<compile_context>
chip_gen: v7x
topology: tpu7x:2x2x1
jax: 0.10.0
libtpu: 0.0.40
codegen_flags: <defaults>
</compile_context>

<pallas_src>
import functools

import numpy as np

import jax
import jax.numpy as jnp
from jax.experimental import pallas as pl
from jax.experimental.pallas import tpu as pltpu


_LANE = 128            # TPU lane width; all GEMM lane dims are padded to this.
_MAX_BATCH_TILE = 128  # samples per grid step (MXU-friendly M, VMEM-safe).


def _round_up(n, m):
    return ((n + m - 1) // m) * m


# -----------------------------------------------------------------------------
# Fused forward kernel: conv3d_1/2/3 -> conv2d_4 -> fc1 -> fc2 -> fc3
# One block of B samples per grid step; everything stays in VMEM.
# -----------------------------------------------------------------------------
def _hybridsn_kernel(x_ref,
                     g1_ref, b1_ref, g2_ref, b2_ref, g3_ref, b3_ref,
                     w4_ref, b4_ref, w5_ref, b5_ref, w6_ref, b6_ref,
                     w7_ref, b7_ref,
                     o_ref,
                     a1_ref, a2_ref, a3_ref, f4_ref, h1_ref, h2_ref,
                     *, B):
    f32 = jnp.float32

    def conv_stage(src_ref, g_ref, b_ref, dst_ref):
        # Activation layout: row = depth * B + sample, lane = (h*W+w)*C + c (0-padded).
        # dst[do*B+b, :] = relu( sum_z  src[(do+z)*B+b, :] @ G[z]  + bias )
        kd = g_ref.shape[0]
        M = dst_ref.shape[0]                              # Do * B
        for z in range(kd):                               # static unroll (<= 7)
            contrib = jnp.dot(src_ref[z * B:z * B + M, :], g_ref[z],
                              preferred_element_type=f32)
            if z == 0:
                dst_ref[...] = contrib
            else:
                dst_ref[...] = dst_ref[...] + contrib
        dst_ref[...] = jnp.maximum(dst_ref[...] + b_ref[...], 0.0)

    conv_stage(x_ref, g1_ref, b1_ref, a1_ref)    # (16B, 128) -> (10B, 256)
    conv_stage(a1_ref, g2_ref, b2_ref, a2_ref)   # (10B, 256) -> ( 6B, 256)
    conv_stage(a2_ref, g3_ref, b3_ref, a3_ref)   # ( 6B, 256) -> ( 4B, 128)

    # conv2d_4 (1x1 conv over 32*4 = 128 features), batched over the sample block.
    # PyTorch's flatten order (c3, d3) is folded into w4 at prep time.
    kd4 = w4_ref.shape[0]
    acc = jnp.dot(a3_ref[0:B, :], w4_ref[0], preferred_element_type=f32)
    for d in range(1, kd4):                               # static unroll (4)
        acc = acc + jnp.dot(a3_ref[d * B:(d + 1) * B, :], w4_ref[d],
                            preferred_element_type=f32)
    f4_ref[...] = jnp.maximum(acc + b4_ref[...], 0.0)     # (B, 128)

    # fc1 / fc2 (+ReLU), fc3 (no activation).
    # TODO(synk): dropout treated as identity (eval mode).
    h1_ref[...] = jnp.maximum(
        jnp.dot(f4_ref[...], w5_ref[...], preferred_element_type=f32) + b5_ref[...],
        0.0)                                              # (B, 256)
    h2_ref[...] = jnp.maximum(
        jnp.dot(h1_ref[...], w6_ref[...], preferred_element_type=f32) + b6_ref[...],
        0.0)                                              # (B, 128)
    o_ref[...] = (jnp.dot(h2_ref[...], w7_ref[...], preferred_element_type=f32)
                  + b7_ref[...])                          # (B, 128)  lane-dense store


# -----------------------------------------------------------------------------
# One-time weight preprocessing (numpy, outside jit / outside the kernel)
# -----------------------------------------------------------------------------
def _conv_toeplitz(w, b, D, H, W, lane=_LANE):
    """Per-depth-tap, lane-padded GEMM matrices for a valid, stride-1 Conv3d.

    w: (Cout, Cin, kd, kh, kw), b: (Cout,).
    Activation layout: A2d[d*B + b, (h*W + w)*Cin + c]  (zero-padded lanes).
    Returns G: (kd, Kp, Np), bias: (1, Np), (Do, Ho, Wo).
    """
    w = np.asarray(w, np.float32)
    b = np.asarray(b, np.float32)
    Cout, Cin, kd, kh, kw = w.shape
    Do, Ho, Wo = D - kd + 1, H - kh + 1, W - kw + 1
    K, Nc = H * W * Cin, Ho * Wo * Cout
    Kp, Np = _round_up(K, lane), _round_up(Nc, lane)
    G = np.zeros((kd, Kp, Np), np.float32)
    for z in range(kd):
        for y in range(kh):
            for x in range(kw):
                blk = w[:, :, z, y, x].T              # (Cin, Cout)
                for ho in range(Ho):
                    for wo in range(Wo):
                        r = ((ho + y) * W + (wo + x)) * Cin
                        c = (ho * Wo + wo) * Cout
                        G[z, r:r + Cin, c:c + Cout] = blk
    bt = np.zeros((1, Np), np.float32)
    bt[0, :Nc] = np.tile(b, Ho * Wo)
    return jnp.asarray(G), jnp.asarray(bt), (Do, Ho, Wo)


def prepare_gemm_params(p, in_shape=(16, 7, 7)):
    """Pack PyTorch-layout params into the fused kernel's padded GEMM layouts."""
    D, H, W = in_shape
    gp = {}
    gp["g1"], gp["b1"], (D1, H1, W1) = _conv_toeplitz(p["c1_w"], p["c1_b"], D, H, W)
    gp["g2"], gp["b2"], (D2, H2, W2) = _conv_toeplitz(p["c2_w"], p["c2_b"], D1, H1, W1)
    gp["g3"], gp["b3"], (D3, H3, W3) = _conv_toeplitz(p["c3_w"], p["c3_b"], D2, H2, W2)
    assert H3 == 1 and W3 == 1, "module requires H = W = 7 input"

    # conv2d_4 (1x1): channels = Cout3 * D3, PyTorch flatten order (c3, d3).
    c3 = p["c3_w"].shape[0]                       # 32
    c4o = p["c4_w"].shape[0]                      # 64
    K4p = _round_up(c3, _LANE)                    # matches g3's padded output width
    N4p = _round_up(c4o, _LANE)
    w4 = np.asarray(p["c4_w"], np.float32).reshape(c4o, c3, D3)
    w4 = np.transpose(w4, (2, 1, 0))              # (d3, c3, out)
    w4p = np.zeros((D3, K4p, N4p), np.float32)
    w4p[:, :c3, :c4o] = w4
    gp["w4"] = jnp.asarray(w4p)
    b4p = np.zeros((1, N4p), np.float32)
    b4p[0, :c4o] = np.asarray(p["c4_b"], np.float32)
    gp["b4"] = jnp.asarray(b4p)

    # FC layers: weights as (in_padded, out_padded), biases as (1, out_padded).
    def fc(wname, bname, in_pad):
        w = np.asarray(p[wname], np.float32)      # PyTorch Linear: (out, in)
        bb = np.asarray(p[bname], np.float32)
        o, i = w.shape
        out_pad = _round_up(o, _LANE)
        wp = np.zeros((in_pad, out_pad), np.float32)
        wp[:i, :o] = w.T
        bp = np.zeros((1, out_pad), np.float32)
        bp[0, :o] = bb
        return jnp.asarray(wp), jnp.asarray(bp)

    gp["w5"], gp["b5"] = fc("fc1_w", "fc1_b", N4p)
    gp["w6"], gp["b6"] = fc("fc2_w", "fc2_b", gp["w5"].shape[1])
    gp["w7"], gp["b7"] = fc("fc3_w", "fc3_b", gp["w6"].shape[1])
    return gp


# -----------------------------------------------------------------------------
# HybridSN parameters (deterministic synthetic init, PyTorch layouts)
# -----------------------------------------------------------------------------
def init_params(key, class_num):
    keys = jax.random.split(key, 14)

    def winit(k, shape, fan_in):
        return (jax.random.normal(k, shape, jnp.float32)
                / np.sqrt(float(fan_in))).astype(jnp.float32)

    p = {}
    p["c1_w"] = winit(keys[0], (8, 1, 7, 3, 3), 1 * 7 * 3 * 3)
    p["c1_b"] = winit(keys[1], (8,), 8)
    p["c2_w"] = winit(keys[2], (16, 8, 5, 3, 3), 8 * 5 * 3 * 3)
    p["c2_b"] = winit(keys[3], (16,), 16)
    p["c3_w"] = winit(keys[4], (32, 16, 3, 3, 3), 16 * 3 * 3 * 3)
    p["c3_b"] = winit(keys[5], (32,), 32)
    p["c4_w"] = winit(keys[6], (64, 128, 1, 1), 128)
    p["c4_b"] = winit(keys[7], (64,), 64)
    p["fc1_w"] = winit(keys[8], (256, 64), 64)        # PyTorch Linear: (out, in)
    p["fc1_b"] = winit(keys[9], (256,), 256)
    p["fc2_w"] = winit(keys[10], (128, 256), 256)
    p["fc2_b"] = winit(keys[11], (128,), 128)
    p["fc3_w"] = winit(keys[12], (class_num, 128), 128)
    p["fc3_b"] = winit(keys[13], (class_num,), class_num)
    return p


# -----------------------------------------------------------------------------
# Forward pass (single fused pallas_call, grid over batch blocks)
# -----------------------------------------------------------------------------
def hybridsn_forward(gp, x, class_num):
    """gp: preprocessed GEMM params; x: (N, 1, 16, 7, 7) float32 -> (N, class_num)."""
    N, Cin, D, H, W = x.shape
    assert Cin == 1
    HW = H * W

    kd1 = gp["g1"].shape[0]
    kd2 = gp["g2"].shape[0]
    kd3 = gp["g3"].shape[0]
    D1 = D - kd1 + 1
    D2 = D1 - kd2 + 1
    D3 = D2 - kd3 + 1

    K1p = gp["g1"].shape[1]
    N1p = gp["g1"].shape[2]
    N2p = gp["g2"].shape[2]
    N3p = gp["g3"].shape[2]
    F4p = gp["w4"].shape[2]
    H1p = gp["w5"].shape[1]
    H2p = gp["w6"].shape[1]
    Cp = gp["w7"].shape[1]
    assert Cp >= class_num

    # Batch tile: fold B samples into the GEMM M dimension each grid step.
    B = min(_MAX_BATCH_TILE, _round_up(N, 8))
    G = -(-N // B)
    Npad = G * B

    # Pack input into the kernel layout: per grid step a (D*B, K1p) slab with
    # row = depth*B + sample and zero-padded spatial lanes (49 -> 128).
    x2 = x.reshape(N, D, HW).astype(jnp.float32)
    x2 = jnp.pad(x2, ((0, Npad - N), (0, 0), (0, K1p - HW)))
    x2 = x2.reshape(G, B, D, K1p).transpose(0, 2, 1, 3).reshape(G * D * B, K1p)

    def const_spec(a):
        nd = a.ndim
        return pl.BlockSpec(a.shape, lambda g: (0,) * nd)

    in_specs = [pl.BlockSpec((D * B, K1p), lambda g: (g, 0))] + [
        const_spec(gp[k]) for k in
        ("g1", "b1", "g2", "b2", "g3", "b3",
         "w4", "b4", "w5", "b5", "w6", "b6", "w7", "b7")]

    out = pl.pallas_call(
        functools.partial(_hybridsn_kernel, B=B),
        out_shape=jax.ShapeDtypeStruct((Npad, Cp), jnp.float32),
        grid=(G,),
        in_specs=in_specs,
        out_specs=pl.BlockSpec((B, Cp), lambda g: (g, 0)),
        scratch_shapes=[
            pltpu.VMEM((D1 * B, N1p), jnp.float32),   # conv3d_1 output
            pltpu.VMEM((D2 * B, N2p), jnp.float32),   # conv3d_2 output
            pltpu.VMEM((D3 * B, N3p), jnp.float32),   # conv3d_3 output
            pltpu.VMEM((B, F4p), jnp.float32),        # conv2d_4 output
            pltpu.VMEM((B, H1p), jnp.float32),        # fc1 output
            pltpu.VMEM((B, H2p), jnp.float32),        # fc2 output
        ],
        compiler_params=pltpu.CompilerParams(
            dimension_semantics=("parallel",),
            vmem_limit_bytes=32 * 1024 * 1024),
    )(x2, gp["g1"], gp["b1"], gp["g2"], gp["b2"], gp["g3"], gp["b3"],
      gp["w4"], gp["b4"], gp["w5"], gp["b5"], gp["w6"], gp["b6"],
      gp["w7"], gp["b7"])
    return out[:N, :class_num]


# -----------------------------------------------------------------------------
# Pure-JAX reference (same math as the PyTorch module, eval mode)
# -----------------------------------------------------------------------------
def hybridsn_reference(p, x):
    with jax.default_matmul_precision("float32"):
        def conv3d(v, w, b):
            y = jax.lax.conv_general_dilated(
                v, w, window_strides=(1, 1, 1), padding="VALID",
                dimension_numbers=("NCDHW", "OIDHW", "NCDHW"))
            return jax.nn.relu(y + b.reshape(1, -1, 1, 1, 1))

        out = conv3d(x, p["c1_w"], p["c1_b"])
        out = conv3d(out, p["c2_w"], p["c2_b"])
        out = conv3d(out, p["c3_w"], p["c3_b"])
        n, c, d, h, w = out.shape
        out = out.reshape(n, c * d, h, w)
        out = jax.lax.conv_general_dilated(
            out, p["c4_w"], window_strides=(1, 1), padding="VALID",
            dimension_numbers=("NCHW", "OIHW", "NCHW"))
        out = jax.nn.relu(out + p["c4_b"].reshape(1, -1, 1, 1))
        out = out.reshape(n, -1)
        out = jax.nn.relu(out @ p["fc1_w"].T + p["fc1_b"])
        out = jax.nn.relu(out @ p["fc2_w"].T + p["fc2_b"])
        return out @ p["fc3_w"].T + p["fc3_b"]


if __name__ == "__main__":
    class_num = 16
    key = jax.random.PRNGKey(0)
    k_params, k_x = jax.random.split(key)

    params = init_params(k_params, class_num)          # PyTorch-layout params
    gemm_params = prepare_gemm_params(params)          # one-time weight packing

    # Input shape forced by the module architecture: (N, 1, D=16, H=7, W=7)
    x = jax.random.normal(k_x, (2, 1, 16, 7, 7), jnp.float32)

    fwd = jax.jit(hybridsn_forward, static_argnames=("class_num",))
    y = fwd(gemm_params, x, class_num=class_num)
    jax.block_until_ready(y)

    assert y.shape == (2, class_num)
    assert bool(jnp.all(jnp.isfinite(y)))

    # Correctness check against a plain-JAX implementation of the module.
    y_ref = hybridsn_reference(params, x)
    max_err = float(jnp.max(jnp.abs(y - y_ref)))
    assert bool(jnp.allclose(y, y_ref, rtol=3e-2, atol=3e-2)), max_err

    print("KERNEL_OK")
</pallas_src>

<mosaic_0001>
module attributes {stable_mosaic.version = 11 : i64} {
  func.func @_hybridsn_kernel(%arg0: i32, %arg1: memref<128x128xf32, #tpu.memory_space<vmem>>, %arg2: memref<7x128x256xf32, #tpu.memory_space<vmem>>, %arg3: memref<1x256xf32, #tpu.memory_space<vmem>>, %arg4: memref<5x256x256xf32, #tpu.memory_space<vmem>>, %arg5: memref<1x256xf32, #tpu.memory_space<vmem>>, %arg6: memref<3x256x128xf32, #tpu.memory_space<vmem>>, %arg7: memref<1x128xf32, #tpu.memory_space<vmem>>, %arg8: memref<4x128x128xf32, #tpu.memory_space<vmem>>, %arg9: memref<1x128xf32, #tpu.memory_space<vmem>>, %arg10: memref<128x256xf32, #tpu.memory_space<vmem>>, %arg11: memref<1x256xf32, #tpu.memory_space<vmem>>, %arg12: memref<256x128xf32, #tpu.memory_space<vmem>>, %arg13: memref<1x128xf32, #tpu.memory_space<vmem>>, %arg14: memref<128x128xf32, #tpu.memory_space<vmem>>, %arg15: memref<1x128xf32, #tpu.memory_space<vmem>>, %arg16: memref<8x128xf32, #tpu.memory_space<vmem>>, %arg17: memref<80x256xf32, #tpu.memory_space<vmem>>, %arg18: memref<48x256xf32, #tpu.memory_space<vmem>>, %arg19: memref<32x128xf32, #tpu.memory_space<vmem>>, %arg20: memref<8x128xf32, #tpu.memory_space<vmem>>, %arg21: memref<8x256xf32, #tpu.memory_space<vmem>>, %arg22: memref<8x128xf32, #tpu.memory_space<vmem>>) attributes {dimension_semantics = [#tpu.dimension_semantics<parallel>], iteration_bounds = array<i64: 1>, scalar_prefetch = 0 : i64, scratch_operands = 6 : i64, tpu.core_type = #tpu.core_type<tc>, window_params = [{transform_indices = @transform_0, window_bounds = array<i64: 128, 128>}, {pipeline_mode = #tpu.pipeline_mode<synchronous>, transform_indices = @transform_1, window_bounds = array<i64: 7, 128, 256>}, {pipeline_mode = #tpu.pipeline_mode<synchronous>, transform_indices = @transform_2, window_bounds = array<i64: 1, 256>}, {pipeline_mode = #tpu.pipeline_mode<synchronous>, transform_indices = @transform_3, window_bounds = array<i64: 5, 256, 256>}, {pipeline_mode = #tpu.pipeline_mode<synchronous>, transform_indices = @transform_4, window_bounds = array<i64: 1, 256>}, {pipeline_mode = #tpu.pipeline_mode<synchronous>, transform_indices = @transform_5, window_bounds = array<i64: 3, 256, 128>}, {pipeline_mode = #tpu.pipeline_mode<synchronous>, transform_indices = @transform_6, window_bounds = array<i64: 1, 128>}, {pipeline_mode = #tpu.pipeline_mode<synchronous>, transform_indices = @transform_7, window_bounds = array<i64: 4, 128, 128>}, {pipeline_mode = #tpu.pipeline_mode<synchronous>, transform_indices = @transform_8, window_bounds = array<i64: 1, 128>}, {pipeline_mode = #tpu.pipeline_mode<synchronous>, transform_indices = @transform_9, window_bounds = array<i64: 128, 256>}, {pipeline_mode = #tpu.pipeline_mode<synchronous>, transform_indices = @transform_10, window_bounds = array<i64: 1, 256>}, {pipeline_mode = #tpu.pipeline_mode<synchronous>, transform_indices = @transform_11, window_bounds = array<i64: 256, 128>}, {pipeline_mode = #tpu.pipeline_mode<synchronous>, transform_indices = @transform_12, window_bounds = array<i64: 1, 128>}, {pipeline_mode = #tpu.pipeline_mode<synchronous>, transform_indices = @transform_13, window_bounds = array<i64: 128, 128>}, {pipeline_mode = #tpu.pipeline_mode<synchronous>, transform_indices = @transform_14, window_bounds = array<i64: 1, 128>}, {transform_indices = @transform_15, window_bounds = array<i64: 8, 128>}]} {
    %c0 = arith.constant 0 : index
    %c0_0 = arith.constant 0 : index
    %0 = vector.load %arg1[%c0, %c0_0] : memref<128x128xf32, #tpu.memory_space<vmem>>, vector<80x128xf32>
    %c0_1 = arith.constant 0 : index
    %c0_2 = arith.constant 0 : index
    %c0_3 = arith.constant 0 : index
    %1 = vector.load %arg2[%c0_1, %c0_2, %c0_3] : memref<7x128x256xf32, #tpu.memory_space<vmem>>, vector<1x128x256xf32>
    %2 = vector.shape_cast %1 : vector<1x128x256xf32> to vector<128x256xf32>
    %cst = arith.constant dense<0.000000e+00> : vector<80x256xf32>
    %3 = tpu.matmul %0, %2, %cst {dimension_numbers = #tpu.dot_dimension_numbers<[1], [0], [0], [1], [0, 0, 1, 1], [], []>} : vector<80x128xf32>, vector<128x256xf32>, vector<80x256xf32> -> vector<80x256xf32>
    %c0_4 = arith.constant 0 : index
    %c0_5 = arith.constant 0 : index
    %4 = vector.load %arg17[%c0_4, %c0_5] : memref<80x256xf32, #tpu.memory_space<vmem>>, vector<80x256xf32>
    tpu.vector_store %arg17[%c0_4, %c0_5], %3 {strides = array<i32>} : memref<80x256xf32, #tpu.memory_space<vmem>>, vector<80x256xf32>,
    %c8 = arith.constant 8 : index
    %c0_6 = arith.constant 0 : index
    %5 = vector.load %arg1[%c8, %c0_6] : memref<128x128xf32, #tpu.memory_space<vmem>>, vector<80x128xf32>
    %c1 = arith.constant 1 : index
    %c0_7 = arith.constant 0 : index
    %c0_8 = arith.constant 0 : index
    %6 = vector.load %arg2[%c1, %c0_7, %c0_8] : memref<7x128x256xf32, #tpu.memory_space<vmem>>, vector<1x128x256xf32>
    %7 = vector.shape_cast %6 : vector<1x128x256xf32> to vector<128x256xf32>
    %cst_9 = arith.constant dense<0.000000e+00> : vector<80x256xf32>
    %8 = tpu.matmul %5, %7, %cst_9 {dimension_numbers = #tpu.dot_dimension_numbers<[1], [0], [0], [1], [0, 0, 1, 1], [], []>} : vector<80x128xf32>, vector<128x256xf32>, vector<80x256xf32> -> vector<80x256xf32>
    %c0_10 = arith.constant 0 : index
    %c0_11 = arith.constant 0 : index
    %9 = vector.load %arg17[%c0_10, %c0_11] : memref<80x256xf32, #tpu.memory_space<vmem>>, vector<80x256xf32>
    %10 = arith.addf %9, %8 : vector<80x256xf32>
    %c0_12 = arith.constant 0 : index
    %c0_13 = arith.constant 0 : index
    %11 = vector.load %arg17[%c0_12, %c0_13] : memref<80x256xf32, #tpu.memory_space<vmem>>, vector<80x256xf32>
    tpu.vector_store %arg17[%c0_12, %c0_13], %10 {strides = array<i32>} : memref<80x256xf32, #tpu.memory_space<vmem>>, vector<80x256xf32>,
    %c16 = arith.constant 16 : index
    %c0_14 = arith.constant 0 : index
    %12 = vector.load %arg1[%c16, %c0_14] : memref<128x128xf32, #tpu.memory_space<vmem>>, vector<80x128xf32>
    %c2 = arith.constant 2 : index
    %c0_15 = arith.constant 0 : index
    %c0_16 = arith.constant 0 : index
    %13 = vector.load %arg2[%c2, %c0_15, %c0_16] : memref<7x128x256xf32, #tpu.memory_space<vmem>>, vector<1x128x256xf32>
    %14 = vector.shape_cast %13 : vector<1x128x256xf32> to vector<128x256xf32>
    %cst_17 = arith.constant dense<0.000000e+00> : vector<80x256xf32>
    %15 = tpu.matmul %12, %14, %cst_17 {dimension_numbers = #tpu.dot_dimension_numbers<[1], [0], [0], [1], [0, 0, 1, 1], [], []>} : vector<80x128xf32>, vector<128x256xf32>, vector<80x256xf32> -> vector<80x256xf32>
    %c0_18 = arith.constant 0 : index
    %c0_19 = arith.constant 0 : index
    %16 = vector.load %arg17[%c0_18, %c0_19] : memref<80x256xf32, #tpu.memory_space<vmem>>, vector<80x256xf32>
    %17 = arith.addf %16, %15 : vector<80x256xf32>
    %c0_20 = arith.constant 0 : index
    %c0_21 = arith.constant 0 : index
    %18 = vector.load %arg17[%c0_20, %c0_21] : memref<80x256xf32, #tpu.memory_space<vmem>>, vector<80x256xf32>
    tpu.vector_store %arg17[%c0_20, %c0_21], %17 {strides = array<i32>} : memref<80x256xf32, #tpu.memory_space<vmem>>, vector<80x256xf32>,
    %c24 = arith.constant 24 : index
    %c0_22 = arith.constant 0 : index
    %19 = vector.load %arg1[%c24, %c0_22] : memref<128x128xf32, #tpu.memory_space<vmem>>, vector<80x128xf32>
    %c3 = arith.constant 3 : index
    %c0_23 = arith.constant 0 : index
    %c0_24 = arith.constant 0 : index
    %20 = vector.load %arg2[%c3, %c0_23, %c0_24] : memref<7x128x256xf32, #tpu.memory_space<vmem>>, vector<1x128x256xf32>
    %21 = vector.shape_cast %20 : vector<1x128x256xf32> to vector<128x256xf32>
    %cst_25 = arith.constant dense<0.000000e+00> : vector<80x256xf32>
    %22 = tpu.matmul %19, %21, %cst_25 {dimension_numbers = #tpu.dot_dimension_numbers<[1], [0], [0], [1], [0, 0, 1, 1], [], []>} : vector<80x128xf32>, vector<128x256xf32>, vector<80x256xf32> -> vector<80x256xf32>
    %c0_26 = arith.constant 0 : index
    %c0_27 = arith.constant 0 : index
    %23 = vector.load %arg17[%c0_26, %c0_27] : memref<80x256xf32, #tpu.memory_space<vmem>>, vector<80x256xf32>
    %24 = arith.addf %23, %22 : vector<80x256xf32>
    %c0_28 = arith.constant 0 : index
    %c0_29 = arith.constant 0 : index
    %25 = vector.load %arg17[%c0_28, %c0_29] : memref<80x256xf32, #tpu.memory_space<vmem>>, vector<80x256xf32>
    tpu.vector_store %arg17[%c0_28, %c0_29], %24 {strides = array<i32>} : memref<80x256xf32, #tpu.memory_space<vmem>>, vector<80x256xf32>,
    %c32 = arith.constant 32 : index
    %c0_30 = arith.constant 0 : index
    %26 = vector.load %arg1[%c32, %c0_30] : memref<128x128xf32, #tpu.memory_space<vmem>>, vector<80x128xf32>
    %c4 = arith.constant 4 : index
    %c0_31 = arith.constant 0 : index
    %c0_32 = arith.constant 0 : index
    %27 = vector.load %arg2[%c4, %c0_31, %c0_32] : memref<7x128x256xf32, #tpu.memory_space<vmem>>, vector<1x128x256xf32>
    %28 = vector.shape_cast %27 : vector<1x128x256xf32> to vector<128x256xf32>
    %cst_33 = arith.constant dense<0.000000e+00> : vector<80x256xf32>
    %29 = tpu.matmul %26, %28, %cst_33 {dimension_numbers = #tpu.dot_dimension_numbers<[1], [0], [0], [1], [0, 0, 1, 1], [], []>} : vector<80x128xf32>, vector<128x256xf32>, vector<80x256xf32> -> vector<80x256xf32>
    %c0_34 = arith.constant 0 : index
    %c0_35 = arith.constant 0 : index
    %30 = vector.load %arg17[%c0_34, %c0_35] : memref<80x256xf32, #tpu.memory_space<vmem>>, vector<80x256xf32>
    %31 = arith.addf %30, %29 : vector<80x256xf32>
    %c0_36 = arith.constant 0 : index
    %c0_37 = arith.constant 0 : index
    %32 = vector.load %arg17[%c0_36, %c0_37] : memref<80x256xf32, #tpu.memory_space<vmem>>, vector<80x256xf32>
    tpu.vector_store %arg17[%c0_36, %c0_37], %31 {strides = array<i32>} : memref<80x256xf32, #tpu.memory_space<vmem>>, vector<80x256xf32>,
    %c40 = arith.constant 40 : index
    %c0_38 = arith.constant 0 : index
    %33 = vector.load %arg1[%c40, %c0_38] : memref<128x128xf32, #tpu.memory_space<vmem>>, vector<80x128xf32>
    %c5 = arith.constant 5 : index
    %c0_39 = arith.constant 0 : index
    %c0_40 = arith.constant 0 : index
    %34 = vector.load %arg2[%c5, %c0_39, %c0_40] : memref<7x128x256xf32, #tpu.memory_space<vmem>>, vector<1x128x256xf32>
    %35 = vector.shape_cast %34 : vector<1x128x256xf32> to vector<128x256xf32>
    %cst_41 = arith.constant dense<0.000000e+00> : vector<80x256xf32>
    %36 = tpu.matmul %33, %35, %cst_41 {dimension_numbers = #tpu.dot_dimension_numbers<[1], [0], [0], [1], [0, 0, 1, 1], [], []>} : vector<80x128xf32>, vector<128x256xf32>, vector<80x256xf32> -> vector<80x256xf32>
    %c0_42 = arith.constant 0 : index
    %c0_43 = arith.constant 0 : index
    %37 = vector.load %arg17[%c0_42, %c0_43] : memref<80x256xf32, #tpu.memory_space<vmem>>, vector<80x256xf32>
    %38 = arith.addf %37, %36 : vector<80x256xf32>
    %c0_44 = arith.constant 0 : index
    %c0_45 = arith.constant 0 : index
    %39 = vector.load %arg17[%c0_44, %c0_45] : memref<80x256xf32, #tpu.memory_space<vmem>>, vector<80x256xf32>
    tpu.vector_store %arg17[%c0_44, %c0_45], %38 {strides = array<i32>} : memref<80x256xf32, #tpu.memory_space<vmem>>, vector<80x256xf32>,
    %c48 = arith.constant 48 : index
    %c0_46 = arith.constant 0 : index
    %40 = vector.load %arg1[%c48, %c0_46] : memref<128x128xf32, #tpu.memory_space<vmem>>, vector<80x128xf32>
    %c6 = arith.constant 6 : index
    %c0_47 = arith.constant 0 : index
    %c0_48 = arith.constant 0 : index
    %41 = vector.load %arg2[%c6, %c0_47, %c0_48] : memref<7x128x256xf32, #tpu.memory_space<vmem>>, vector<1x128x256xf32>
    %42 = vector.shape_cast %41 : vector<1x128x256xf32> to vector<128x256xf32>
    %cst_49 = arith.constant dense<0.000000e+00> : vector<80x256xf32>
    %43 = tpu.matmul %40, %42, %cst_49 {dimension_numbers = #tpu.dot_dimension_numbers<[1], [0], [0], [1], [0, 0, 1, 1], [], []>} : vector<80x128xf32>, vector<128x256xf32>, vector<80x256xf32> -> vector<80x256xf32>
    %c0_50 = arith.constant 0 : index
    %c0_51 = arith.constant 0 : index
    %44 = vector.load %arg17[%c0_50, %c0_51] : memref<80x256xf32, #tpu.memory_space<vmem>>, vector<80x256xf32>
    %45 = arith.addf %44, %43 : vector<80x256xf32>
    %c0_52 = arith.constant 0 : index
    %c0_53 = arith.constant 0 : index
    %46 = vector.load %arg17[%c0_52, %c0_53] : memref<80x256xf32, #tpu.memory_space<vmem>>, vector<80x256xf32>
    tpu.vector_store %arg17[%c0_52, %c0_53], %45 {strides = array<i32>} : memref<80x256xf32, #tpu.memory_space<vmem>>, vector<80x256xf32>,
    %c0_54 = arith.constant 0 : index
    %c0_55 = arith.constant 0 : index
    %47 = vector.load %arg17[%c0_54, %c0_55] : memref<80x256xf32, #tpu.memory_space<vmem>>, vector<80x256xf32>
    %c0_56 = arith.constant 0 : index
    %c0_57 = arith.constant 0 : index
    %48 = vector.load %arg3[%c0_56, %c0_57] : memref<1x256xf32, #tpu.memory_space<vmem>>, vector<1x256xf32>
    %49 = vector.broadcast %48 : vector<1x256xf32> to vector<80x256xf32>
    %50 = arith.addf %47, %49 : vector<80x256xf32>
    %cst_58 = arith.constant 0.000000e+00 : f32
    %51 = vector.broadcast %cst_58 : f32 to vector<80x256xf32>
    %52 = arith.maximumf %50, %51 : vector<80x256xf32>
    %c0_59 = arith.constant 0 : index
    %c0_60 = arith.constant 0 : index
    %53 = vector.load %arg17[%c0_59, %c0_60] : memref<80x256xf32, #tpu.memory_space<vmem>>, vector<80x256xf32>
    tpu.vector_store %arg17[%c0_59, %c0_60], %52 {strides = array<i32>} : memref<80x256xf32, #tpu.memory_space<vmem>>, vector<80x256xf32>,
    %c0_61 = arith.constant 0 : index
    %c0_62 = arith.constant 0 : index
    %54 = vector.load %arg17[%c0_61, %c0_62] : memref<80x256xf32, #tpu.memory_space<vmem>>, vector<48x256xf32>
    %c0_63 = arith.constant 0 : index
    %c0_64 = arith.constant 0 : index
    %c0_65 = arith.constant 0 : index
    %55 = vector.load %arg4[%c0_63, %c0_64, %c0_65] : memref<5x256x256xf32, #tpu.memory_space<vmem>>, vector<1x256x256xf32>
    %56 = vector.shape_cast %55 : vector<1x256x256xf32> to vector<256x256xf32>
    %cst_66 = arith.constant dense<0.000000e+00> : vector<48x256xf32>
    %57 = tpu.matmul %54, %56, %cst_66 {dimension_numbers = #tpu.dot_dimension_numbers<[1], [0], [0], [1], [0, 0, 1, 1], [], []>} : vector<48x256xf32>, vector<256x256xf32>, vector<48x256xf32> -> vector<48x256xf32>
    %c0_67 = arith.constant 0 : index
    %c0_68 = arith.constant 0 : index
    %58 = vector.load %arg18[%c0_67, %c0_68] : memref<48x256xf32, #tpu.memory_space<vmem>>, vector<48x256xf32>
    tpu.vector_store %arg18[%c0_67, %c0_68], %57 {strides = array<i32>} : memref<48x256xf32, #tpu.memory_space<vmem>>, vector<48x256xf32>,
    %c8_69 = arith.constant 8 : index
    %c0_70 = arith.constant 0 : index
    %59 = vector.load %arg17[%c8_69, %c0_70] : memref<80x256xf32, #tpu.memory_space<vmem>>, vector<48x256xf32>
    %c1_71 = arith.constant 1 : index
    %c0_72 = arith.constant 0 : index
    %c0_73 = arith.constant 0 : index
    %60 = vector.load %arg4[%c1_71, %c0_72, %c0_73] : memref<5x256x256xf32, #tpu.memory_space<vmem>>, vector<1x256x256xf32>
    %61 = vector.shape_cast %60 : vector<1x256x256xf32> to vector<256x256xf32>
    %cst_74 = arith.constant dense<0.000000e+00> : vector<48x256xf32>
    %62 = tpu.matmul %59, %61, %cst_74 {dimension_numbers = #tpu.dot_dimension_numbers<[1], [0], [0], [1], [0, 0, 1, 1], [], []>} : vector<48x256xf32>, vector<256x256xf32>, vector<48x256xf32> -> vector<48x256xf32>
    %c0_75 = arith.constant 0 : index
    %c0_76 = arith.constant 0 : index
    %63 = vector.load %arg18[%c0_75, %c0_76] : memref<48x256xf32, #tpu.memory_space<vmem>>, vector<48x256xf32>
    %64 = arith.addf %63, %62 : vector<48x256xf32>
    %c0_77 = arith.constant 0 : index
    %c0_78 = arith.constant 0 : index
    %65 = vector.load %arg18[%c0_77, %c0_78] : memref<48x256xf32, #tpu.memory_space<vmem>>, vector<48x256xf32>
    tpu.vector_store %arg18[%c0_77, %c0_78], %64 {strides = array<i32>} : memref<48x256xf32, #tpu.memory_space<vmem>>, vector<48x256xf32>,
    %c16_79 = arith.constant 16 : index
    %c0_80 = arith.constant 0 : index
    %66 = vector.load %arg17[%c16_79, %c0_80] : memref<80x256xf32, #tpu.memory_space<vmem>>, vector<48x256xf32>
    %c2_81 = arith.constant 2 : index
    %c0_82 = arith.constant 0 : index
    %c0_83 = arith.constant 0 : index
    %67 = vector.load %arg4[%c2_81, %c0_82, %c0_83] : memref<5x256x256xf32, #tpu.memory_space<vmem>>, vector<1x256x256xf32>
    %68 = vector.shape_cast %67 : vector<1x256x256xf32> to vector<256x256xf32>
    %cst_84 = arith.constant dense<0.000000e+00> : vector<48x256xf32>
    %69 = tpu.matmul %66, %68, %cst_84 {dimension_numbers = #tpu.dot_dimension_numbers<[1], [0], [0], [1], [0, 0, 1, 1], [], []>} : vector<48x256xf32>, vector<256x256xf32>, vector<48x256xf32> -> vector<48x256xf32>
    %c0_85 = arith.constant 0 : index
    %c0_86 = arith.constant 0 : index
    %70 = vector.load %arg18[%c0_85, %c0_86] : memref<48x256xf32, #tpu.memory_space<vmem>>, vector<48x256xf32>
    %71 = arith.addf %70, %69 : vector<48x256xf32>
    %c0_87 = arith.constant 0 : index
    %c0_88 = arith.constant 0 : index
    %72 = vector.load %arg18[%c0_87, %c0_88] : memref<48x256xf32, #tpu.memory_space<vmem>>, vector<48x256xf32>
    tpu.vector_store %arg18[%c0_87, %c0_88], %71 {strides = array<i32>} : memref<48x256xf32, #tpu.memory_space<vmem>>, vector<48x256xf32>,
    %c24_89 = arith.constant 24 : index
    %c0_90 = arith.constant 0 : index
    %73 = vector.load %arg17[%c24_89, %c0_90] : memref<80x256xf32, #tpu.memory_space<vmem>>, vector<48x256xf32>
    %c3_91 = arith.constant 3 : index
    %c0_92 = arith.constant 0 : index
    %c0_93 = arith.constant 0 : index
    %74 = vector.load %arg4[%c3_91, %c0_92, %c0_93] : memref<5x256x256xf32, #tpu.memory_space<vmem>>, vector<1x256x256xf32>
    %75 = vector.shape_cast %74 : vector<1x256x256xf32> to vector<256x256xf32>
    %cst_94 = arith.constant dense<0.000000e+00> : vector<48x256xf32>
    %76 = tpu.matmul %73, %75, %cst_94 {dimension_numbers = #tpu.dot_dimension_numbers<[1], [0], [0], [1], [0, 0, 1, 1], [], []>} : vector<48x256xf32>, vector<256x256xf32>, vector<48x256xf32> -> vector<48x256xf32>
    %c0_95 = arith.constant 0 : index
    %c0_96 = arith.constant 0 : index
    %77 = vector.load %arg18[%c0_95, %c0_96] : memref<48x256xf32, #tpu.memory_space<vmem>>, vector<48x256xf32>
    %78 = arith.addf %77, %76 : vector<48x256xf32>
    %c0_97 = arith.constant 0 : index
    %c0_98 = arith.constant 0 : index
    %79 = vector.load %arg18[%c0_97, %c0_98] : memref<48x256xf32, #tpu.memory_space<vmem>>, vector<48x256xf32>
    tpu.vector_store %arg18[%c0_97, %c0_98], %78 {strides = array<i32>} : memref<48x256xf32, #tpu.memory_space<vmem>>, vector<48x256xf32>,
    %c32_99 = arith.constant 32 : index
    %c0_100 = arith.constant 0 : index
    %80 = vector.load %arg17[%c32_99, %c0_100] : memref<80x256xf32, #tpu.memory_space<vmem>>, vector<48x256xf32>
    %c4_101 = arith.constant 4 : index
    %c0_102 = arith.constant 0 : index
    %c0_103 = arith.constant 0 : index
    %81 = vector.load %arg4[%c4_101, %c0_102, %c0_103] : memref<5x256x256xf32, #tpu.memory_space<vmem>>, vector<1x256x256xf32>
    %82 = vector.shape_cast %81 : vector<1x256x256xf32> to vector<256x256xf32>
    %cst_104 = arith.constant dense<0.000000e+00> : vector<48x256xf32>
    %83 = tpu.matmul %80, %82, %cst_104 {dimension_numbers = #tpu.dot_dimension_numbers<[1], [0], [0], [1], [0, 0, 1, 1], [], []>} : vector<48x256xf32>, vector<256x256xf32>, vector<48x256xf32> -> vector<48x256xf32>
    %c0_105 = arith.constant 0 : index
    %c0_106 = arith.constant 0 : index
    %84 = vector.load %arg18[%c0_105, %c0_106] : memref<48x256xf32, #tpu.memory_space<vmem>>, vector<48x256xf32>
    %85 = arith.addf %84, %83 : vector<48x256xf32>
    %c0_107 = arith.constant 0 : index
    %c0_108 = arith.constant 0 : index
    %86 = vector.load %arg18[%c0_107, %c0_108] : memref<48x256xf32, #tpu.memory_space<vmem>>, vector<48x256xf32>
    tpu.vector_store %arg18[%c0_107, %c0_108], %85 {strides = array<i32>} : memref<48x256xf32, #tpu.memory_space<vmem>>, vector<48x256xf32>,
    %c0_109 = arith.constant 0 : index
    %c0_110 = arith.constant 0 : index
    %87 = vector.load %arg18[%c0_109, %c0_110] : memref<48x256xf32, #tpu.memory_space<vmem>>, vector<48x256xf32>
    %c0_111 = arith.constant 0 : index
    %c0_112 = arith.constant 0 : index
    %88 = vector.load %arg5[%c0_111, %c0_112] : memref<1x256xf32, #tpu.memory_space<vmem>>, vector<1x256xf32>
    %89 = vector.broadcast %88 : vector<1x256xf32> to vector<48x256xf32>
    %90 = arith.addf %87, %89 : vector<48x256xf32>
    %cst_113 = arith.constant 0.000000e+00 : f32
    %91 = vector.broadcast %cst_113 : f32 to vector<48x256xf32>
    %92 = arith.maximumf %90, %91 : vector<48x256xf32>
    %c0_114 = arith.constant 0 : index
    %c0_115 = arith.constant 0 : index
    %93 = vector.load %arg18[%c0_114, %c0_115] : memref<48x256xf32, #tpu.memory_space<vmem>>, vector<48x256xf32>
    tpu.vector_store %arg18[%c0_114, %c0_115], %92 {strides = array<i32>} : memref<48x256xf32, #tpu.memory_space<vmem>>, vector<48x256xf32>,
    %c0_116 = arith.constant 0 : index
    %c0_117 = arith.constant 0 : index
    %94 = vector.load %arg18[%c0_116, %c0_117] : memref<48x256xf32, #tpu.memory_space<vmem>>, vector<32x256xf32>
    %c0_118 = arith.constant 0 : index
    %c0_119 = arith.constant 0 : index
    %c0_120 = arith.constant 0 : index
    %95 = vector.load %arg6[%c0_118, %c0_119, %c0_120] : memref<3x256x128xf32, #tpu.memory_space<vmem>>, vector<1x256x128xf32>
    %96 = vector.shape_cast %95 : vector<1x256x128xf32> to vector<256x128xf32>
    %cst_121 = arith.constant dense<0.000000e+00> : vector<32x128xf32>
    %97 = tpu.matmul %94, %96, %cst_121 {dimension_numbers = #tpu.dot_dimension_numbers<[1], [0], [0], [1], [0, 0, 1, 1], [], []>} : vector<32x256xf32>, vector<256x128xf32>, vector<32x128xf32> -> vector<32x128xf32>
    %c0_122 = arith.constant 0 : index
    %c0_123 = arith.constant 0 : index
    %98 = vector.load %arg19[%c0_122, %c0_123] : memref<32x128xf32, #tpu.memory_space<vmem>>, vector<32x128xf32>
    tpu.vector_store %arg19[%c0_122, %c0_123], %97 {strides = array<i32>} : memref<32x128xf32, #tpu.memory_space<vmem>>, vector<32x128xf32>,
    %c8_124 = arith.constant 8 : index
    %c0_125 = arith.constant 0 : index
    %99 = vector.load %arg18[%c8_124, %c0_125] : memref<48x256xf32, #tpu.memory_space<vmem>>, vector<32x256xf32>
    %c1_126 = arith.constant 1 : index
    %c0_127 = arith.constant 0 : index
    %c0_128 = arith.constant 0 : index
    %100 = vector.load %arg6[%c1_126, %c0_127, %c0_128] : memref<3x256x128xf32, #tpu.memory_space<vmem>>, vector<1x256x128xf32>
    %101 = vector.shape_cast %100 : vector<1x256x128xf32> to vector<256x128xf32>
    %cst_129 = arith.constant dense<0.000000e+00> : vector<32x128xf32>
    %102 = tpu.matmul %99, %101, %cst_129 {dimension_numbers = #tpu.dot_dimension_numbers<[1], [0], [0], [1], [0, 0, 1, 1], [], []>} : vector<32x256xf32>, vector<256x128xf32>, vector<32x128xf32> -> vector<32x128xf32>
    %c0_130 = arith.constant 0 : index
    %c0_131 = arith.constant 0 : index
    %103 = vector.load %arg19[%c0_130, %c0_131] : memref<32x128xf32, #tpu.memory_space<vmem>>, vector<32x128xf32>
    %104 = arith.addf %103, %102 : vector<32x128xf32>
    %c0_132 = arith.constant 0 : index
    %c0_133 = arith.constant 0 : index
    %105 = vector.load %arg19[%c0_132, %c0_133] : memref<32x128xf32, #tpu.memory_space<vmem>>, vector<32x128xf32>
    tpu.vector_store %arg19[%c0_132, %c0_133], %104 {strides = array<i32>} : memref<32x128xf32, #tpu.memory_space<vmem>>, vector<32x128xf32>,
    %c16_134 = arith.constant 16 : index
    %c0_135 = arith.constant 0 : index
    %106 = vector.load %arg18[%c16_134, %c0_135] : memref<48x256xf32, #tpu.memory_space<vmem>>, vector<32x256xf32>
    %c2_136 = arith.constant 2 : index
    %c0_137 = arith.constant 0 : index
    %c0_138 = arith.constant 0 : index
    %107 = vector.load %arg6[%c2_136, %c0_137, %c0_138] : memref<3x256x128xf32, #tpu.memory_space<vmem>>, vector<1x256x128xf32>
    %108 = vector.shape_cast %107 : vector<1x256x128xf32> to vector<256x128xf32>
    %cst_139 = arith.constant dense<0.000000e+00> : vector<32x128xf32>
    %109 = tpu.matmul %106, %108, %cst_139 {dimension_numbers = #tpu.dot_dimension_numbers<[1], [0], [0], [1], [0, 0, 1, 1], [], []>} : vector<32x256xf32>, vector<256x128xf32>, vector<32x128xf32> -> vector<32x128xf32>
    %c0_140 = arith.constant 0 : index
    %c0_141 = arith.constant 0 : index
    %110 = vector.load %arg19[%c0_140, %c0_141] : memref<32x128xf32, #tpu.memory_space<vmem>>, vector<32x128xf32>
    %111 = arith.addf %110, %109 : vector<32x128xf32>
    %c0_142 = arith.constant 0 : index
    %c0_143 = arith.constant 0 : index
    %112 = vector.load %arg19[%c0_142, %c0_143] : memref<32x128xf32, #tpu.memory_space<vmem>>, vector<32x128xf32>
    tpu.vector_store %arg19[%c0_142, %c0_143], %111 {strides = array<i32>} : memref<32x128xf32, #tpu.memory_space<vmem>>, vector<32x128xf32>,
    %c0_144 = arith.constant 0 : index
    %c0_145 = arith.constant 0 : index
    %113 = vector.load %arg19[%c0_144, %c0_145] : memref<32x128xf32, #tpu.memory_space<vmem>>, vector<32x128xf32>
    %c0_146 = arith.constant 0 : index
    %c0_147 = arith.constant 0 : index
    %114 = vector.load %arg7[%c0_146, %c0_147] : memref<1x128xf32, #tpu.memory_space<vmem>>, vector<1x128xf32>
    %115 = vector.broadcast %114 : vector<1x128xf32> to vector<32x128xf32>
    %116 = arith.addf %113, %115 : vector<32x128xf32>
    %cst_148 = arith.constant 0.000000e+00 : f32
    %117 = vector.broadcast %cst_148 : f32 to vector<32x128xf32>
    %118 = arith.maximumf %116, %117 : vector<32x128xf32>
    %c0_149 = arith.constant 0 : index
    %c0_150 = arith.constant 0 : index
    %119 = vector.load %arg19[%c0_149, %c0_150] : memref<32x128xf32, #tpu.memory_space<vmem>>, vector<32x128xf32>
    tpu.vector_store %arg19[%c0_149, %c0_150], %118 {strides = array<i32>} : memref<32x128xf32, #tpu.memory_space<vmem>>, vector<32x128xf32>,
    %c0_151 = arith.constant 0 : index
    %c0_152 = arith.constant 0 : index
    %120 = vector.load %arg19[%c0_151, %c0_152] : memref<32x128xf32, #tpu.memory_space<vmem>>, vector<8x128xf32>
    %c0_153 = arith.constant 0 : index
    %c0_154 = arith.constant 0 : index
    %c0_155 = arith.constant 0 : index
    %121 = vector.load %arg8[%c0_153, %c0_154, %c0_155] : memref<4x128x128xf32, #tpu.memory_space<vmem>>, vector<1x128x128xf32>
    %122 = vector.shape_cast %121 : vector<1x128x128xf32> to vector<128x128xf32>
    %cst_156 = arith.constant dense<0.000000e+00> : vector<8x128xf32>
    %123 = tpu.matmul %120, %122, %cst_156 {dimension_numbers = #tpu.dot_dimension_numbers<[1], [0], [0], [1], [0, 0, 1, 1], [], []>} : vector<8x128xf32>, vector<128x128xf32>, vector<8x128xf32> -> vector<8x128xf32>
    %c8_157 = arith.constant 8 : index
    %c0_158 = arith.constant 0 : index
    %124 = vector.load %arg19[%c8_157, %c0_158] : memref<32x128xf32, #tpu.memory_space<vmem>>, vector<8x128xf32>
    %c1_159 = arith.constant 1 : index
    %c0_160 = arith.constant 0 : index
    %c0_161 = arith.constant 0 : index
    %125 = vector.load %arg8[%c1_159, %c0_160, %c0_161] : memref<4x128x128xf32, #tpu.memory_space<vmem>>, vector<1x128x128xf32>
    %126 = vector.shape_cast %125 : vector<1x128x128xf32> to vector<128x128xf32>
    %cst_162 = arith.constant dense<0.000000e+00> : vector<8x128xf32>
    %127 = tpu.matmul %124, %126, %cst_162 {dimension_numbers = #tpu.dot_dimension_numbers<[1], [0], [0], [1], [0, 0, 1, 1], [], []>} : vector<8x128xf32>, vector<128x128xf32>, vector<8x128xf32> -> vector<8x128xf32>
    %128 = arith.addf %123, %127 : vector<8x128xf32>
    %c16_163 = arith.constant 16 : index
    %c0_164 = arith.constant 0 : index
    %129 = vector.load %arg19[%c16_163, %c0_164] : memref<32x128xf32, #tpu.memory_space<vmem>>, vector<8x128xf32>
    %c2_165 = arith.constant 2 : index
    %c0_166 = arith.constant 0 : index
    %c0_167 = arith.constant 0 : index
    %130 = vector.load %arg8[%c2_165, %c0_166, %c0_167] : memref<4x128x128xf32, #tpu.memory_space<vmem>>, vector<1x128x128xf32>
    %131 = vector.shape_cast %130 : vector<1x128x128xf32> to vector<128x128xf32>
    %cst_168 = arith.constant dense<0.000000e+00> : vector<8x128xf32>
    %132 = tpu.matmul %129, %131, %cst_168 {dimension_numbers = #tpu.dot_dimension_numbers<[1], [0], [0], [1], [0, 0, 1, 1], [], []>} : vector<8x128xf32>, vector<128x128xf32>, vector<8x128xf32> -> vector<8x128xf32>
    %133 = arith.addf %128, %132 : vector<8x128xf32>
    %c24_169 = arith.constant 24 : index
    %c0_170 = arith.constant 0 : index
    %134 = vector.load %arg19[%c24_169, %c0_170] : memref<32x128xf32, #tpu.memory_space<vmem>>, vector<8x128xf32>
    %c3_171 = arith.constant 3 : index
    %c0_172 = arith.constant 0 : index
    %c0_173 = arith.constant 0 : index
    %135 = vector.load %arg8[%c3_171, %c0_172, %c0_173] : memref<4x128x128xf32, #tpu.memory_space<vmem>>, vector<1x128x128xf32>
    %136 = vector.shape_cast %135 : vector<1x128x128xf32> to vector<128x128xf32>
    %cst_174 = arith.constant dense<0.000000e+00> : vector<8x128xf32>
    %137 = tpu.matmul %134, %136, %cst_174 {dimension_numbers = #tpu.dot_dimension_numbers<[1], [0], [0], [1], [0, 0, 1, 1], [], []>} : vector<8x128xf32>, vector<128x128xf32>, vector<8x128xf32> -> vector<8x128xf32>
    %138 = arith.addf %133, %137 : vector<8x128xf32>
    %c0_175 = arith.constant 0 : index
    %c0_176 = arith.constant 0 : index
    %139 = vector.load %arg9[%c0_175, %c0_176] : memref<1x128xf32, #tpu.memory_space<vmem>>, vector<1x128xf32>
    %140 = vector.broadcast %139 : vector<1x128xf32> to vector<8x128xf32>
    %141 = arith.addf %138, %140 : vector<8x128xf32>
    %cst_177 = arith.constant 0.000000e+00 : f32
    %142 = vector.broadcast %cst_177 : f32 to vector<8x128xf32>
    %143 = arith.maximumf %141, %142 : vector<8x128xf32>
    %c0_178 = arith.constant 0 : index
    %c0_179 = arith.constant 0 : index
    %144 = vector.load %arg20[%c0_178, %c0_179] : memref<8x128xf32, #tpu.memory_space<vmem>>, vector<8x128xf32>
    tpu.vector_store %arg20[%c0_178, %c0_179], %143 {strides = array<i32>} : memref<8x128xf32, #tpu.memory_space<vmem>>, vector<8x128xf32>,
    %c0_180 = arith.constant 0 : index
    %c0_181 = arith.constant 0 : index
    %145 = vector.load %arg20[%c0_180, %c0_181] : memref<8x128xf32, #tpu.memory_space<vmem>>, vector<8x128xf32>
    %c0_182 = arith.constant 0 : index
    %c0_183 = arith.constant 0 : index
    %146 = vector.load %arg10[%c0_182, %c0_183] : memref<128x256xf32, #tpu.memory_space<vmem>>, vector<128x256xf32>
    %cst_184 = arith.constant dense<0.000000e+00> : vector<8x256xf32>
    %147 = tpu.matmul %145, %146, %cst_184 {dimension_numbers = #tpu.dot_dimension_numbers<[1], [0], [0], [1], [0, 0, 1, 1], [], []>} : vector<8x128xf32>, vector<128x256xf32>, vector<8x256xf32> -> vector<8x256xf32>
    %c0_185 = arith.constant 0 : index
    %c0_186 = arith.constant 0 : index
    %148 = vector.load %arg11[%c0_185, %c0_186] : memref<1x256xf32, #tpu.memory_space<vmem>>, vector<1x256xf32>
    %149 = vector.broadcast %148 : vector<1x256xf32> to vector<8x256xf32>
    %150 = arith.addf %147, %149 : vector<8x256xf32>
    %cst_187 = arith.constant 0.000000e+00 : f32
    %151 = vector.broadcast %cst_187 : f32 to vector<8x256xf32>
    %152 = arith.maximumf %150, %151 : vector<8x256xf32>
    %c0_188 = arith.constant 0 : index
    %c0_189 = arith.constant 0 : index
    %153 = vector.load %arg21[%c0_188, %c0_189] : memref<8x256xf32, #tpu.memory_space<vmem>>, vector<8x256xf32>
    tpu.vector_store %arg21[%c0_188, %c0_189], %152 {strides = array<i32>} : memref<8x256xf32, #tpu.memory_space<vmem>>, vector<8x256xf32>,
    %c0_190 = arith.constant 0 : index
    %c0_191 = arith.constant 0 : index
    %154 = vector.load %arg21[%c0_190, %c0_191] : memref<8x256xf32, #tpu.memory_space<vmem>>, vector<8x256xf32>
    %c0_192 = arith.constant 0 : index
    %c0_193 = arith.constant 0 : index
    %155 = vector.load %arg12[%c0_192, %c0_193] : memref<256x128xf32, #tpu.memory_space<vmem>>, vector<256x128xf32>
    %cst_194 = arith.constant dense<0.000000e+00> : vector<8x128xf32>
    %156 = tpu.matmul %154, %155, %cst_194 {dimension_numbers = #tpu.dot_dimension_numbers<[1], [0], [0], [1], [0, 0, 1, 1], [], []>} : vector<8x256xf32>, vector<256x128xf32>, vector<8x128xf32> -> vector<8x128xf32>
    %c0_195 = arith.constant 0 : index
    %c0_196 = arith.constant 0 : index
    %157 = vector.load %arg13[%c0_195, %c0_196] : memref<1x128xf32, #tpu.memory_space<vmem>>, vector<1x128xf32>
    %158 = vector.broadcast %157 : vector<1x128xf32> to vector<8x128xf32>
    %159 = arith.addf %156, %158 : vector<8x128xf32>
    %cst_197 = arith.constant 0.000000e+00 : f32
    %160 = vector.broadcast %cst_197 : f32 to vector<8x128xf32>
    %161 = arith.maximumf %159, %160 : vector<8x128xf32>
    %c0_198 = arith.constant 0 : index
    %c0_199 = arith.constant 0 : index
    %162 = vector.load %arg22[%c0_198, %c0_199] : memref<8x128xf32, #tpu.memory_space<vmem>>, vector<8x128xf32>
    tpu.vector_store %arg22[%c0_198, %c0_199], %161 {strides = array<i32>} : memref<8x128xf32, #tpu.memory_space<vmem>>, vector<8x128xf32>,
    %c0_200 = arith.constant 0 : index
    %c0_201 = arith.constant 0 : index
    %163 = vector.load %arg22[%c0_200, %c0_201] : memref<8x128xf32, #tpu.memory_space<vmem>>, vector<8x128xf32>
    %c0_202 = arith.constant 0 : index
    %c0_203 = arith.constant 0 : index
    %164 = vector.load %arg14[%c0_202, %c0_203] : memref<128x128xf32, #tpu.memory_space<vmem>>, vector<128x128xf32>
    %cst_204 = arith.constant dense<0.000000e+00> : vector<8x128xf32>
    %165 = tpu.matmul %163, %164, %cst_204 {dimension_numbers = #tpu.dot_dimension_numbers<[1], [0], [0], [1], [0, 0, 1, 1], [], []>} : vector<8x128xf32>, vector<128x128xf32>, vector<8x128xf32> -> vector<8x128xf32>
    %c0_205 = arith.constant 0 : index
    %c0_206 = arith.constant 0 : index
    %166 = vector.load %arg15[%c0_205, %c0_206] : memref<1x128xf32, #tpu.memory_space<vmem>>, vector<1x128xf32>
    %167 = vector.broadcast %166 : vector<1x128xf32> to vector<8x128xf32>
    %168 = arith.addf %165, %167 : vector<8x128xf32>
    %c0_207 = arith.constant 0 : index
    %c0_208 = arith.constant 0 : index
    %169 = vector.load %arg16[%c0_207, %c0_208] : memref<8x128xf32, #tpu.memory_space<vmem>>, vector<8x128xf32>
    tpu.vector_store %arg16[%c0_207, %c0_208], %168 {strides = array<i32>} : memref<8x128xf32, #tpu.memory_space<vmem>>, vector<8x128xf32>,
    return
  }
  func.func @transform_0(%arg0: i32) -> (i32, i32) {
    %c0_i32 = arith.constant 0 : i32
    %c0_i32_0 = arith.constant 0 : i32
    return %arg0, %c0_i32 : i32, i32
  }
  func.func @transform_1(%arg0: i32) -> (i32, i32, i32) {
    %c0_i32 = arith.constant 0 : i32
    %c0_i32_0 = arith.constant 0 : i32
    %c0_i32_1 = arith.constant 0 : i32
    %c0_i32_2 = arith.constant 0 : i32
    return %c0_i32, %c0_i32_0, %c0_i32_1 : i32, i32, i32
  }
  func.func @transform_2(%arg0: i32) -> (i32, i32) {
    %c0_i32 = arith.constant 0 : i32
    %c0_i32_0 = arith.constant 0 : i32
    %c0_i32_1 = arith.constant 0 : i32
    return %c0_i32, %c0_i32_0 : i32, i32
  }
  func.func @transform_3(%arg0: i32) -> (i32, i32, i32) {
    %c0_i32 = arith.constant 0 : i32
    %c0_i32_0 = arith.constant 0 : i32
    %c0_i32_1 = arith.constant 0 : i32
    %c0_i32_2 = arith.constant 0 : i32
    return %c0_i32, %c0_i32_0, %c0_i32_1 : i32, i32, i32
  }
  func.func @transform_4(%arg0: i32) -> (i32, i32) {
    %c0_i32 = arith.constant 0 : i32
    %c0_i32_0 = arith.constant 0 : i32
    %c0_i32_1 = arith.constant 0 : i32
    return %c0_i32, %c0_i32_0 : i32, i32
  }
  func.func @transform_5(%arg0: i32) -> (i32, i32, i32) {
    %c0_i32 = arith.constant 0 : i32
    %c0_i32_0 = arith.constant 0 : i32
    %c0_i32_1 = arith.constant 0 : i32
    %c0_i32_2 = arith.constant 0 : i32
    return %c0_i32, %c0_i32_0, %c0_i32_1 : i32, i32, i32
  }
  func.func @transform_6(%arg0: i32) -> (i32, i32) {
    %c0_i32 = arith.constant 0 : i32
    %c0_i32_0 = arith.constant 0 : i32
    %c0_i32_1 = arith.constant 0 : i32
    return %c0_i32, %c0_i32_0 : i32, i32
  }
  func.func @transform_7(%arg0: i32) -> (i32, i32, i32) {
    %c0_i32 = arith.constant 0 : i32
    %c0_i32_0 = arith.constant 0 : i32
    %c0_i32_1 = arith.constant 0 : i32
    %c0_i32_2 = arith.constant 0 : i32
    return %c0_i32, %c0_i32_0, %c0_i32_1 : i32, i32, i32
  }
  func.func @transform_8(%arg0: i32) -> (i32, i32) {
    %c0_i32 = arith.constant 0 : i32
    %c0_i32_0 = arith.constant 0 : i32
    %c0_i32_1 = arith.constant 0 : i32
    return %c0_i32, %c0_i32_0 : i32, i32
  }
  func.func @transform_9(%arg0: i32) -> (i32, i32) {
    %c0_i32 = arith.constant 0 : i32
    %c0_i32_0 = arith.constant 0 : i32
    %c0_i32_1 = arith.constant 0 : i32
    return %c0_i32, %c0_i32_0 : i32, i32
  }
  func.func @transform_10(%arg0: i32) -> (i32, i32) {
    %c0_i32 = arith.constant 0 : i32
    %c0_i32_0 = arith.constant 0 : i32
    %c0_i32_1 = arith.constant 0 : i32
    return %c0_i32, %c0_i32_0 : i32, i32
  }
  func.func @transform_11(%arg0: i32) -> (i32, i32) {
    %c0_i32 = arith.constant 0 : i32
    %c0_i32_0 = arith.constant 0 : i32
    %c0_i32_1 = arith.constant 0 : i32
    return %c0_i32, %c0_i32_0 : i32, i32
  }
  func.func @transform_12(%arg0: i32) -> (i32, i32) {
    %c0_i32 = arith.constant 0 : i32
    %c0_i32_0 = arith.constant 0 : i32
    %c0_i32_1 = arith.constant 0 : i32
    return %c0_i32, %c0_i32_0 : i32, i32
  }
  func.func @transform_13(%arg0: i32) -> (i32, i32) {
    %c0_i32 = arith.constant 0 : i32
    %c0_i32_0 = arith.constant 0 : i32
    %c0_i32_1 = arith.constant 0 : i32
    return %c0_i32, %c0_i32_0 : i32, i32
  }
  func.func @transform_14(%arg0: i32) -> (i32, i32) {
    %c0_i32 = arith.constant 0 : i32
    %c0_i32_0 = arith.constant 0 : i32
    %c0_i32_1 = arith.constant 0 : i32
    return %c0_i32, %c0_i32_0 : i32, i32
  }
  func.func @transform_15(%arg0: i32) -> (i32, i32) {
    %c0_i32 = arith.constant 0 : i32
    %c0_i32_0 = arith.constant 0 : i32
    return %arg0, %c0_i32 : i32, i32
  }
}

</mosaic_0001>

<bundles_post_ra>
// kernel: hybridsn_forward.1
= control target key start
LH: loop header
LB: loop body
LE: loop exit
PB: predicated region body
PF: predicated region fallthrough
CT: control target
= control target key end

     0   :  { %20 = vsyncpa [#allocation9], 0  ;;  %s7631_s0 = inlined_call_operand.vmem [shape: f32[128,128], index: 0, kind: input, shape index: {}]   ;;  %s7632_s1 = inlined_call_operand.vmem [shape: f32[7,128,256], index: 1, kind: input, shape index: {}]   ;;  %s7633_s2 = inlined_call_operand.hbm [shape: f32[1,256], index: 2, kind: input, shape index: {}]   ;;  %s7634_s3 = inlined_call_operand.hbm [shape: f32[5,256,256], index: 3, kind: input, shape index: {}]   ;;  %s7635_s4 = inlined_call_operand.hbm [shape: f32[1,256], index: 4, kind: input, shape index: {}]   ;;  %s7636_s5 = inlined_call_operand.hbm [shape: f32[3,256,128], index: 5, kind: input, shape index: {}]   ;;  %s7637_s6 = inlined_call_operand.hbm [shape: f32[1,128], index: 6, kind: input, shape index: {}]   ;;  %s7638_s7 = inlined_call_operand.vmem [shape: f32[4,128,128], index: 7, kind: input, shape index: {}]   ;;  %s7639_s8 = inlined_call_operand.hbm [shape: f32[1,128], index: 8, kind: input, shape index: {}]   ;;  %s7640_s9 = inlined_call_operand.hbm [shape: f32[128,256], index: 9, kind: input, shape index: {}]   ;;  %s7641_s10 = inlined_call_operand.hbm [shape: f32[1,256], index: 10, kind: input, shape index: {}]   ;;  %s7642_s11 = inlined_call_operand.hbm [shape: f32[256,128], index: 11, kind: input, shape index: {}]   ;;  %s7643_s12 = inlined_call_operand.hbm [shape: f32[1,128], index: 12, kind: input, shape index: {}]   ;;  %s7644_s13 = inlined_call_operand.vmem [shape: f32[128,128], index: 13, kind: input, shape index: {}]   ;;  %s7645_s14 = inlined_call_operand.hbm [shape: f32[1,128], index: 14, kind: input, shape index: {}]   ;;  %s7646_s15 = inlined_call_operand.vmem [shape: f32[8,128], index: 15, kind: output, shape index: {}]  }
   0x1   :  { %21 = vsyncpa [#allocation11], 0 }
   0x2   :  { %22 = vsyncpa [#allocation14], 0 }
   0x3   :  { %23 = vsyncpa [#allocation17], 0 }
   0x4   :  { %24 = vsyncpa [#allocation20], 0 }
   0x5   :  { %25 = vsyncpa [#allocation23], 0  ;;  %s6005_s18 = smov [#allocation10]   ;;  %s5751_s22 = scalar_lea.hbm %s7634_s3, 40960 }
   0x6   :  { %s45_s19 = sshll.u32 %s6005_s18, 4  ;;  %p5752_p0 = scmp.ne.s32.totalorder %s7634_s3, %s5751_s22  ;;  %s46_s19 = int_to_ptr.vmem [resolvable:$true] %s45_s19 }
   0x7   :  { %p5755_p1 = scmp.lt.u32.totalorder %s5751_s22, %s7634_s3 }
   0x9   :  { %p5757_p2 = pnand %p5755_p1, %p5752_p0 }
   0xb   :  { %5760 = shalt.err (!%p5757_p2)
}
   0xc   :  { %s5761_s27 = scalar_lea.vmem %s46_s19, 40960  ;;  %p5766_p4 = scmp.lt.s32.totalorder %s46_s19, %s46_s19 }
   0xd   :  { %p5762_p3 = scmp.ne.s32.totalorder %s46_s19, %s5761_s27  ;;  %p5767_p5 = scmp.lt.s32.totalorder %s5761_s27, %s5761_s27 }
   0xf   :  { %p5768_p6 = por %p5767_p5, %p5766_p4 }
  0x11   :  { %p5769_p7 = pnand %p5768_p6, %p5762_p3 }
  0x13   :  { %5772 = shalt.err (!%p5769_p7)
}
  0x14   :  { %s7647_s28 = smov 256   ;;  %s7648_s29 = smov 16  }
  0x15   :  { %51 = dma.hbm_to_vmem [thread:$0]  %s7634_s3, 40960, %s46_s19, [#allocation11], %s7647_s28, %s7647_s28, %s7648_s29  }
  0x16   :  { %s6008_s17 = smov [#allocation13]   ;;  %s5773_s22 = scalar_lea.hbm %s7636_s5, 12288 }
  0x17   :  { %s67_s18 = sshll.u32 %s6008_s17, 4  ;;  %p5774_p8 = scmp.ne.s32.totalorder %s7636_s5, %s5773_s22  ;;  %s68_s18 = int_to_ptr.vmem [resolvable:$true] %s67_s18 }
  0x18   :  { %p5777_p9 = scmp.lt.u32.totalorder %s5773_s22, %s7636_s5 }
  0x1a   :  { %p5779_p10 = pnand %p5777_p9, %p5774_p8 }
  0x1c   :  { %5782 = shalt.err (!%p5779_p10)
}
  0x1d   :  { %s5783_s27 = scalar_lea.vmem %s68_s18, 12288  ;;  %p5788_p12 = scmp.lt.s32.totalorder %s68_s18, %s68_s18 }
  0x1e   :  { %p5784_p11 = scmp.ne.s32.totalorder %s68_s18, %s5783_s27  ;;  %p5789_p13 = scmp.lt.s32.totalorder %s5783_s27, %s5783_s27 }
  0x20   :  { %p5790_p0 = por %p5789_p13, %p5788_p12 }
  0x22   :  { %p5791_p1 = pnand %p5790_p0, %p5784_p11 }
  0x24   :  { %5794 = shalt.err (!%p5791_p1)
}
  0x25   :  { %s6009_s3 = smov 128   ;;  %s6010_s19 = smov 8  }
  0x26   :  { %73 = dma.hbm_to_vmem [thread:$0]  %s7636_s5, 12288, %s68_s18, [#allocation14], %s6009_s3, %s6009_s3, %s6010_s19  }
  0x27   :  { %s6011_s17 = smov [#allocation16]   ;;  %s6012_s21 = smov [#allocation19]  }
  0x28   :  { %s92_s20 = sshll.u32 %s6011_s17, 4  ;;  %s114_s22 = sshll.u32 %s6012_s21, 4  ;;  %s93_s20 = int_to_ptr.vmem [resolvable:$true] %s92_s20  ;;  %s115_s22 = int_to_ptr.vmem [resolvable:$true] %s114_s22 }
  0x29   :  { %s5795_s25 = scalar_lea.hbm %s7639_s8, 16 }
  0x2a   :  { %p5796_p2 = scmp.ne.s32.totalorder %s7639_s8, %s5795_s25  ;;  %p5799_p3 = scmp.lt.u32.totalorder %s5795_s25, %s7639_s8 }
  0x2c   :  { %p5801_p4 = pnand %p5799_p3, %p5796_p2 }
  0x2e   :  { %5804 = shalt.err (!%p5801_p4)
}
  0x2f   :  { %s5805_s5 = scalar_lea.vmem %s93_s20, 16  ;;  %s5809_s18 = scalar_lea.vmem %s93_s20, 32 }
  0x30   :  { %p5806_p5 = scmp.ne.s32.totalorder %s93_s20, %s5805_s5  ;;  %p5810_p6 = scmp.lt.s32.totalorder %s93_s20, %s93_s20 }
  0x31   :  { %p5811_p7 = scmp.lt.s32.totalorder %s5809_s18, %s5805_s5 }
  0x33   :  { %p5812_p8 = por %p5811_p7, %p5810_p6 }
  0x35   :  { %p5813_p9 = pnand %p5812_p8, %p5806_p5 }
  0x37   :  { %5816 = shalt.err (!%p5813_p9)
}
  0x38   :  { %95 = dma.hbm_to_vmem [thread:$0]  %s7639_s8, 16, %s93_s20, [#allocation17]  }
  0x39   :  { %s5817_s23 = scalar_lea.hbm %s7641_s10, 32 }
  0x3a   :  { %p5818_p10 = scmp.ne.s32.totalorder %s7641_s10, %s5817_s23  ;;  %p5821_p11 = scmp.lt.u32.totalorder %s5817_s23, %s7641_s10 }
  0x3c   :  { %p5823_p12 = pnand %p5821_p11, %p5818_p10 }
  0x3e   :  { %5826 = shalt.err (!%p5823_p12)
}
  0x3f   :  { %s5827_s26 = scalar_lea.vmem %s115_s22, 32  ;;  %p5832_p0 = scmp.lt.s32.totalorder %s115_s22, %s115_s22 }
  0x40   :  { %p5828_p13 = scmp.ne.s32.totalorder %s115_s22, %s5827_s26  ;;  %p5833_p1 = scmp.lt.s32.totalorder %s5827_s26, %s5827_s26 }
  0x42   :  { %p5834_p2 = por %p5833_p1, %p5832_p0 }
  0x44   :  { %p5835_p3 = pnand %p5834_p2, %p5828_p13 }
  0x46   :  { %5838 = shalt.err (!%p5835_p3)
}
  0x47   :  { %117 = dma.hbm_to_vmem [thread:$0]  %s7641_s10, 32, %s115_s22, [#allocation20]  }
  0x48   :  { %s6013_s27 = smov [#allocation22]   ;;  %s6014_s18 = smov [#allocation8]  }
  0x49   :  { %s136_s5 = sshll.u32 %s6013_s27, 4  ;;  %s36_s30 = sshll.u32 %s6014_s18, 4  ;;  %s137_s5 = int_to_ptr.vmem [resolvable:$true] %s136_s5  ;;  %s37_s30 = int_to_ptr.vmem [resolvable:$true] %s36_s30 }
  0x4a   :  { %s5839_s21 = scalar_lea.hbm %s7643_s12, 16 }
  0x4b   :  { %p5840_p4 = scmp.ne.s32.totalorder %s7643_s12, %s5839_s21  ;;  %p5843_p5 = scmp.lt.u32.totalorder %s5839_s21, %s7643_s12 }
  0x4d   :  { %p5845_p6 = pnand %p5843_p5, %p5840_p4 }
  0x4f   :  { %5848 = shalt.err (!%p5845_p6)
}
  0x50   :  { %s5849_s10 = scalar_lea.vmem %s137_s5, 16  ;;  %s5853_s22 = scalar_lea.vmem %s137_s5, 32 }
  0x51   :  { %p5850_p7 = scmp.ne.s32.totalorder %s137_s5, %s5849_s10  ;;  %p5854_p8 = scmp.lt.s32.totalorder %s137_s5, %s137_s5 }
  0x52   :  { %p5855_p9 = scmp.lt.s32.totalorder %s5853_s22, %s5849_s10 }
  0x54   :  { %p5856_p10 = por %p5855_p9, %p5854_p8 }
  0x56   :  { %p5857_p11 = pnand %p5856_p10, %p5850_p7 }
  0x58   :  { %5860 = shalt.err (!%p5857_p11)
}
  0x59   :  { %139 = dma.hbm_to_vmem [thread:$0]  %s7643_s12, 16, %s137_s5, [#allocation23]  }
  0x5a   :  { %s5861_s27 = scalar_lea.hbm %s7633_s2, 32 }
  0x5b   :  { %p5862_p12 = scmp.ne.s32.totalorder %s7633_s2, %s5861_s27  ;;  %p5865_p13 = scmp.lt.u32.totalorder %s5861_s27, %s7633_s2 }
  0x5d   :  { %p5867_p0 = pnand %p5865_p13, %p5862_p12 }
  0x5f   :  { %5870 = shalt.err (!%p5867_p0)
}
  0x60   :  { %s5871_s23 = scalar_lea.vmem %s37_s30, 32  ;;  %p5876_p2 = scmp.lt.s32.totalorder %s37_s30, %s37_s30 }
  0x61   :  { %p5872_p1 = scmp.ne.s32.totalorder %s37_s30, %s5871_s23  ;;  %p5877_p3 = scmp.lt.s32.totalorder %s5871_s23, %s5871_s23 }
  0x63   :  { %p5878_p4 = por %p5877_p3, %p5876_p2 }
  0x65   :  { %p5879_p5 = pnand %p5878_p4, %p5872_p1 }
  0x67   :  { %5882 = shalt.err (!%p5879_p5)
}
  0x68   :  { %39 = dma.hbm_to_vmem [thread:$0]  %s7633_s2, 32, %s37_s30, [#allocation9]  }
  0x69   :  { %s6015_s28 = smov [#allocation12]   ;;  %s6016_s24 = smov [#allocation15]  }
  0x6a   :  { %s58_s29 = sshll.u32 %s6015_s28, 4  ;;  %s80_s10 = sshll.u32 %s6016_s24, 4  ;;  %s59_s29 = int_to_ptr.vmem [resolvable:$true] %s58_s29  ;;  %s81_s10 = int_to_ptr.vmem [resolvable:$true] %s80_s10 }
  0x6b   :  { %s5883_s26 = scalar_lea.hbm %s7635_s4, 32 }
  0x6c   :  { %p5884_p6 = scmp.ne.s32.totalorder %s7635_s4, %s5883_s26  ;;  %p5887_p7 = scmp.lt.u32.totalorder %s5883_s26, %s7635_s4 }
  0x6e   :  { %p5889_p8 = pnand %p5887_p7, %p5884_p6 }
  0x70   :  { %5892 = shalt.err (!%p5889_p8)
}
  0x71   :  { %s5893_s2 = scalar_lea.vmem %s59_s29, 32  ;;  %p5898_p10 = scmp.lt.s32.totalorder %s59_s29, %s59_s29 }
  0x72   :  { %p5894_p9 = scmp.ne.s32.totalorder %s59_s29, %s5893_s2  ;;  %p5899_p11 = scmp.lt.s32.totalorder %s5893_s2, %s5893_s2 }
  0x74   :  { %p5900_p12 = por %p5899_p11, %p5898_p10 }
  0x76   :  { %p5901_p13 = pnand %p5900_p12, %p5894_p9 }
  0x78   :  { %5904 = shalt.err (!%p5901_p13)
}
  0x79   :  { %61 = dma.hbm_to_vmem [thread:$0]  %s7635_s4, 32, %s59_s29, [#allocation11]  }
  0x7a   :  { %s5905_s23 = scalar_lea.hbm %s7637_s6, 16 }
  0x7b   :  { %p5906_p0 = scmp.ne.s32.totalorder %s7637_s6, %s5905_s23  ;;  %p5909_p1 = scmp.lt.u32.totalorder %s5905_s23, %s7637_s6 }
  0x7d   :  { %p5911_p2 = pnand %p5909_p1, %p5906_p0 }
  0x7f   :  { %5914 = shalt.err (!%p5911_p2)
}
  0x80   :  { %s5915_s22 = scalar_lea.vmem %s81_s10, 16  ;;  %s5919_s25 = scalar_lea.vmem %s81_s10, 32 }
  0x81   :  { %p5916_p3 = scmp.ne.s32.totalorder %s81_s10, %s5915_s22  ;;  %p5920_p4 = scmp.lt.s32.totalorder %s81_s10, %s81_s10 }
  0x82   :  { %p5921_p5 = scmp.lt.s32.totalorder %s5919_s25, %s5915_s22 }
  0x84   :  { %p5922_p6 = por %p5921_p5, %p5920_p4 }
  0x86   :  { %p5923_p7 = pnand %p5922_p6, %p5916_p3 }
  0x88   :  { %5926 = shalt.err (!%p5923_p7)
}
  0x89   :  { %83 = dma.hbm_to_vmem [thread:$0]  %s7637_s6, 16, %s81_s10, [#allocation14]  }
  0x8a   :  { %s6017_s26 = smov [#allocation18]   ;;  %s6018_s20 = smov [#allocation21]  }
  0x8b   :  { %s101_s8 = sshll.u32 %s6017_s26, 4  ;;  %s123_s27 = sshll.u32 %s6018_s20, 4  ;;  %s102_s8 = int_to_ptr.vmem [resolvable:$true] %s101_s8  ;;  %s6205_s27 = int_to_ptr.vmem [resolvable:$true] %s123_s27 }
  0x8c   :  { %s5927_s30 = scalar_lea.hbm %s7640_s9, 4096 }
  0x8d   :  { %p5928_p8 = scmp.ne.s32.totalorder %s7640_s9, %s5927_s30  ;;  %p5931_p9 = scmp.lt.u32.totalorder %s5927_s30, %s7640_s9 }
  0x8f   :  { %p5933_p10 = pnand %p5931_p9, %p5928_p8 }
  0x91   :  { %5936 = shalt.err (!%p5933_p10)
}
  0x92   :  { %s5937_s6 = scalar_lea.vmem %s102_s8, 4096  ;;  %p5942_p12 = scmp.lt.s32.totalorder %s102_s8, %s102_s8 }
  0x93   :  { %p5938_p11 = scmp.ne.s32.totalorder %s102_s8, %s5937_s6  ;;  %p5943_p13 = scmp.lt.s32.totalorder %s5937_s6, %s5937_s6 }
  0x95   :  { %p5944_p0 = por %p5943_p13, %p5942_p12 }
  0x97   :  { %p5945_p1 = pnand %p5944_p0, %p5938_p11 }
  0x99   :  { %5948 = shalt.err (!%p5945_p1)
}
  0x9a   :  { %s7649_s10 = smov 16   ;;  %s7650_s12 = smov 256  }
  0x9b   :  { %107 = dma.hbm_to_vmem [thread:$0]  %s7640_s9, 4096, %s102_s8, [#allocation17], %s7650_s12, %s7650_s12, %s7649_s10  }
  0x9c   :  { %s5949_s25 = scalar_lea.hbm %s7642_s11, 4096 }
  0x9d   :  { %p5950_p2 = scmp.ne.s32.totalorder %s7642_s11, %s5949_s25  ;;  %p5953_p3 = scmp.lt.u32.totalorder %s5949_s25, %s7642_s11 }
  0x9f   :  { %p5955_p4 = pnand %p5953_p3, %p5950_p2 }
  0xa1   :  { %5958 = shalt.err (!%p5955_p4)
}
  0xa2   :  { %s5959_s18 = scalar_lea.vmem %s6205_s27, 4096  ;;  %p5964_p6 = scmp.lt.s32.totalorder %s6205_s27, %s6205_s27 }
  0xa3   :  { %p5960_p5 = scmp.ne.s32.totalorder %s6205_s27, %s5959_s18  ;;  %p5965_p7 = scmp.lt.s32.totalorder %s5959_s18, %s5959_s18 }
  0xa5   :  { %p5966_p8 = por %p5965_p7, %p5964_p6 }
  0xa7   :  { %p5967_p9 = pnand %p5966_p8, %p5960_p5 }
  0xa9   :  { %5970 = shalt.err (!%p5967_p9)
}
  0xaa   :  { %129 = dma.hbm_to_vmem [thread:$0]  %s7642_s11, 4096, %s6205_s27, [#allocation20], %s6009_s3, %s6009_s3, %s6010_s19  }
  0xab   :  { %s6019_s2 = smov [#allocation24]   ;;  %s5971_s21 = scalar_lea.hbm %s7645_s14, 16 }
  0xac   :  { %s148_s30 = sshll.u32 %s6019_s2, 4  ;;  %p5972_p10 = scmp.ne.s32.totalorder %s7645_s14, %s5971_s21  ;;  %s149_s30 = int_to_ptr.vmem [resolvable:$true] %s148_s30 }
  0xad   :  { %p5975_p11 = scmp.lt.u32.totalorder %s5971_s21, %s7645_s14 }
  0xaf   :  { %p5977_p12 = pnand %p5975_p11, %p5972_p10 }
  0xb1   :  { %5980 = shalt.err (!%p5977_p12)
}
  0xb2   :  { %s5981_s5 = scalar_lea.vmem %s149_s30, 16  ;;  %s5985_s11 = scalar_lea.vmem %s149_s30, 32 }
  0xb3   :  { %p5982_p13 = scmp.ne.s32.totalorder %s149_s30, %s5981_s5  ;;  %p5986_p0 = scmp.lt.s32.totalorder %s149_s30, %s149_s30 }
  0xb4   :  { %p5987_p1 = scmp.lt.s32.totalorder %s5985_s11, %s5981_s5 }
  0xb6   :  { %p5988_p2 = por %p5987_p1, %p5986_p0 }
  0xb8   :  { %p5989_p3 = pnand %p5988_p2, %p5982_p13 }
  0xba   :  { %5992 = shalt.err (!%p5989_p3)
}
  0xbb   :  { %151 = dma.hbm_to_vmem [thread:$0]  %s7645_s14, 16, %s149_s30, [#allocation23]  }
  0xbc   :  { %5993 = dma.done.wait [#allocation9], 32  }
  0xbd   :  { %5994 = vsyncadd [#allocation9], 4294967264 }
  0xbe   :  { %5995 = dma.done.wait [#allocation11], 40992  }
  0xbf   :  { %5996 = vsyncadd [#allocation11], 4294926304 }
  0xc0   :  { %5997 = dma.done.wait [#allocation14], 12304  }
  0xc1   :  { %5998 = vsyncadd [#allocation14], 4294954992 }
  0xc2   :  { %5999 = dma.done.wait [#allocation17], 4112  }
  0xc3   :  { %6000 = vsyncadd [#allocation17], 4294963184 }
  0xc4   :  { %6001 = dma.done.wait [#allocation20], 4128  }
  0xc5   :  { %6002 = vsyncadd [#allocation20], 4294963168 }
  0xc6   :  { %6003 = dma.done.wait [#allocation23], 32  }
  0xc7   :  { %6004 = vsyncadd [#allocation23], 4294967264  ;;  %v6020_v0 = vmov 0.0   ;;  %v196_v1 = vld [vmem:[%s7632_s1 + $0x8] sm:$0xff]  ;;  %v198_v2 = vld [vmem:[%s7632_s1 + $0x18] sm:$0xff]  ;;  %vm6022_vm0 = vmmov 0  }
  0xc8   :  { %291 = vmatprep.mubr.f32.mxu0 %v6020_v0  ;;  %v195_v3 = vld [vmem:[%s7632_s1] sm:$0xff]  ;;  %v4737_v4 = vpack.c.bf16 %v198_v2, %v196_v1  ;;  %v197_v5 = vld [vmem:[%s7632_s1 + $0x10] sm:$0xff]  ;;  %v200_v6 = vld [vmem:[%s7632_s1 + $0x28] sm:$0xff] }
  0xc9   :  { %v202_v7 = vld [vmem:[%s7632_s1 + $0x38] sm:$0xff]  ;;  %v4739_v8 = vpack.c.bf16 %v197_v5, %v195_v3  ;;  %v199_v10 = vld [vmem:[%s7632_s1 + $0x20] sm:$0xff]  ;;  %v201_v11 = vld [vmem:[%s7632_s1 + $0x30] sm:$0xff] }
  0xca   :  { %v4741_v9 = vpack.c.bf16 %v202_v7, %v200_v6  ;;  %v204_v12 = vld [vmem:[%s7632_s1 + $0x48] sm:$0xff]  ;;  %4738 = vmatprep.subr.bf16.mxu0 %v4737_v4  ;;  %v206_v13 = vld [vmem:[%s7632_s1 + $0x58] sm:$0xff]  ;;  %v4743_v14 = vpack.c.bf16 %v201_v11, %v199_v10  ;;  %v203_v16 = vld [vmem:[%s7632_s1 + $0x40] sm:$0xff] }
  0xcb   :  { %4740 = vmatpush1.bf16.msra.mxu0 %v4739_v8  ;;  %v4745_v15 = vpack.c.bf16 %v206_v13, %v204_v12  ;;  %v205_v17 = vld [vmem:[%s7632_s1 + $0x50] sm:$0xff]  ;;  %v208_v18 = vld [vmem:[%s7632_s1 + $0x68] sm:$0xff]  ;;  %v210_v19 = vld [vmem:[%s7632_s1 + $0x78] sm:$0xff] }
  0xcc   :  { %4742 = vmatprep.subr.bf16.mxu0 %v4741_v9  ;;  %v4747_v20 = vpack.c.bf16 %v205_v17, %v203_v16  ;;  %v4749_v21 = vpack.c.bf16 %v210_v19, %v208_v18  ;;  %v207_v22 = vld [vmem:[%s7632_s1 + $0x60] sm:$0xff]  ;;  %v209_v23 = vld [vmem:[%s7632_s1 + $0x70] sm:$0xff]  ;;  %v212_v24 = vld [vmem:[%s7632_s1 + $0x88] sm:$0xff] }
  0xcd   :  { %v214_v25 = vld [vmem:[%s7632_s1 + $0x98] sm:$0xff]  ;;  %v4751_v26 = vpack.c.bf16 %v209_v23, %v207_v22  ;;  %v211_v28 = vld [vmem:[%s7632_s1 + $0x80] sm:$0xff]  ;;  %v213_v29 = vld [vmem:[%s7632_s1 + $0x90] sm:$0xff] }
  0xce   :  { %v4753_v27 = vpack.c.bf16 %v214_v25, %v212_v24  ;;  %v216_v30 = vld [vmem:[%s7632_s1 + $0xa8] sm:$0xff]  ;;  %v218_v31 = vld [vmem:[%s7632_s1 + $0xb8] sm:$0xff]  ;;  %v4755_v32 = vpack.c.bf16 %v213_v29, %v211_v28  ;;  %v215_v34 = vld [vmem:[%s7632_s1 + $0xa0] sm:$0xff] }
  0xcf   :  { %4744 = vmatpush1.bf16.msra.mxu0 %v4743_v14  ;;  %v4757_v33 = vpack.c.bf16 %v218_v31, %v216_v30  ;;  %v217_v35 = vld [vmem:[%s7632_s1 + $0xb0] sm:$0xff]  ;;  %v220_v36 = vld [vmem:[%s7632_s1 + $0xc8] sm:$0xff]  ;;  %v222_v37 = vld [vmem:[%s7632_s1 + $0xd8] sm:$0xff] }
  0xd0   :  { %4746 = vmatprep.subr.bf16.mxu0 %v4745_v15  ;;  %v4759_v38 = vpack.c.bf16 %v217_v35, %v215_v34  ;;  %v4761_v39 = vpack.c.bf16 %v222_v37, %v220_v36  ;;  %v219_v40 = vld [vmem:[%s7632_s1 + $0xc0] sm:$0xff]  ;;  %v221_v41 = vld [vmem:[%s7632_s1 + $0xd0] sm:$0xff]  ;;  %v224_v42 = vld [vmem:[%s7632_s1 + $0xe8] sm:$0xff] }
  0xd1   :  { %v226_v43 = vld [vmem:[%s7632_s1 + $0xf8] sm:$0xff]  ;;  %v4763_v44 = vpack.c.bf16 %v221_v41, %v219_v40  ;;  %v223_v46 = vld [vmem:[%s7632_s1 + $0xe0] sm:$0xff]  ;;  %v225_v47 = vld [vmem:[%s7632_s1 + $0xf0] sm:$0xff] }
  0xd2   :  { %v4765_v45 = vpack.c.bf16 %v226_v43, %v224_v42  ;;  %v4067_v48 = vld [vmem:[%s7632_s1 + $0x108] sm:$0xff]  ;;  %v4069_v49 = vld [vmem:[%s7632_s1 + $0x118] sm:$0xff]  ;;  %v4767_v50 = vpack.c.bf16 %v225_v47, %v223_v46  ;;  %v4066_v52 = vld [vmem:[%s7632_s1 + $0x100] sm:$0xff] }
  0xd3   :  { %4748 = vmatpush1.bf16.msra.mxu0 %v4747_v20  ;;  %v4769_v51 = vpack.c.bf16 %v4069_v49, %v4067_v48  ;;  %v4068_v53 = vld [vmem:[%s7632_s1 + $0x110] sm:$0xff]  ;;  %v4071_v54 = vld [vmem:[%s7632_s1 + $0x128] sm:$0xff]  ;;  %v4073_v55 = vld [vmem:[%s7632_s1 + $0x138] sm:$0xff] }
  0xd4   :  { %4750 = vmatprep.subr.bf16.mxu0 %v4749_v21  ;;  %v185_v56 = vld [vmem:[%s7631_s0] sm:$0xff]  ;;  %v4771_v57 = vpack.c.bf16 %v4068_v53, %v4066_v52  ;;  %v4773_v58 = vpack.c.bf16 %v4073_v55, %v4071_v54  ;;  %v4072_v60 = vld [vmem:[%s7632_s1 + $0x130] sm:$0xff]  ;;  %v4075_v61 = vld [vmem:[%s7632_s1 + $0x148] sm:$0xff] }
  0xd5   :  { %v4070_v59 = vld [vmem:[%s7632_s1 + $0x120] sm:$0xff]  ;;  %v4077_v62 = vld [vmem:[%s7632_s1 + $0x158] sm:$0xff]  ;;  %v6388_v63 = vld [vmem:[%s7631_s0 + $0x8] sm:$0xff] }
  0xd6   :  { %v4775_v1 = vpack.c.bf16 %v4072_v60, %v4070_v59  ;;  %v4777_v2 = vpack.c.bf16 %v4077_v62, %v4075_v61  ;;  %v4074_v3 = vld [vmem:[%s7632_s1 + $0x140] sm:$0xff]  ;;  %v4076_v4 = vld [vmem:[%s7632_s1 + $0x150] sm:$0xff]  ;;  %v4079_v5 = vld [vmem:[%s7632_s1 + $0x168] sm:$0xff] }
  0xd7   :  { %4752 = vmatpush1.bf16.msra.mxu0 %v4751_v26  ;;  %v4081_v6 = vld [vmem:[%s7632_s1 + $0x178] sm:$0xff]  ;;  %v6407_v7 = vld [vmem:[%s7631_s0 + $0x10] sm:$0xff]  ;;  %v4779_v8 = vpack.c.bf16 %v4076_v4, %v4074_v3  ;;  %v4078_v10 = vld [vmem:[%s7632_s1 + $0x160] sm:$0xff] }
  0xd8   :  { %4754 = vmatprep.subr.bf16.mxu0 %v4753_v27  ;;  %v4781_v9 = vpack.c.bf16 %v4081_v6, %v4079_v5  ;;  %v4080_v11 = vld [vmem:[%s7632_s1 + $0x170] sm:$0xff]  ;;  %v4083_v12 = vld [vmem:[%s7632_s1 + $0x188] sm:$0xff]  ;;  %v4085_v13 = vld [vmem:[%s7632_s1 + $0x198] sm:$0xff] }
  0xd9   :  { %v6426_v14 = vld [vmem:[%s7631_s0 + $0x18] sm:$0xff]  ;;  %v4783_v15 = vpack.c.bf16 %v4080_v11, %v4078_v10  ;;  %v4785_v16 = vpack.c.bf16 %v4085_v13, %v4083_v12  ;;  %v4082_v17 = vld [vmem:[%s7632_s1 + $0x180] sm:$0xff]  ;;  %v4084_v18 = vld [vmem:[%s7632_s1 + $0x190] sm:$0xff] }
  0xda   :  { %v4087_v19 = vld [vmem:[%s7632_s1 + $0x1a8] sm:$0xff]  ;;  %v4089_v20 = vld [vmem:[%s7632_s1 + $0x1b8] sm:$0xff]  ;;  %v6445_v21 = vld [vmem:[%s7631_s0 + $0x20] sm:$0xff]  ;;  %v4787_v22 = vpack.c.bf16 %v4084_v18, %v4082_v17 }
  0xdb   :  { %4756 = vmatpush1.bf16.msra.mxu0 %v4755_v32  ;;  %v4789_v23 = vpack.c.bf16 %v4089_v20, %v4087_v19  ;;  %v4086_v24 = vld [vmem:[%s7632_s1 + $0x1a0] sm:$0xff]  ;;  %v4088_v25 = vld [vmem:[%s7632_s1 + $0x1b0] sm:$0xff]  ;;  %v4091_v26 = vld [vmem:[%s7632_s1 + $0x1c8] sm:$0xff] }
  0xdc   :  { %4758 = vmatprep.subr.bf16.mxu0 %v4757_v33  ;;  %v4093_v27 = vld [vmem:[%s7632_s1 + $0x1d8] sm:$0xff]  ;;  %v6464_v28 = vld [vmem:[%s7631_s0 + $0x28] sm:$0xff]  ;;  %v4791_v29 = vpack.c.bf16 %v4088_v25, %v4086_v24  ;;  %v4090_v31 = vld [vmem:[%s7632_s1 + $0x1c0] sm:$0xff] }
  0xdd   :  { %v4793_v30 = vpack.c.bf16 %v4093_v27, %v4091_v26  ;;  %v4092_v32 = vld [vmem:[%s7632_s1 + $0x1d0] sm:$0xff]  ;;  %v4095_v33 = vld [vmem:[%s7632_s1 + $0x1e8] sm:$0xff]  ;;  %v4097_v34 = vld [vmem:[%s7632_s1 + $0x1f8] sm:$0xff] }
  0xde   :  { %v6483_v35 = vld [vmem:[%s7631_s0 + $0x30] sm:$0xff]  ;;  %v4795_v36 = vpack.c.bf16 %v4092_v32, %v4090_v31  ;;  %v4797_v37 = vpack.c.bf16 %v4097_v34, %v4095_v33  ;;  %v4099_v40 = vld [vmem:[%s7632_s1 + $0x208] sm:$0xff]  ;;  %v4101_v41 = vld [vmem:[%s7632_s1 + $0x218] sm:$0xff] }
  0xdf   :  { %4760 = vmatpush1.bf16.msra.mxu0 %v4759_v38  ;;  %v4094_v38 = vld [vmem:[%s7632_s1 + $0x1e0] sm:$0xff]  ;;  %v6502_v42 = vld [vmem:[%s7631_s0 + $0x38] sm:$0xff]  ;;  %v6516_v46 = vld [vmem:[%s7631_s0 + $0x48] sm:$0xff] }
  0xe0   :  { %4762 = vmatprep.subr.bf16.mxu0 %v4761_v39  ;;  %v4096_v39 = vld [vmem:[%s7632_s1 + $0x1f0] sm:$0xff]  ;;  %v4098_v47 = vld [vmem:[%s7632_s1 + $0x200] sm:$0xff]  ;;  %v4103_v49 = vld [vmem:[%s7632_s1 + $0x228] sm:$0xff] }
  0xe1   :  { %v4799_v43 = vpack.c.bf16 %v4096_v39, %v4094_v38  ;;  %v4100_v48 = vld [vmem:[%s7632_s1 + $0x210] sm:$0xff]  ;;  %v4102_v53 = vld [vmem:[%s7632_s1 + $0x220] sm:$0xff]  ;;  %v4107_v55 = vld [vmem:[%s7632_s1 + $0x248] sm:$0xff] }
  0xe2   :  { %v4104_v54 = vld [vmem:[%s7632_s1 + $0x230] sm:$0xff]  ;;  %v4106_v59 = vld [vmem:[%s7632_s1 + $0x240] sm:$0xff]  ;;  %v4111_v61 = vld [vmem:[%s7632_s1 + $0x268] sm:$0xff] }
  0xe3   :  { %4764 = vmatpush1.bf16.msra.mxu0 %v4763_v44  ;;  %v4801_v44 = vpack.c.bf16 %v4101_v41, %v4099_v40  ;;  %v4108_v60 = vld [vmem:[%s7632_s1 + $0x250] sm:$0xff]  ;;  %v4113_v62 = vld [vmem:[%s7632_s1 + $0x278] sm:$0xff]  ;;  %v4115_v4 = vld [vmem:[%s7632_s1 + $0x288] sm:$0xff] }
  0xe4   :  { %4766 = vmatprep.subr.bf16.mxu0 %v4765_v45  ;;  %v6509_v45 = vld [vmem:[%s7631_s0 + $0x40] sm:$0xff]  ;;  %v4112_v3 = vld [vmem:[%s7632_s1 + $0x270] sm:$0xff]  ;;  %v4117_v5 = vld [vmem:[%s7632_s1 + $0x298] sm:$0xff] }
  0xe5   :  { %v4116_v10 = vld [vmem:[%s7632_s1 + $0x290] sm:$0xff]  ;;  %v4119_v11 = vld [vmem:[%s7632_s1 + $0x2a8] sm:$0xff]  ;;  %v4121_v12 = vld [vmem:[%s7632_s1 + $0x2b8] sm:$0xff] }
  0xe6   :  { %v4120_v17 = vld [vmem:[%s7632_s1 + $0x2b0] sm:$0xff]  ;;  %v4123_v18 = vld [vmem:[%s7632_s1 + $0x2c8] sm:$0xff]  ;;  %v4125_v19 = vld [vmem:[%s7632_s1 + $0x2d8] sm:$0xff] }
  0xe7   :  { %4768 = vmatpush1.bf16.msra.mxu0 %v4767_v50  ;;  %v4105_v50 = vld [vmem:[%s7632_s1 + $0x238] sm:$0xff]  ;;  %v4124_v24 = vld [vmem:[%s7632_s1 + $0x2d0] sm:$0xff]  ;;  %v4127_v25 = vld [vmem:[%s7632_s1 + $0x2e8] sm:$0xff] }
  0xe8   :  { %4770 = vmatprep.subr.bf16.mxu0 %v4769_v51  ;;  %v4803_v51 = vpack.c.bf16 %v4100_v48, %v4098_v47  ;;  %v4805_v52 = vpack.c.bf16 %v4105_v50, %v4103_v49  ;;  %v4129_v26 = vld [vmem:[%s7632_s1 + $0x2f8] sm:$0xff]  ;;  %v4128_v31 = vld [vmem:[%s7632_s1 + $0x2f0] sm:$0xff]  ;;  %v4131_v32 = vld [vmem:[%s7632_s1 + $0x308] sm:$0xff] }
  0xe9   :  { %v4133_v33 = vld [vmem:[%s7632_s1 + $0x318] sm:$0xff]  ;;  %v4130_v38 = vld [vmem:[%s7632_s1 + $0x300] sm:$0xff]  ;;  %v4132_v39 = vld [vmem:[%s7632_s1 + $0x310] sm:$0xff] }
  0xea   :  { %292 = vmatmul.mubr.f32.vlgmr.msra.gmra.mrb[0].mxu0 %v185_v56  ;;  %v4109_v56 = vld [vmem:[%s7632_s1 + $0x258] sm:$0xff]  ;;  %v4135_v40 = vld [vmem:[%s7632_s1 + $0x328] sm:$0xff]  ;;  %v4134_v47 = vld [vmem:[%s7632_s1 + $0x320] sm:$0xff] }
  0xeb   :  { %4772 = vmatpush1.bf16.msra.mxu0 %v4771_v57  ;;  %297 = vmatprep.mubr.f32.mxu0 %v6020_v0  ;;  %v4807_v57 = vpack.c.bf16 %v4104_v54, %v4102_v53  ;;  %v4137_v41 = vld [vmem:[%s7632_s1 + $0x338] sm:$0xff]  ;;  %v4136_v48 = vld [vmem:[%s7632_s1 + $0x330] sm:$0xff]  ;;  %v4139_v49 = vld [vmem:[%s7632_s1 + $0x348] sm:$0xff] }
  0xec   :  { %4774 = vmatprep.subr.bf16.mxu0 %v4773_v58  ;;  %v4809_v58 = vpack.c.bf16 %v4109_v56, %v4107_v55  ;;  %v4141_v50 = vld [vmem:[%s7632_s1 + $0x358] sm:$0xff]  ;;  %v4138_v53 = vld [vmem:[%s7632_s1 + $0x340] sm:$0xff]  ;;  %v4140_v54 = vld [vmem:[%s7632_s1 + $0x350] sm:$0xff] }
  0xed   :  { %v4143_v55 = vld [vmem:[%s7632_s1 + $0x368] sm:$0xff]  ;;  %v4843_v56 = vpack.c.bf16 %v4140_v54, %v4138_v53  ;;  %v4176_v53 = vld [vmem:[%s7632_s1 + $0x470] sm:$0xff] }
  0xee   :  { %298 = vmatmul.mubr.f32.gmra.mrb[2].mxu0 %v6388_v63  ;;  %v4179_v54 = vld [vmem:[%s7632_s1 + $0x488] sm:$0xff] }
  0xef   :  { %4776 = vmatpush1.bf16.msra.mxu0 %v4775_v1  ;;  %303 = vmatprep.mubr.f32.mxu0 %v6020_v0  ;;  %v4813_v1 = vpack.c.bf16 %v4113_v62, %v4111_v61  ;;  %v4149_v61 = vld [vmem:[%s7632_s1 + $0x398] sm:$0xff] }
  0xf0   :  { %4778 = vmatprep.subr.bf16.mxu0 %v4777_v2  ;;  %v4110_v2 = vld [vmem:[%s7632_s1 + $0x260] sm:$0xff] }
  0xf1   :  { %v4815_v6 = vpack.c.bf16 %v4112_v3, %v4110_v2  ;;  %v4148_v2 = vld [vmem:[%s7632_s1 + $0x390] sm:$0xff]  ;;  %v4151_v3 = vld [vmem:[%s7632_s1 + $0x3a8] sm:$0xff] }
  0xf2   :  { %304 = vmatmul.mubr.f32.gmra.mrb[4].mxu0 %v6407_v7 }
  0xf3   :  { %309 = vmatprep.mubr.f32.mxu0 %v6020_v0  ;;  %4780 = vmatpush1.bf16.msra.mxu0 %v4779_v8  ;;  %v4817_v8 = vpack.c.bf16 %v4117_v5, %v4115_v4  ;;  %v4153_v4 = vld [vmem:[%s7632_s1 + $0x3b8] sm:$0xff] }
  0xf4   :  { %4782 = vmatprep.subr.bf16.mxu0 %v4781_v9  ;;  %v4114_v9 = vld [vmem:[%s7632_s1 + $0x280] sm:$0xff] }
  0xf5   :  { %v4819_v13 = vpack.c.bf16 %v4116_v10, %v4114_v9  ;;  %v4152_v9 = vld [vmem:[%s7632_s1 + $0x3b0] sm:$0xff]  ;;  %v4155_v10 = vld [vmem:[%s7632_s1 + $0x3c8] sm:$0xff] }
  0xf6   :  { %310 = vmatmul.mubr.f32.gmra.mrb[6].mxu0 %v6426_v14 }
  0xf7   :  { %315 = vmatprep.mubr.f32.mxu0 %v6020_v0  ;;  %4784 = vmatpush1.bf16.msra.mxu0 %v4783_v15  ;;  %v4821_v15 = vpack.c.bf16 %v4121_v12, %v4119_v11  ;;  %v4157_v11 = vld [vmem:[%s7632_s1 + $0x3d8] sm:$0xff] }
  0xf8   :  { %4786 = vmatprep.subr.bf16.mxu0 %v4785_v16  ;;  %v4118_v16 = vld [vmem:[%s7632_s1 + $0x2a0] sm:$0xff] }
  0xf9   :  { %v4823_v20 = vpack.c.bf16 %v4120_v17, %v4118_v16  ;;  %v4156_v16 = vld [vmem:[%s7632_s1 + $0x3d0] sm:$0xff]  ;;  %v4159_v17 = vld [vmem:[%s7632_s1 + $0x3e8] sm:$0xff] }
  0xfa   :  { %316 = vmatmul.mubr.f32.gmra.mrb[8].mxu0 %v6445_v21 }
  0xfb   :  { %321 = vmatprep.mubr.f32.mxu0 %v6020_v0  ;;  %4788 = vmatpush1.bf16.msra.mxu0 %v4787_v22  ;;  %v4825_v22 = vpack.c.bf16 %v4125_v19, %v4123_v18  ;;  %v4161_v18 = vld [vmem:[%s7632_s1 + $0x3f8] sm:$0xff] }
  0xfc   :  { %4790 = vmatprep.subr.bf16.mxu0 %v4789_v23  ;;  %v4122_v23 = vld [vmem:[%s7632_s1 + $0x2c0] sm:$0xff] }
  0xfd   :  { %v4827_v27 = vpack.c.bf16 %v4124_v24, %v4122_v23  ;;  %v4160_v23 = vld [vmem:[%s7632_s1 + $0x3f0] sm:$0xff]  ;;  %v4163_v24 = vld [vmem:[%s7632_s1 + $0x408] sm:$0xff] }
  0xfe   :  { %322 = vmatmul.mubr.f32.gmra.mrb[10].mxu0 %v6464_v28 }
  0xff   :  { %327 = vmatprep.mubr.f32.mxu0 %v6020_v0  ;;  %4792 = vmatpush1.bf16.msra.mxu0 %v4791_v29  ;;  %v4829_v29 = vpack.c.bf16 %v4129_v26, %v4127_v25  ;;  %v4165_v25 = vld [vmem:[%s7632_s1 + $0x418] sm:$0xff] }
 0x100   :  { %4794 = vmatprep.subr.bf16.mxu0 %v4793_v30  ;;  %v4126_v30 = vld [vmem:[%s7632_s1 + $0x2e0] sm:$0xff] }
 0x101   :  { %v4831_v34 = vpack.c.bf16 %v4128_v31, %v4126_v30  ;;  %v4162_v30 = vld [vmem:[%s7632_s1 + $0x400] sm:$0xff]  ;;  %v4164_v31 = vld [vmem:[%s7632_s1 + $0x410] sm:$0xff] }
 0x102   :  { %328 = vmatmul.mubr.f32.gmra.mrb[12].mxu0 %v6483_v35 }
 0x103   :  { %333 = vmatprep.mubr.f32.mxu0 %v6020_v0  ;;  %4796 = vmatpush1.bf16.msra.mxu0 %v4795_v36  ;;  %v4833_v36 = vpack.c.bf16 %v4133_v33, %v4131_v32  ;;  %v4167_v32 = vld [vmem:[%s7632_s1 + $0x428] sm:$0xff]  ;;  %v4169_v33 = vld [vmem:[%s7632_s1 + $0x438] sm:$0xff] }
 0x104   :  { %4798 = vmatprep.subr.bf16.mxu0 %v4797_v37  ;;  %v6637_v37 = vld [vmem:[%s7631_s0 + $0x50] sm:$0xff] }
 0x106   :  { %334 = vmatmul.mubr.f32.gmra.mrb[14].mxu0 %v6502_v42 }
 0x107   :  { %339 = vmatprep.mubr.f32.mxu0 %v6020_v0  ;;  %4800 = vmatpush1.bf16.msra.mxu0 %v4799_v43  ;;  %v4835_v43 = vpack.c.bf16 %v4132_v39, %v4130_v38  ;;  %v4166_v38 = vld [vmem:[%s7632_s1 + $0x420] sm:$0xff]  ;;  %v4168_v39 = vld [vmem:[%s7632_s1 + $0x430] sm:$0xff] }
 0x108   :  { %4802 = vmatprep.subr.bf16.mxu0 %v4801_v44  ;;  %v4837_v44 = vpack.c.bf16 %v4137_v41, %v4135_v40  ;;  %v4171_v40 = vld [vmem:[%s7632_s1 + $0x448] sm:$0xff]  ;;  %v4173_v41 = vld [vmem:[%s7632_s1 + $0x458] sm:$0xff] }
 0x10a   :  { %340 = vmatmul.mubr.f32.gmra.mrb[16].mxu0 %v6509_v45 }
 0x10b   :  { %345 = vmatprep.mubr.f32.mxu0 %v6020_v0 }
 0x10e   :  { %346 = vmatmul.mubr.f32.gmra.mrb[18].mxu0 %v6516_v46 }
 0x10f   :  { %479 = vmatprep.mubr.f32.mxu0 %v6020_v0 }
 0x112   :  { %480 = vmatmul.mubr.f32.vlgmr.msra.gmra.mrb[0].mxu0 %v6388_v63  ;;  %v4811_v63 = vpack.c.bf16 %v4108_v60, %v4106_v59  ;;  %v4144_v59 = vld [vmem:[%s7632_s1 + $0x370] sm:$0xff]  ;;  %v4147_v60 = vld [vmem:[%s7632_s1 + $0x388] sm:$0xff] }
 0x113   :  { %4804 = vmatpush1.bf16.msra.mxu0 %v4803_v51  ;;  %485 = vmatprep.mubr.f32.mxu0 %v6020_v0  ;;  %v4839_v51 = vpack.c.bf16 %v4136_v48, %v4134_v47  ;;  %v4170_v47 = vld [vmem:[%s7632_s1 + $0x440] sm:$0xff]  ;;  %v4172_v48 = vld [vmem:[%s7632_s1 + $0x450] sm:$0xff] }
 0x114   :  { %4806 = vmatprep.subr.bf16.mxu0 %v4805_v52  ;;  %v4841_v52 = vpack.c.bf16 %v4141_v50, %v4139_v49  ;;  %v4175_v49 = vld [vmem:[%s7632_s1 + $0x468] sm:$0xff]  ;;  %v4875_v50 = vpack.c.bf16 %v4172_v48, %v4170_v47  ;;  %v4196_v47 = vld [vmem:[%s7632_s1 + $0x510] sm:$0xff] }
 0x115   :  { %v4199_v48 = vld [vmem:[%s7632_s1 + $0x528] sm:$0xff] }
 0x116   :  { %486 = vmatmul.mubr.f32.gmra.mrb[2].mxu0 %v6407_v7 }
 0x117   :  { %4808 = vmatpush1.bf16.msra.mxu0 %v4807_v57  ;;  %491 = vmatprep.mubr.f32.mxu0 %v6020_v0 }
 0x118   :  { %4810 = vmatprep.subr.bf16.mxu0 %v4809_v58  ;;  %v4142_v58 = vld [vmem:[%s7632_s1 + $0x360] sm:$0xff] }
 0x119   :  { %v4847_v62 = vpack.c.bf16 %v4144_v59, %v4142_v58  ;;  %v4180_v58 = vld [vmem:[%s7632_s1 + $0x490] sm:$0xff]  ;;  %v4183_v59 = vld [vmem:[%s7632_s1 + $0x4a8] sm:$0xff] }
 0x11a   :  { %492 = vmatmul.mubr.f32.gmra.mrb[4].mxu0 %v6426_v14 }
 0x11b   :  { %497 = vmatprep.mubr.f32.mxu0 %v6020_v0  ;;  %4812 = vmatpush1.bf16.msra.mxu0 %v4811_v63  ;;  %v4849_v63 = vpack.c.bf16 %v4149_v61, %v4147_v60  ;;  %v4185_v60 = vld [vmem:[%s7632_s1 + $0x4b8] sm:$0xff] }
 0x11c   :  { %4814 = vmatprep.subr.bf16.mxu0 %v4813_v1  ;;  %v4146_v1 = vld [vmem:[%s7632_s1 + $0x380] sm:$0xff] }
 0x11d   :  { %v4851_v5 = vpack.c.bf16 %v4148_v2, %v4146_v1  ;;  %v4184_v1 = vld [vmem:[%s7632_s1 + $0x4b0] sm:$0xff]  ;;  %v4187_v2 = vld [vmem:[%s7632_s1 + $0x4c8] sm:$0xff] }
 0x11e   :  { %498 = vmatmul.mubr.f32.gmra.mrb[6].mxu0 %v6445_v21 }
 0x11f   :  { %503 = vmatprep.mubr.f32.mxu0 %v6020_v0  ;;  %4816 = vmatpush1.bf16.msra.mxu0 %v4815_v6  ;;  %v4853_v6 = vpack.c.bf16 %v4153_v4, %v4151_v3  ;;  %v4189_v3 = vld [vmem:[%s7632_s1 + $0x4d8] sm:$0xff] }
 0x120   :  { %4818 = vmatprep.subr.bf16.mxu0 %v4817_v8  ;;  %v4150_v8 = vld [vmem:[%s7632_s1 + $0x3a0] sm:$0xff] }
 0x121   :  { %v4855_v12 = vpack.c.bf16 %v4152_v9, %v4150_v8  ;;  %v4188_v8 = vld [vmem:[%s7632_s1 + $0x4d0] sm:$0xff]  ;;  %v4191_v9 = vld [vmem:[%s7632_s1 + $0x4e8] sm:$0xff] }
 0x122   :  { %504 = vmatmul.mubr.f32.gmra.mrb[8].mxu0 %v6464_v28 }
 0x123   :  { %509 = vmatprep.mubr.f32.mxu0 %v6020_v0  ;;  %4820 = vmatpush1.bf16.msra.mxu0 %v4819_v13  ;;  %v4857_v13 = vpack.c.bf16 %v4157_v11, %v4155_v10  ;;  %v4193_v10 = vld [vmem:[%s7632_s1 + $0x4f8] sm:$0xff] }
 0x124   :  { %4822 = vmatprep.subr.bf16.mxu0 %v4821_v15  ;;  %v4154_v15 = vld [vmem:[%s7632_s1 + $0x3c0] sm:$0xff] }
 0x125   :  { %v4859_v19 = vpack.c.bf16 %v4156_v16, %v4154_v15  ;;  %v4192_v15 = vld [vmem:[%s7632_s1 + $0x4f0] sm:$0xff]  ;;  %v4195_v16 = vld [vmem:[%s7632_s1 + $0x508] sm:$0xff] }
 0x126   :  { %510 = vmatmul.mubr.f32.gmra.mrb[10].mxu0 %v6483_v35 }
 0x127   :  { %515 = vmatprep.mubr.f32.mxu0 %v6020_v0  ;;  %4824 = vmatpush1.bf16.msra.mxu0 %v4823_v20  ;;  %v4861_v20 = vpack.c.bf16 %v4161_v18, %v4159_v17  ;;  %v4197_v17 = vld [vmem:[%s7632_s1 + $0x518] sm:$0xff] }
 0x128   :  { %4826 = vmatprep.subr.bf16.mxu0 %v4825_v22  ;;  %v4158_v22 = vld [vmem:[%s7632_s1 + $0x3e0] sm:$0xff] }
 0x129   :  { %v4863_v26 = vpack.c.bf16 %v4160_v23, %v4158_v22  ;;  %v1847_v22 = vld [vmem:[#allocation10 + $0x18] sm:$0xff]  ;;  %v1844_v23 = vld [vmem:[#allocation10] sm:$0xff] }
 0x12a   :  { %516 = vmatmul.mubr.f32.gmra.mrb[12].mxu0 %v6502_v42 }
 0x12b   :  { %521 = vmatprep.mubr.f32.mxu0 %v6020_v0  ;;  %4828 = vmatpush1.bf16.msra.mxu0 %v4827_v27  ;;  %v4865_v27 = vpack.c.bf16 %v4165_v25, %v4163_v24  ;;  %v1846_v25 = vld [vmem:[#allocation10 + $0x10] sm:$0xff] }
 0x12c   :  { %4830 = vmatprep.subr.bf16.mxu0 %v4829_v29  ;;  %v6758_v29 = vld [vmem:[%s7631_s0 + $0x58] sm:$0xff] }
 0x12e   :  { %522 = vmatmul.mubr.f32.gmra.mrb[14].mxu0 %v6509_v45 }
 0x12f   :  { %527 = vmatprep.mubr.f32.mxu0 %v6020_v0  ;;  %4832 = vmatpush1.bf16.msra.mxu0 %v4831_v34  ;;  %v4867_v34 = vpack.c.bf16 %v4164_v31, %v4162_v30  ;;  %v4963_v30 = vpack.c.bf16 %v1846_v25, %v1844_v23  ;;  %v1869_v23 = vld [vmem:[#allocation10 + $0xc8] sm:$0xff] }
 0x130   :  { %4834 = vmatprep.subr.bf16.mxu0 %v4833_v36  ;;  %v4869_v36 = vpack.c.bf16 %v4169_v33, %v4167_v32  ;;  %v1848_v32 = vld [vmem:[#allocation10 + $0x20] sm:$0xff]  ;;  %v1850_v33 = vld [vmem:[#allocation10 + $0x30] sm:$0xff] }
 0x132   :  { %528 = vmatmul.mubr.f32.gmra.mrb[16].mxu0 %v6516_v46 }
 0x133   :  { %533 = vmatprep.mubr.f32.mxu0 %v6020_v0 }
 0x136   :  { %534 = vmatmul.mubr.f32.gmra.mrb[18].mxu0 %v6637_v37 }
 0x137   :  { %707 = vmatprep.mubr.f32.mxu0 %v6020_v0 }
 0x13a   :  { %708 = vmatmul.mubr.f32.vlgmr.msra.gmra.mrb[0].mxu0 %v6407_v7  ;;  %v4145_v7 = vld [vmem:[%s7632_s1 + $0x378] sm:$0xff] }
 0x13b   :  { %4836 = vmatpush1.bf16.msra.mxu0 %v4835_v43  ;;  %713 = vmatprep.mubr.f32.mxu0 %v6020_v0  ;;  %v4845_v57 = vpack.c.bf16 %v4145_v7, %v4143_v55  ;;  %v4871_v43 = vpack.c.bf16 %v4168_v39, %v4166_v38  ;;  %v4181_v55 = vld [vmem:[%s7632_s1 + $0x498] sm:$0xff]  ;;  %v4967_v38 = vpack.c.bf16 %v1850_v33, %v1848_v32  ;;  %v6879_v39 = vld [vmem:[%s7631_s0 + $0x60] sm:$0xff]  ;;  %v4212_v33 = vld [vmem:[%s7632_s1 + $0x590] sm:$0xff] }
 0x13c   :  { %4838 = vmatprep.subr.bf16.mxu0 %v4837_v44  ;;  %v4873_v44 = vpack.c.bf16 %v4173_v41, %v4171_v40  ;;  %v1852_v41 = vld [vmem:[#allocation10 + $0x40] sm:$0xff] }
 0x13d   :  { %v4210_v32 = vld [vmem:[%s7632_s1 + $0x580] sm:$0xff] }
 0x13e   :  { %714 = vmatmul.mubr.f32.gmra.mrb[2].mxu0 %v6426_v14 }
 0x13f   :  { %4840 = vmatpush1.bf16.msra.mxu0 %v4839_v51  ;;  %719 = vmatprep.mubr.f32.mxu0 %v6020_v0 }
 0x140   :  { %4842 = vmatprep.subr.bf16.mxu0 %v4841_v52  ;;  %v4174_v52 = vld [vmem:[%s7632_s1 + $0x460] sm:$0xff] }
 0x141   :  { %v4879_v7 = vpack.c.bf16 %v4176_v53, %v4174_v52  ;;  %v1856_v53 = vld [vmem:[#allocation10 + $0x60] sm:$0xff] }
 0x142   :  { %720 = vmatmul.mubr.f32.gmra.mrb[4].mxu0 %v6445_v21 }
 0x143   :  { %725 = vmatprep.mubr.f32.mxu0 %v6020_v0  ;;  %4844 = vmatpush1.bf16.msra.mxu0 %v4843_v56  ;;  %v4881_v56 = vpack.c.bf16 %v4181_v55, %v4179_v54  ;;  %v1858_v54 = vld [vmem:[#allocation10 + $0x70] sm:$0xff] }
 0x144   :  { %4846 = vmatprep.subr.bf16.mxu0 %v4845_v57  ;;  %v4178_v57 = vld [vmem:[%s7632_s1 + $0x480] sm:$0xff] }
 0x145   :  { %v4883_v61 = vpack.c.bf16 %v4180_v58, %v4178_v57  ;;  %v4203_v57 = vld [vmem:[%s7632_s1 + $0x548] sm:$0xff] }
 0x146   :  { %726 = vmatmul.mubr.f32.gmra.mrb[6].mxu0 %v6464_v28 }
 0x147   :  { %731 = vmatprep.mubr.f32.mxu0 %v6020_v0  ;;  %4848 = vmatpush1.bf16.msra.mxu0 %v4847_v62  ;;  %v4885_v62 = vpack.c.bf16 %v4185_v60, %v4183_v59  ;;  %v4205_v59 = vld [vmem:[%s7632_s1 + $0x558] sm:$0xff]  ;;  %v1861_v60 = vld [vmem:[#allocation10 + $0x88] sm:$0xff] }
 0x148   :  { %4850 = vmatprep.subr.bf16.mxu0 %v4849_v63  ;;  %v4182_v63 = vld [vmem:[%s7632_s1 + $0x4a0] sm:$0xff] }
 0x149   :  { %v4887_v4 = vpack.c.bf16 %v4184_v1, %v4182_v63  ;;  %v1860_v1 = vld [vmem:[#allocation10 + $0x80] sm:$0xff] }
 0x14a   :  { %732 = vmatmul.mubr.f32.gmra.mrb[8].mxu0 %v6483_v35 }
 0x14b   :  { %737 = vmatprep.mubr.f32.mxu0 %v6020_v0  ;;  %4852 = vmatpush1.bf16.msra.mxu0 %v4851_v5  ;;  %v4889_v5 = vpack.c.bf16 %v4189_v3, %v4187_v2  ;;  %v1862_v2 = vld [vmem:[#allocation10 + $0x90] sm:$0xff]  ;;  %v4905_v3 = vpack.c.bf16 %v4205_v59, %v4203_v57  ;;  %v1876_v57 = vld [vmem:[#allocation10 + $0x100] sm:$0xff] }
 0x14c   :  { %4854 = vmatprep.subr.bf16.mxu0 %v4853_v6  ;;  %v4186_v6 = vld [vmem:[%s7632_s1 + $0x4c0] sm:$0xff] }
 0x14d   :  { %v4891_v11 = vpack.c.bf16 %v4188_v8, %v4186_v6  ;;  %v4209_v8 = vld [vmem:[%s7632_s1 + $0x578] sm:$0xff] }
 0x14e   :  { %738 = vmatmul.mubr.f32.gmra.mrb[10].mxu0 %v6502_v42 }
 0x14f   :  { %743 = vmatprep.mubr.f32.mxu0 %v6020_v0  ;;  %4856 = vmatpush1.bf16.msra.mxu0 %v4855_v12  ;;  %v4893_v12 = vpack.c.bf16 %v4193_v10, %v4191_v9  ;;  %v1865_v9 = vld [vmem:[#allocation10 + $0xa8] sm:$0xff]  ;;  %v1867_v10 = vld [vmem:[#allocation10 + $0xb8] sm:$0xff] }
 0x150   :  { %4858 = vmatprep.subr.bf16.mxu0 %v4857_v13  ;;  %v4190_v13 = vld [vmem:[%s7632_s1 + $0x4e0] sm:$0xff] }
 0x151   :  { %v4895_v18 = vpack.c.bf16 %v4192_v15, %v4190_v13  ;;  %v1864_v13 = vld [vmem:[#allocation10 + $0xa0] sm:$0xff]  ;;  %v1866_v15 = vld [vmem:[#allocation10 + $0xb0] sm:$0xff] }
 0x152   :  { %744 = vmatmul.mubr.f32.gmra.mrb[12].mxu0 %v6509_v45  ;;  %v4983_v25 = vpack.c.bf16 %v1866_v15, %v1864_v13  ;;  %v1885_v13 = vld [vmem:[#allocation10 + $0x148] sm:$0xff]  ;;  %v1887_v15 = vld [vmem:[#allocation10 + $0x158] sm:$0xff] }
 0x153   :  { %749 = vmatprep.mubr.f32.mxu0 %v6020_v0  ;;  %4860 = vmatpush1.bf16.msra.mxu0 %v4859_v19  ;;  %v4897_v19 = vpack.c.bf16 %v4197_v17, %v4195_v16  ;;  %v4206_v17 = vld [vmem:[%s7632_s1 + $0x560] sm:$0xff] }
 0x154   :  { %4862 = vmatprep.subr.bf16.mxu0 %v4861_v20  ;;  %v1845_v20 = vld [vmem:[#allocation10 + $0x8] sm:$0xff] }
 0x155   :  { %v4961_v24 = vpack.c.bf16 %v1847_v22, %v1845_v20  ;;  %v4981_v20 = vpack.c.bf16 %v1867_v10, %v1865_v9  ;;  %v4213_v22 = vld [vmem:[%s7632_s1 + $0x598] sm:$0xff]  ;;  %v4222_v9 = vld [vmem:[%s7632_s1 + $0x5e0] sm:$0xff]  ;;  %v4224_v10 = vld [vmem:[%s7632_s1 + $0x5f0] sm:$0xff] }
 0x156   :  { %750 = vmatmul.mubr.f32.gmra.mrb[14].mxu0 %v6516_v46 }
 0x157   :  { %755 = vmatprep.mubr.f32.mxu0 %v6020_v0  ;;  %4864 = vmatpush1.bf16.msra.mxu0 %v4863_v26  ;;  %v1849_v26 = vld [vmem:[#allocation10 + $0x28] sm:$0xff] }
 0x158   :  { %4866 = vmatprep.subr.bf16.mxu0 %v4865_v27  ;;  %v1851_v27 = vld [vmem:[#allocation10 + $0x38] sm:$0xff]  ;;  %4962 = vmatprep.subr.bf16.mxu1 %v4961_v24 }
 0x159   :  { %v4965_v31 = vpack.c.bf16 %v1851_v27, %v1849_v26  ;;  %4964 = vmatpush1.bf16.msra.mxu1 %v4963_v30  ;;  %v1871_v24 = vld [vmem:[#allocation10 + $0xd8] sm:$0xff]  ;;  %v1868_v27 = vld [vmem:[#allocation10 + $0xc0] sm:$0xff]  ;;  %v1870_v30 = vld [vmem:[#allocation10 + $0xd0] sm:$0xff] }
 0x15a   :  { %756 = vmatmul.mubr.f32.gmra.mrb[16].mxu0 %v6637_v37 }
 0x15b   :  { %761 = vmatprep.mubr.f32.mxu0 %v6020_v0  ;;  %4966 = vmatprep.subr.bf16.mxu1 %v4965_v31 }
 0x15d   :  { %4968 = vmatpush1.bf16.msra.mxu1 %v4967_v38  ;;  %v4217_v38 = vld [vmem:[%s7632_s1 + $0x5b8] sm:$0xff] }
 0x15e   :  { %762 = vmatmul.mubr.f32.gmra.mrb[18].mxu0 %v6758_v29 }
 0x15f   :  { %935 = vmatprep.mubr.f32.mxu0 %v6020_v0 }
 0x162   :  { %936 = vmatmul.mubr.f32.vlgmr.msra.gmra.mrb[0].mxu0 %v6426_v14  ;;  %v4177_v14 = vld [vmem:[%s7632_s1 + $0x478] sm:$0xff] }
 0x163   :  { %4868 = vmatpush1.bf16.msra.mxu0 %v4867_v34  ;;  %941 = vmatprep.mubr.f32.mxu0 %v6020_v0  ;;  %v4877_v51 = vpack.c.bf16 %v4177_v14, %v4175_v49  ;;  %v1853_v34 = vld [vmem:[#allocation10 + $0x48] sm:$0xff]  ;;  %v4201_v49 = vld [vmem:[%s7632_s1 + $0x538] sm:$0xff] }
 0x164   :  { %4870 = vmatprep.subr.bf16.mxu0 %v4869_v36  ;;  %v1855_v36 = vld [vmem:[#allocation10 + $0x58] sm:$0xff]  ;;  %v1857_v14 = vld [vmem:[#allocation10 + $0x68] sm:$0xff]  ;;  %v4901_v55 = vpack.c.bf16 %v4201_v49, %v4199_v48  ;;  %v1874_v48 = vld [vmem:[#allocation10 + $0xf0] sm:$0xff] }
 0x165   :  { %v4969_v40 = vpack.c.bf16 %v1855_v36, %v1853_v34  ;;  %v4215_v34 = vld [vmem:[%s7632_s1 + $0x5a8] sm:$0xff]  ;;  %v4985_v36 = vpack.c.bf16 %v1871_v24, %v1869_v23  ;;  %v1891_v24 = vld [vmem:[#allocation10 + $0x178] sm:$0xff] }
 0x166   :  { %942 = vmatmul.mubr.f32.gmra.mrb[2].mxu0 %v6445_v21  ;;  %v4917_v49 = vpack.c.bf16 %v4217_v38, %v4215_v34  ;;  %v1889_v23 = vld [vmem:[#allocation10 + $0x168] sm:$0xff]  ;;  %v1892_v38 = vld [vmem:[#allocation10 + $0x180] sm:$0xff] }
 0x167   :  { %4872 = vmatpush1.bf16.msra.mxu0 %v4871_v43  ;;  %947 = vmatprep.mubr.f32.mxu0 %v6020_v0  ;;  %v1854_v43 = vld [vmem:[#allocation10 + $0x50] sm:$0xff]  ;;  %v7000_v34 = vld [vmem:[%s7631_s0 + $0x68] sm:$0xff] }
 0x168   :  { %4874 = vmatprep.subr.bf16.mxu0 %v4873_v44  ;;  %v4194_v44 = vld [vmem:[%s7632_s1 + $0x500] sm:$0xff]  ;;  %4970 = vmatprep.subr.bf16.mxu1 %v4969_v40  ;;  %v1873_v40 = vld [vmem:[#allocation10 + $0xe8] sm:$0xff] }
 0x169   :  { %v4899_v52 = vpack.c.bf16 %v4196_v47, %v4194_v44  ;;  %v4915_v44 = vpack.c.bf16 %v4212_v33, %v4210_v32  ;;  %v1872_v47 = vld [vmem:[#allocation10 + $0xe0] sm:$0xff]  ;;  %v1895_v32 = vld [vmem:[#allocation10 + $0x198] sm:$0xff] }
 0x16a   :  { %948 = vmatmul.mubr.f32.gmra.mrb[4].mxu0 %v6464_v28 }
 0x16b   :  { %953 = vmatprep.mubr.f32.mxu0 %v6020_v0  ;;  %4876 = vmatpush1.bf16.msra.mxu0 %v4875_v50  ;;  %v1859_v50 = vld [vmem:[#allocation10 + $0x78] sm:$0xff] }
 0x16c   :  { %4878 = vmatprep.subr.bf16.mxu0 %v4877_v51  ;;  %v4971_v51 = vpack.c.bf16 %v1854_v43, %v1852_v41  ;;  %v4973_v58 = vpack.c.bf16 %v1859_v50, %v1857_v14  ;;  %v1875_v41 = vld [vmem:[#allocation10 + $0xf8] sm:$0xff]  ;;  %v4987_v43 = vpack.c.bf16 %v1870_v30, %v1868_v27  ;;  %v4216_v50 = vld [vmem:[%s7632_s1 + $0x5b0] sm:$0xff]  ;;  %v1888_v27 = vld [vmem:[#allocation10 + $0x160] sm:$0xff] }
 0x16d   :  { %v4214_v14 = vld [vmem:[%s7632_s1 + $0x5a0] sm:$0xff]  ;;  %v1890_v30 = vld [vmem:[#allocation10 + $0x170] sm:$0xff] }
 0x16e   :  { %954 = vmatmul.mubr.f32.gmra.mrb[6].mxu0 %v6483_v35  ;;  %4972 = vmatpush1.bf16.msra.mxu1 %v4971_v51  ;;  %v4219_v51 = vld [vmem:[%s7632_s1 + $0x5c8] sm:$0xff]  ;;  %v5007_v33 = vpack.c.bf16 %v1890_v30, %v1888_v27  ;;  %v4252_v27 = vld [vmem:[%s7632_s1 + $0x6d0] sm:$0xff] }
 0x16f   :  { %959 = vmatprep.mubr.f32.mxu0 %v6020_v0  ;;  %4880 = vmatpush1.bf16.msra.mxu0 %v4879_v7  ;;  %v4198_v7 = vld [vmem:[%s7632_s1 + $0x520] sm:$0xff]  ;;  %v4255_v30 = vld [vmem:[%s7632_s1 + $0x6e8] sm:$0xff] }
 0x170   :  { %4882 = vmatprep.subr.bf16.mxu0 %v4881_v56  ;;  %v4200_v56 = vld [vmem:[%s7632_s1 + $0x530] sm:$0xff]  ;;  %4974 = vmatprep.subr.bf16.mxu1 %v4973_v58 }
 0x171   :  { %v4903_v63 = vpack.c.bf16 %v4200_v56, %v4198_v7  ;;  %v4991_v7 = vpack.c.bf16 %v1874_v48, %v1872_v47  ;;  %v4919_v56 = vpack.c.bf16 %v4216_v50, %v4214_v14  ;;  %v1878_v58 = vld [vmem:[#allocation10 + $0x110] sm:$0xff]  ;;  %v1897_v48 = vld [vmem:[#allocation10 + $0x1a8] sm:$0xff] }
 0x172   :  { %960 = vmatmul.mubr.f32.gmra.mrb[8].mxu0 %v6502_v42  ;;  %v4233_v47 = vld [vmem:[%s7632_s1 + $0x638] sm:$0xff] }
 0x173   :  { %965 = vmatprep.mubr.f32.mxu0 %v6020_v0  ;;  %4884 = vmatpush1.bf16.msra.mxu0 %v4883_v61  ;;  %v1863_v61 = vld [vmem:[#allocation10 + $0x98] sm:$0xff] }
 0x174   :  { %4886 = vmatprep.subr.bf16.mxu0 %v4885_v62  ;;  %v4975_v62 = vpack.c.bf16 %v1858_v54, %v1856_v53  ;;  %v4977_v6 = vpack.c.bf16 %v1863_v61, %v1861_v60  ;;  %v4221_v53 = vld [vmem:[%s7632_s1 + $0x5d8] sm:$0xff]  ;;  %v1877_v54 = vld [vmem:[#allocation10 + $0x108] sm:$0xff]  ;;  %v4218_v60 = vld [vmem:[%s7632_s1 + $0x5c0] sm:$0xff] }
 0x175   :  { %v4921_v59 = vpack.c.bf16 %v4221_v53, %v4219_v51  ;;  %v4220_v61 = vld [vmem:[%s7632_s1 + $0x5d0] sm:$0xff]  ;;  %v1896_v51 = vld [vmem:[#allocation10 + $0x1a0] sm:$0xff] }
 0x176   :  { %966 = vmatmul.mubr.f32.gmra.mrb[10].mxu0 %v6509_v45  ;;  %4976 = vmatpush1.bf16.msra.mxu1 %v4975_v62  ;;  %v4223_v62 = vld [vmem:[%s7632_s1 + $0x5e8] sm:$0xff] }
 0x177   :  { %971 = vmatprep.mubr.f32.mxu0 %v6020_v0  ;;  %4888 = vmatpush1.bf16.msra.mxu0 %v4887_v4  ;;  %v4202_v4 = vld [vmem:[%s7632_s1 + $0x540] sm:$0xff] }
 0x178   :  { %4890 = vmatprep.subr.bf16.mxu0 %v4889_v5  ;;  %v4204_v5 = vld [vmem:[%s7632_s1 + $0x550] sm:$0xff]  ;;  %4978 = vmatprep.subr.bf16.mxu1 %v4977_v6 }
 0x179   :  { %v1882_v6 = vld [vmem:[#allocation10 + $0x130] sm:$0xff] }
 0x17a   :  { %972 = vmatmul.mubr.f32.gmra.mrb[12].mxu0 %v6516_v46 }
 0x17b   :  { %977 = vmatprep.mubr.f32.mxu0 %v6020_v0  ;;  %4892 = vmatpush1.bf16.msra.mxu0 %v4891_v11  ;;  %v4979_v11 = vpack.c.bf16 %v1862_v2, %v1860_v1  ;;  %v4225_v1 = vld [vmem:[%s7632_s1 + $0x5f8] sm:$0xff]  ;;  %v1881_v2 = vld [vmem:[#allocation10 + $0x128] sm:$0xff] }
 0x17c   :  { %4894 = vmatprep.subr.bf16.mxu0 %v4893_v12  ;;  %v4907_v12 = vpack.c.bf16 %v4204_v5, %v4202_v4  ;;  %v4995_v4 = vpack.c.bf16 %v1878_v58, %v1876_v57  ;;  %v4923_v5 = vpack.c.bf16 %v4220_v61, %v4218_v60  ;;  %v4237_v57 = vld [vmem:[%s7632_s1 + $0x658] sm:$0xff]  ;;  %v1901_v58 = vld [vmem:[#allocation10 + $0x1c8] sm:$0xff] }
 0x17d   :  { %4980 = vmatpush1.bf16.msra.mxu1 %v4979_v11 }
 0x17e   :  { %978 = vmatmul.mubr.f32.gmra.mrb[14].mxu0 %v6637_v37  ;;  %4982 = vmatprep.subr.bf16.mxu1 %v4981_v20 }
 0x17f   :  { %983 = vmatprep.mubr.f32.mxu0 %v6020_v0  ;;  %4896 = vmatpush1.bf16.msra.mxu0 %v4895_v18  ;;  %v4208_v18 = vld [vmem:[%s7632_s1 + $0x570] sm:$0xff] }
 0x180   :  { %4898 = vmatprep.subr.bf16.mxu0 %v4897_v19  ;;  %v4211_v19 = vld [vmem:[%s7632_s1 + $0x588] sm:$0xff]  ;;  %v4911_v26 = vpack.c.bf16 %v4208_v18, %v4206_v17  ;;  %v4927_v17 = vpack.c.bf16 %v4224_v10, %v4222_v9  ;;  %v4238_v9 = vld [vmem:[%s7632_s1 + $0x660] sm:$0xff]  ;;  %v4240_v10 = vld [vmem:[%s7632_s1 + $0x670] sm:$0xff] }
 0x181   :  { %v4913_v31 = vpack.c.bf16 %v4213_v22, %v4211_v19  ;;  %4984 = vmatpush1.bf16.msra.mxu1 %v4983_v25  ;;  %v1884_v18 = vld [vmem:[#allocation10 + $0x140] sm:$0xff]  ;;  %v1886_v19 = vld [vmem:[#allocation10 + $0x150] sm:$0xff]  ;;  %v5001_v22 = vpack.c.bf16 %v1887_v15, %v1885_v13 }
 0x182   :  { %984 = vmatmul.mubr.f32.gmra.mrb[16].mxu0 %v6758_v29  ;;  %4986 = vmatprep.subr.bf16.mxu1 %v4985_v36  ;;  %v5003_v25 = vpack.c.bf16 %v1886_v19, %v1884_v18  ;;  %v4242_v13 = vld [vmem:[%s7632_s1 + $0x680] sm:$0xff]  ;;  %v4244_v15 = vld [vmem:[%s7632_s1 + $0x690] sm:$0xff] }
 0x183   :  { %989 = vmatprep.mubr.f32.mxu0 %v6020_v0  ;;  %v4246_v19 = vld [vmem:[%s7632_s1 + $0x6a0] sm:$0xff] }
 0x185   :  { %4988 = vmatpush1.bf16.msra.mxu1 %v4987_v43  ;;  %v4228_v43 = vld [vmem:[%s7632_s1 + $0x610] sm:$0xff] }
 0x186   :  { %990 = vmatmul.mubr.f32.gmra.mrb[18].mxu0 %v6879_v39 }
 0x187   :  { %1163 = vmatprep.mubr.f32.mxu0 %v6020_v0 }
 0x18a   :  { %1164 = vmatmul.mubr.f32.vlgmr.msra.gmra.mrb[0].mxu0 %v6445_v21  ;;  %v4207_v21 = vld [vmem:[%s7632_s1 + $0x568] sm:$0xff] }
 0x18b   :  { %4900 = vmatpush1.bf16.msra.mxu0 %v4899_v52  ;;  %1169 = vmatprep.mubr.f32.mxu0 %v6020_v0  ;;  %v4909_v16 = vpack.c.bf16 %v4209_v8, %v4207_v21  ;;  %v4989_v52 = vpack.c.bf16 %v1875_v41, %v1873_v40  ;;  %v1880_v21 = vld [vmem:[#allocation10 + $0x120] sm:$0xff]  ;;  %v4925_v8 = vpack.c.bf16 %v4225_v1, %v4223_v62  ;;  %v1894_v40 = vld [vmem:[#allocation10 + $0x190] sm:$0xff] }
 0x18c   :  { %4902 = vmatprep.subr.bf16.mxu0 %v4901_v55  ;;  %v1879_v55 = vld [vmem:[#allocation10 + $0x118] sm:$0xff]  ;;  %v5011_v14 = vpack.c.bf16 %v1894_v40, %v1892_v38  ;;  %v1900_v62 = vld [vmem:[#allocation10 + $0x1c0] sm:$0xff]  ;;  %v4256_v38 = vld [vmem:[%s7632_s1 + $0x6f0] sm:$0xff] }
 0x18d   :  { %4990 = vmatprep.subr.bf16.mxu1 %v4989_v52  ;;  %v4226_v41 = vld [vmem:[%s7632_s1 + $0x600] sm:$0xff]  ;;  %v1898_v52 = vld [vmem:[#allocation10 + $0x1b0] sm:$0xff] }
 0x18e   :  { %1170 = vmatmul.mubr.f32.gmra.mrb[2].mxu0 %v6464_v28  ;;  %4992 = vmatpush1.bf16.msra.mxu1 %v4991_v7  ;;  %v4931_v50 = vpack.c.bf16 %v4228_v43, %v4226_v41  ;;  %v4235_v7 = vld [vmem:[%s7632_s1 + $0x648] sm:$0xff]  ;;  %v5015_v60 = vpack.c.bf16 %v1898_v52, %v1896_v51  ;;  %v1293_v41 = vld [vmem:[%s7631_s0 + $0x70] sm:$0xff] }
 0x18f   :  { %4904 = vmatpush1.bf16.msra.mxu0 %v4903_v63  ;;  %1175 = vmatprep.mubr.f32.mxu0 %v6020_v0  ;;  %v4993_v63 = vpack.c.bf16 %v1879_v55, %v1877_v54  ;;  %v4230_v54 = vld [vmem:[%s7632_s1 + $0x620] sm:$0xff]  ;;  %v4232_v55 = vld [vmem:[%s7632_s1 + $0x630] sm:$0xff]  ;;  %v4937_v1 = vpack.c.bf16 %v4237_v57, %v4235_v7 }
 0x190   :  { %4906 = vmatprep.subr.bf16.mxu0 %v4905_v3  ;;  %v1883_v3 = vld [vmem:[#allocation10 + $0x138] sm:$0xff]  ;;  %v4935_v61 = vpack.c.bf16 %v4232_v55, %v4230_v54  ;;  %v5748_v43 = vld [vmem:[%s7631_s0 + $0x30] sm:$0xff] }
 0x191   :  { %4994 = vmatprep.subr.bf16.mxu1 %v4993_v63  ;;  %v4997_v11 = vpack.c.bf16 %v1883_v3, %v1881_v2  ;;  %v1902_v63 = vld [vmem:[#allocation10 + $0x1d0] sm:$0xff]  ;;  %v4234_v2 = vld [vmem:[%s7632_s1 + $0x640] sm:$0xff]  ;;  %v2035_v51 = vld [vmem:[#allocation10 + $0x208] sm:$0xff] }
 0x192   :  { %1176 = vmatmul.mubr.f32.gmra.mrb[4].mxu0 %v6483_v35  ;;  %4996 = vmatpush1.bf16.msra.mxu1 %v4995_v4  ;;  %v4236_v3 = vld [vmem:[%s7632_s1 + $0x650] sm:$0xff]  ;;  %v4239_v4 = vld [vmem:[%s7632_s1 + $0x668] sm:$0xff]  ;;  %v1760_v7 = vld [vmem:[#allocation8] sm:$0x3] }
 0x193   :  { %1181 = vmatprep.mubr.f32.mxu0 %v6020_v0  ;;  %4908 = vmatpush1.bf16.msra.mxu0 %v4907_v12  ;;  %v4229_v12 = vld [vmem:[%s7632_s1 + $0x618] sm:$0xff] }
 0x194   :  { %4910 = vmatprep.subr.bf16.mxu0 %v4909_v16  ;;  %v4999_v16 = vpack.c.bf16 %v1882_v6, %v1880_v21  ;;  %4998 = vmatprep.subr.bf16.mxu1 %v4997_v11  ;;  %v5019_v21 = vpack.c.bf16 %v1902_v63, %v1900_v62  ;;  %v4939_v6 = vpack.c.bf16 %v4236_v3, %v4234_v2  ;;  %v2034_v62 = vld [vmem:[#allocation10 + $0x200] sm:$0xff]  ;;  %v2036_v63 = vld [vmem:[#allocation10 + $0x210] sm:$0xff]  ;;  %v2039_v2 = vld [vmem:[#allocation10 + $0x228] sm:$0xff] }
 0x195   :  { %v4943_v11 = vpack.c.bf16 %v4240_v10, %v4238_v9  ;;  %v2041_v3 = vld [vmem:[#allocation10 + $0x238] sm:$0xff]  ;;  %v2038_v10 = vld [vmem:[#allocation10 + $0x220] sm:$0xff] }
 0x196   :  { %1182 = vmatmul.mubr.f32.gmra.mrb[6].mxu0 %v6502_v42  ;;  %5000 = vmatpush1.bf16.msra.mxu1 %v4999_v16  ;;  %v4247_v16 = vld [vmem:[%s7632_s1 + $0x6a8] sm:$0xff]  ;;  %v5029_v9 = vpack.c.bf16 %v2041_v3, %v2039_v2 }
 0x197   :  { %1187 = vmatprep.mubr.f32.mxu0 %v6020_v0  ;;  %4912 = vmatpush1.bf16.msra.mxu0 %v4911_v26  ;;  %v5005_v26 = vpack.c.bf16 %v1891_v24, %v1889_v23  ;;  %v5747_v23 = vld [vmem:[%s7631_s0 + $0x48] sm:$0xff] }
 0x198   :  { %4914 = vmatprep.subr.bf16.mxu0 %v4913_v31  ;;  %5002 = vmatprep.subr.bf16.mxu1 %v5001_v22  ;;  %v1893_v31 = vld [vmem:[#allocation10 + $0x188] sm:$0xff] }
 0x199   :  { %v5009_v36 = vpack.c.bf16 %v1895_v32, %v1893_v31  ;;  %v4251_v22 = vld [vmem:[%s7632_s1 + $0x6c8] sm:$0xff]  ;;  %v4257_v31 = vld [vmem:[%s7632_s1 + $0x6f8] sm:$0xff] }
 0x19a   :  { %1188 = vmatmul.mubr.f32.gmra.mrb[8].mxu0 %v6509_v45  ;;  %5004 = vmatpush1.bf16.msra.mxu1 %v5003_v25  ;;  %v2059_v3 = vld [vmem:[#allocation10 + $0x2c8] sm:$0xff] }
 0x19b   :  { %1193 = vmatprep.mubr.f32.mxu0 %v6020_v0  ;;  %4916 = vmatpush1.bf16.msra.mxu0 %v4915_v44  ;;  %v4231_v44 = vld [vmem:[%s7632_s1 + $0x628] sm:$0xff] }
 0x19c   :  { %4918 = vmatprep.subr.bf16.mxu0 %v4917_v49  ;;  %5006 = vmatprep.subr.bf16.mxu1 %v5005_v26  ;;  %v1899_v49 = vld [vmem:[#allocation10 + $0x1b8] sm:$0xff]  ;;  %v4933_v53 = vpack.c.bf16 %v4233_v47, %v4231_v44 }
 0x19d   :  { %v4250_v26 = vld [vmem:[%s7632_s1 + $0x6c0] sm:$0xff]  ;;  %v5749_v44 = vld [vmem:[%s7631_s0 + $0x38] sm:$0xff] }
 0x19e   :  { %1194 = vmatmul.mubr.f32.gmra.mrb[10].mxu0 %v6516_v46  ;;  %v4227_v46 = vld [vmem:[%s7632_s1 + $0x608] sm:$0xff]  ;;  %5008 = vmatpush1.bf16.msra.mxu1 %v5007_v33  ;;  %v4955_v32 = vpack.c.bf16 %v4252_v27, %v4250_v26  ;;  %v4957_v33 = vpack.c.bf16 %v4257_v31, %v4255_v30  ;;  %v5750_v47 = vld [vmem:[%s7631_s0 + $0x40] sm:$0xff] }
 0x19f   :  { %1199 = vmatprep.mubr.f32.mxu0 %v6020_v0  ;;  %4920 = vmatpush1.bf16.msra.mxu0 %v4919_v56  ;;  %v4929_v20 = vpack.c.bf16 %v4229_v12, %v4227_v46  ;;  %v5013_v56 = vpack.c.bf16 %v1899_v49, %v1897_v48  ;;  %v4245_v46 = vld [vmem:[%s7632_s1 + $0x698] sm:$0xff]  ;;  %v1905_v48 = vld [vmem:[#allocation10 + $0x1e8] sm:$0xff] }
 0x1a0   :  { %4922 = vmatprep.subr.bf16.mxu0 %v4921_v59  ;;  %5010 = vmatprep.subr.bf16.mxu1 %v5009_v36  ;;  %v1903_v59 = vld [vmem:[#allocation10 + $0x1d8] sm:$0xff] }
 0x1a1   :  { %v4254_v36 = vld [vmem:[%s7632_s1 + $0x6e0] sm:$0xff] }
 0x1a2   :  { %1200 = vmatmul.mubr.f32.gmra.mrb[12].mxu0 %v6637_v37  ;;  %5012 = vmatpush1.bf16.msra.mxu1 %v5011_v14  ;;  %v4959_v40 = vpack.c.bf16 %v4256_v38, %v4254_v36  ;;  %v1904_v14 = vld [vmem:[#allocation10 + $0x1e0] sm:$0xff]  ;;  %v2048_v38 = vld [vmem:[#allocation10 + $0x270] sm:$0xff] }
 0x1a3   :  { %1205 = vmatprep.mubr.f32.mxu0 %v6020_v0  ;;  %4924 = vmatpush1.bf16.msra.mxu0 %v4923_v5  ;;  %v4241_v5 = vld [vmem:[%s7632_s1 + $0x678] sm:$0xff]  ;;  %v2046_v36 = vld [vmem:[#allocation10 + $0x260] sm:$0xff] }
 0x1a4   :  { %4926 = vmatprep.subr.bf16.mxu0 %v4925_v8  ;;  %5014 = vmatprep.subr.bf16.mxu1 %v5013_v56  ;;  %v4941_v8 = vpack.c.bf16 %v4241_v5, %v4239_v4  ;;  %v5027_v5 = vpack.c.bf16 %v2036_v63, %v2034_v62  ;;  %v2054_v63 = vld [vmem:[#allocation10 + $0x2a0] sm:$0xff] }
 0x1a6   :  { %1206 = vmatmul.mubr.f32.gmra.mrb[14].mxu0 %v6758_v29  ;;  %5016 = vmatpush1.bf16.msra.mxu1 %v5015_v60 }
 0x1a7   :  { %1211 = vmatprep.mubr.f32.mxu0 %v6020_v0  ;;  %4928 = vmatpush1.bf16.msra.mxu0 %v4927_v17  ;;  %v4947_v17 = vpack.c.bf16 %v4244_v15, %v4242_v13 }
 0x1a8   :  { %4930 = vmatprep.subr.bf16.mxu0 %v4929_v20  ;;  %v4248_v20 = vld [vmem:[%s7632_s1 + $0x6b0] sm:$0xff] }
 0x1a9   :  { %v4951_v24 = vpack.c.bf16 %v4248_v20, %v4246_v19  ;;  %v2042_v20 = vld [vmem:[#allocation10 + $0x240] sm:$0xff] }
 0x1aa   :  { %1212 = vmatmul.mubr.f32.gmra.mrb[16].mxu0 %v6879_v39 }
 0x1ab   :  { %1217 = vmatprep.mubr.f32.mxu0 %v6020_v0 }
 0x1ae   :  { %1218 = vmatmul.mubr.f32.gmra.mrb[18].mxu0 %v7000_v34 }
 0x1af   :  { %1391 = vmatprep.mubr.f32.mxu0 %v6020_v0 }
 0x1b2   :  { %1392 = vmatmul.mubr.f32.vlgmr.msra.gmra.mrb[0].mxu0 %v6464_v28  ;;  %v5017_v28 = vpack.c.bf16 %v1903_v59, %v1901_v58 }
 0x1b3   :  { %4932 = vmatpush1.bf16.msra.mxu0 %v4931_v50  ;;  %1397 = vmatprep.mubr.f32.mxu0 %v6020_v0  ;;  %v1906_v50 = vld [vmem:[#allocation10 + $0x1f0] sm:$0xff] }
 0x1b4   :  { %4934 = vmatprep.subr.bf16.mxu0 %v4933_v53  ;;  %5018 = vmatprep.subr.bf16.mxu1 %v5017_v28  ;;  %v1762_v53 = vlaneseq }
 0x1b5   :  { %5020 = vmatpush1.bf16.msra.mxu1 %v5019_v21 }
 0x1b6   :  { %1398 = vmatmul.mubr.f32.gmra.mrb[2].mxu0 %v6483_v35  ;;  %v4243_v35 = vld [vmem:[%s7632_s1 + $0x688] sm:$0xff]  ;;  %v1763_v54 = vshrl.u32 %v1762_v53, 7 }
 0x1b7   :  { %4936 = vmatpush1.bf16.msra.mxu0 %v4935_v61  ;;  %1403 = vmatprep.mubr.f32.mxu0 %v6020_v0  ;;  %v4945_v12 = vpack.c.bf16 %v4245_v46, %v4243_v35  ;;  %v2040_v35 = vld [vmem:[#allocation10 + $0x230] sm:$0xff] }
 0x1b8   :  { %4938 = vmatprep.subr.bf16.mxu0 %v4937_v1  ;;  %v7143_v55 = vsub.s32 0, %v1763_v54  ;;  %v7145_v56 = vsub.s32 1, %v1763_v54 }
 0x1ba   :  { %1404 = vmatmul.mubr.f32.gmra.mrb[4].mxu0 %v6502_v42  ;;  %v4249_v42 = vld [vmem:[%s7632_s1 + $0x6b8] sm:$0xff]  ;;  %v7148_v57 = vrot.slane %v1760_v7, %v7143_v55  ;;  %v7151_v58 = vrot.slane %v1760_v7, %v7145_v56 }
 0x1bb   :  { %1409 = vmatprep.mubr.f32.mxu0 %v6020_v0  ;;  %4940 = vmatpush1.bf16.msra.mxu0 %v4939_v6  ;;  %v4949_v18 = vpack.c.bf16 %v4249_v42, %v4247_v16  ;;  %v5031_v16 = vpack.c.bf16 %v2040_v35, %v2038_v10 }
 0x1bc   :  { %4942 = vmatprep.subr.bf16.mxu0 %v4941_v8 }
 0x1be   :  { %1410 = vmatmul.mubr.f32.gmra.mrb[6].mxu0 %v6509_v45  ;;  %v4253_v45 = vld [vmem:[%s7632_s1 + $0x6d8] sm:$0xff] }
 0x1bf   :  { %1415 = vmatprep.mubr.f32.mxu0 %v6020_v0  ;;  %4944 = vmatpush1.bf16.msra.mxu0 %v4943_v11  ;;  %v4953_v25 = vpack.c.bf16 %v4253_v45, %v4251_v22  ;;  %v2043_v11 = vld [vmem:[#allocation10 + $0x248] sm:$0xff]  ;;  %v2044_v22 = vld [vmem:[#allocation10 + $0x250] sm:$0xff] }
 0x1c0   :  { %4946 = vmatprep.subr.bf16.mxu0 %v4945_v12  ;;  %v2045_v12 = vld [vmem:[#allocation10 + $0x258] sm:$0xff]  ;;  %v5035_v27 = vpack.c.bf16 %v2044_v22, %v2042_v20 }
 0x1c1   :  { %v5033_v19 = vpack.c.bf16 %v2045_v12, %v2043_v11  ;;  %v2058_v11 = vld [vmem:[#allocation10 + $0x2c0] sm:$0xff]  ;;  %v2060_v12 = vld [vmem:[#allocation10 + $0x2d0] sm:$0xff] }
 0x1c2   :  { %1416 = vmatmul.mubr.f32.gmra.mrb[8].mxu0 %v5747_v23 }
 0x1c3   :  { %1421 = vmatprep.mubr.f32.mxu0 %v6020_v0  ;;  %4948 = vmatpush1.bf16.msra.mxu0 %v4947_v17 }
 0x1c4   :  { %4950 = vmatprep.subr.bf16.mxu0 %v4949_v18 }
 0x1c6   :  { %1422 = vmatmul.mubr.f32.gmra.mrb[10].mxu0 %v6637_v37 }
 0x1c7   :  { %1427 = vmatprep.mubr.f32.mxu0 %v6020_v0  ;;  %4952 = vmatpush1.bf16.msra.mxu0 %v4951_v24  ;;  %v2049_v24 = vld [vmem:[#allocation10 + $0x278] sm:$0xff] }
 0x1c8   :  { %4954 = vmatprep.subr.bf16.mxu0 %v4953_v25 }
 0x1ca   :  { %1428 = vmatmul.mubr.f32.gmra.mrb[12].mxu0 %v6758_v29 }
 0x1cb   :  { %1433 = vmatprep.mubr.f32.mxu0 %v6020_v0  ;;  %4956 = vmatpush1.bf16.msra.mxu0 %v4955_v32 }
 0x1cc   :  { %4958 = vmatprep.subr.bf16.mxu0 %v4957_v33 }
 0x1ce   :  { %1434 = vmatmul.mubr.f32.gmra.mrb[14].mxu0 %v6879_v39 }
 0x1cf   :  { %1439 = vmatprep.mubr.f32.mxu0 %v6020_v0  ;;  %4960 = vmatpush1.bf16.msra.mxu0 %v4959_v40 }
 0x1d2   :  { %1440 = vmatmul.mubr.f32.gmra.mrb[16].mxu0 %v7000_v34 }
 0x1d3   :  { %1445 = vmatprep.mubr.f32.mxu0 %v6020_v0 }
 0x1d6   :  { %1446 = vmatmul.mubr.f32.gmra.mrb[18].mxu0 %v1293_v41 }
 0x1d7   :  { %1619 = vmatprep.mubr.f32.mxu0 %v6020_v0 }
 0x1da   :  { %1620 = vmatmul.mubr.f32.vlgmr.msra.gmra.mrb[0].mxu0 %v5748_v43  ;;  %v2053_v43 = vld [vmem:[#allocation10 + $0x298] sm:$0xff] }
 0x1db   :  { %1625 = vmatprep.mubr.f32.mxu0 %v6020_v0 }
 0x1de   :  { %1626 = vmatmul.mubr.f32.gmra.mrb[2].mxu0 %v5749_v44 }
 0x1df   :  { %1631 = vmatprep.mubr.f32.mxu0 %v6020_v0 }
 0x1e2   :  { %1632 = vmatmul.mubr.f32.gmra.mrb[4].mxu0 %v5750_v47 }
 0x1e3   :  { %1637 = vmatprep.mubr.f32.mxu0 %v6020_v0 }
 0x1e6   :  { %1638 = vmatmul.mubr.f32.gmra.mrb[6].mxu0 %v5747_v23  ;;  %v2047_v23 = vld [vmem:[#allocation10 + $0x268] sm:$0xff] }
 0x1e7   :  { %1643 = vmatprep.mubr.f32.mxu0 %v6020_v0  ;;  %v5037_v33 = vpack.c.bf16 %v2049_v24, %v2047_v23  ;;  %v2062_v23 = vld [vmem:[#allocation10 + $0x2e0] sm:$0xff]  ;;  %v2064_v24 = vld [vmem:[#allocation10 + $0x2f0] sm:$0xff] }
 0x1ea   :  { %1644 = vmatmul.mubr.f32.gmra.mrb[8].mxu0 %v6637_v37  ;;  %v1521_v37 = vld [vmem:[%s7631_s0 + $0x78] sm:$0xff] }
 0x1eb   :  { %1649 = vmatprep.mubr.f32.mxu0 %v6020_v0 }
 0x1ee   :  { %1650 = vmatmul.mubr.f32.gmra.mrb[10].mxu0 %v6758_v29  ;;  %v1907_v29 = vld [vmem:[#allocation10 + $0x1f8] sm:$0xff] }
 0x1ef   :  { %1655 = vmatprep.mubr.f32.mxu0 %v6020_v0  ;;  %v5021_v49 = vpack.c.bf16 %v1907_v29, %v1905_v48 }
 0x1f1   :  { %5022 = vmatprep.subr.bf16.mxu1 %v5021_v49 }
 0x1f2   :  { %1656 = vmatmul.mubr.f32.gmra.mrb[12].mxu0 %v6879_v39  ;;  %v5023_v39 = vpack.c.bf16 %v1906_v50, %v1904_v14  ;;  %v2050_v50 = vld [vmem:[#allocation10 + $0x280] sm:$0xff] }
 0x1f3   :  { %1661 = vmatprep.mubr.f32.mxu0 %v6020_v0 }
 0x1f4   :  { %5024 = vmatpush1.bf16.msra.mxu1 %v5023_v39  ;;  %v2052_v39 = vld [vmem:[#allocation10 + $0x290] sm:$0xff] }
 0x1f5   :  { %v5043_v7 = vpack.c.bf16 %v2052_v39, %v2050_v50  ;;  %v2070_v39 = vld [vmem:[#allocation10 + $0x320] sm:$0xff] }
 0x1f6   :  { %1662 = vmatmul.mubr.f32.gmra.mrb[14].mxu0 %v7000_v34  ;;  %v2037_v34 = vld [vmem:[#allocation10 + $0x218] sm:$0xff] }
 0x1f7   :  { %1667 = vmatprep.mubr.f32.mxu0 %v6020_v0  ;;  %v5025_v52 = vpack.c.bf16 %v2037_v34, %v2035_v51  ;;  %v2055_v34 = vld [vmem:[#allocation10 + $0x2a8] sm:$0xff] }
 0x1f9   :  { %5026 = vmatprep.subr.bf16.mxu1 %v5025_v52  ;;  %v2057_v52 = vld [vmem:[#allocation10 + $0x2b8] sm:$0xff] }
 0x1fa   :  { %1668 = vmatmul.mubr.f32.gmra.mrb[16].mxu0 %v1293_v41  ;;  %v2051_v41 = vld [vmem:[#allocation10 + $0x288] sm:$0xff]  ;;  %v5045_v62 = vpack.c.bf16 %v2057_v52, %v2055_v34 }
 0x1fb   :  { %1673 = vmatprep.mubr.f32.mxu0 %v6020_v0  ;;  %v5041_v14 = vpack.c.bf16 %v2053_v43, %v2051_v41  ;;  %v2071_v43 = vld [vmem:[#allocation10 + $0x328] sm:$0xff] }
 0x1fc   :  { %v2075_v52 = vld [vmem:[#allocation10 + $0x348] sm:$0xff] }
 0x1fe   :  { %1674 = vmatmul.mubr.f32.gmra.mrb[18].mxu0 %v1521_v37  ;;  %v5039_v37 = vpack.c.bf16 %v2048_v38, %v2046_v36  ;;  %v2066_v38 = vld [vmem:[#allocation10 + $0x300] sm:$0xff] }
 0x2ad   :  { %v1621_v59 = vpop.f32.mrb[0].mxu0 }
 0x2ae   :  { %v1772_v60 = vadd.f32 %v7148_v57, %v1621_v59  ;;  %v1623_v61 = vpop.f32.mrb[1].mxu0 }
 0x2af   :  { %v1773_v1 = vadd.f32 %v7151_v58, %v1623_v61 }
 0x2b0   :  { %v1792_v21 = vmax.f32 %v1772_v60, 0.0 }
 0x2b1   :  { %v1627_v28 = vpop.f32.mrb[2].mxu0  ;;  %v1793_v4 = vmax.f32 %v1773_v1, 0.0  ;;  %v2056_v1 = vld [vmem:[#allocation10 + $0x2b0] sm:$0xff] }
 0x2b2   :  { %v7156_v6 = vadd.f32 %v7148_v57, %v1627_v28  ;;  %v1629_v8 = vpop.f32.mrb[3].mxu0  ;;  %v2061_v28 = vld [vmem:[#allocation10 + $0x2d8] sm:$0xff] }
 0x2b3   :  { %v7159_v46 = vadd.f32 %v7151_v58, %v1629_v8  ;;  %1972 = vmatprep.mubr.f32.mxu1 %v1793_v4  ;;  %v5049_v35 = vpack.c.bf16 %v2061_v28, %v2059_v3  ;;  %v2078_v3 = vld [vmem:[#allocation10 + $0x360] sm:$0xff]  ;;  %v2080_v28 = vld [vmem:[#allocation10 + $0x370] sm:$0xff] }
 0x2b4   :  { %1973 = vmatmul.mubr.f32.vlgmr.msra.gmra.mrb[0].mxu1 %v1792_v21  ;;  %v1794_v42 = vmax.f32 %v7156_v6, 0.0  ;;  %v5047_v21 = vpack.c.bf16 %v2056_v1, %v2054_v63  ;;  %v2079_v63 = vld [vmem:[#allocation10 + $0x368] sm:$0xff]  ;;  %v2081_v1 = vld [vmem:[#allocation10 + $0x378] sm:$0xff]  ;;  %v2260_v6 = vld [vmem:[#allocation10 + $0x460] sm:$0xff] }
 0x2b5   :  { %v1795_v13 = vmax.f32 %v7159_v46, 0.0  ;;  %5028 = vmatpush1.bf16.msra.mxu1 %v5027_v5  ;;  %v1633_v15 = vpop.f32.mrb[4].mxu0 }
 0x2b6   :  { %v1776_v17 = vadd.f32 %v7148_v57, %v1633_v15  ;;  %v1635_v18 = vpop.f32.mrb[5].mxu0  ;;  %5030 = vmatprep.subr.bf16.mxu1 %v5029_v9 }
 0x2b7   :  { %v1777_v45 = vadd.f32 %v7151_v58, %v1635_v18  ;;  %1978 = vmatprep.mubr.f32.mxu1 %v1795_v13 }
 0x2b8   :  { %1979 = vmatmul.mubr.f32.gmra.mrb[2].mxu1 %v1794_v42  ;;  %v7171_v30 = vmax.f32 %v1776_v17, 0.0  ;;  %v2065_v17 = vld [vmem:[#allocation10 + $0x2f8] sm:$0xff] }
 0x2b9   :  { %v7169_v25 = vmax.f32 %v1777_v45, 0.0  ;;  %5032 = vmatpush1.bf16.msra.mxu1 %v5031_v16  ;;  %v1639_v26 = vpop.f32.mrb[6].mxu0  ;;  %v2063_v16 = vld [vmem:[#allocation10 + $0x2e8] sm:$0xff] }
 0x2ba   :  { %v1778_v31 = vadd.f32 %v7148_v57, %v1639_v26  ;;  %v1641_v32 = vpop.f32.mrb[7].mxu0  ;;  %5034 = vmatprep.subr.bf16.mxu1 %v5033_v19  ;;  %v5051_v19 = vpack.c.bf16 %v2060_v12, %v2058_v11  ;;  %v5053_v45 = vpack.c.bf16 %v2065_v17, %v2063_v16  ;;  %v2084_v11 = vld [vmem:[#allocation10 + $0x390] sm:$0xff]  ;;  %v2087_v12 = vld [vmem:[#allocation10 + $0x3a8] sm:$0xff]  ;;  %v2089_v16 = vld [vmem:[#allocation10 + $0x3b8] sm:$0xff] }
 0x2bb   :  { %v1779_v40 = vadd.f32 %v7151_v58, %v1641_v32  ;;  %1984 = vmatprep.mubr.f32.mxu1 %v7169_v25 }
 0x2bc   :  { %1985 = vmatmul.mubr.f32.gmra.mrb[4].mxu1 %v7171_v30  ;;  %v7179_v48 = vmax.f32 %v1778_v31, 0.0  ;;  %v2069_v31 = vld [vmem:[#allocation10 + $0x318] sm:$0xff] }
 0x2bd   :  { %v7177_v44 = vmax.f32 %v1779_v40, 0.0  ;;  %5036 = vmatpush1.bf16.msra.mxu1 %v5035_v27  ;;  %v1645_v47 = vpop.f32.mrb[8].mxu0  ;;  %v2067_v27 = vld [vmem:[#allocation10 + $0x308] sm:$0xff]  ;;  %v2068_v40 = vld [vmem:[#allocation10 + $0x310] sm:$0xff] }
 0x2be   :  { %v1780_v29 = vadd.f32 %v7148_v57, %v1645_v47  ;;  %v1647_v49 = vpop.f32.mrb[9].mxu0  ;;  %5038 = vmatprep.subr.bf16.mxu1 %v5037_v33  ;;  %v5055_v33 = vpack.c.bf16 %v2064_v24, %v2062_v23  ;;  %v5057_v36 = vpack.c.bf16 %v2069_v31, %v2067_v27  ;;  %v2073_v47 = vld [vmem:[#allocation10 + $0x338] sm:$0xff]  ;;  %v2090_v31 = vld [vmem:[#allocation10 + $0x3c0] sm:$0xff] }
 0x2bf   :  { %v1781_v51 = vadd.f32 %v7151_v58, %v1647_v49  ;;  %1990 = vmatprep.mubr.f32.mxu1 %v7177_v44  ;;  %v5061_v50 = vpack.c.bf16 %v2073_v47, %v2071_v43  ;;  %v2093_v23 = vld [vmem:[#allocation10 + $0x3d8] sm:$0xff]  ;;  %v2096_v43 = vld [vmem:[#allocation10 + $0x3f0] sm:$0xff]  ;;  %v2249_v47 = vld [vmem:[#allocation10 + $0x408] sm:$0xff] }
 0x2c0   :  { %1991 = vmatmul.mubr.f32.gmra.mrb[6].mxu1 %v7179_v48  ;;  %v7187_v59 = vmax.f32 %v1780_v29, 0.0  ;;  %v5059_v29 = vpack.c.bf16 %v2068_v40, %v2066_v38  ;;  %v2094_v40 = vld [vmem:[#allocation10 + $0x3e0] sm:$0xff] }
 0x2c1   :  { %v7185_v53 = vmax.f32 %v1781_v51, 0.0  ;;  %5040 = vmatpush1.bf16.msra.mxu1 %v5039_v37  ;;  %v1651_v54 = vpop.f32.mrb[10].mxu0  ;;  %v2072_v51 = vld [vmem:[#allocation10 + $0x330] sm:$0xff] }
 0x2c2   :  { %v1782_v60 = vadd.f32 %v7148_v57, %v1651_v54  ;;  %v1653_v61 = vpop.f32.mrb[11].mxu0  ;;  %5042 = vmatprep.subr.bf16.mxu1 %v5041_v14  ;;  %v2077_v54 = vld [vmem:[#allocation10 + $0x358] sm:$0xff] }
 0x2c3   :  { %v1783_v2 = vadd.f32 %v7151_v58, %v1653_v61  ;;  %1996 = vmatprep.mubr.f32.mxu1 %v7185_v53  ;;  %v2074_v61 = vld [vmem:[#allocation10 + $0x340] sm:$0xff] }
 0x2c4   :  { %1997 = vmatmul.mubr.f32.gmra.mrb[8].mxu1 %v7187_v59  ;;  %v7195_v8 = vmax.f32 %v1782_v60, 0.0  ;;  %v5065_v60 = vpack.c.bf16 %v2077_v54, %v2075_v52  ;;  %v2255_v52 = vld [vmem:[#allocation10 + $0x438] sm:$0xff] }
 0x2c5   :  { %v7193_v4 = vmax.f32 %v1783_v2, 0.0  ;;  %5044 = vmatpush1.bf16.msra.mxu1 %v5043_v7  ;;  %v1657_v5 = vpop.f32.mrb[12].mxu0  ;;  %v5063_v7 = vpack.c.bf16 %v2072_v51, %v2070_v39  ;;  %v5069_v2 = vpack.c.bf16 %v2081_v1, %v2079_v63  ;;  %v2250_v39 = vld [vmem:[#allocation10 + $0x410] sm:$0xff]  ;;  %v2253_v51 = vld [vmem:[#allocation10 + $0x428] sm:$0xff]  ;;  %v2259_v63 = vld [vmem:[#allocation10 + $0x458] sm:$0xff] }
 0x2c6   :  { %v7198_v9 = vadd.f32 %v7148_v57, %v1657_v5  ;;  %v1659_v10 = vpop.f32.mrb[13].mxu0  ;;  %5046 = vmatprep.subr.bf16.mxu1 %v5045_v62  ;;  %v2076_v62 = vld [vmem:[#allocation10 + $0x350] sm:$0xff]  ;;  %v2083_v5 = vld [vmem:[#allocation10 + $0x388] sm:$0xff] }
 0x2c7   :  { %v7201_v15 = vadd.f32 %v7151_v58, %v1659_v10  ;;  %2002 = vmatprep.mubr.f32.mxu1 %v7193_v4 }
 0x2c8   :  { %2003 = vmatmul.mubr.f32.gmra.mrb[10].mxu1 %v7195_v8 }
 0x2c9   :  { %5048 = vmatpush1.bf16.msra.mxu1 %v5047_v21  ;;  %v1663_v18 = vpop.f32.mrb[14].mxu0  ;;  %2162 = vmatprep.mubr.f32.mxu1 %v1795_v13  ;;  %v2085_v21 = vld [vmem:[#allocation10 + $0x398] sm:$0xff] }
 0x2ca   :  { %v7208_v20 = vadd.f32 %v7148_v57, %v1663_v18  ;;  %v1665_v22 = vpop.f32.mrb[15].mxu0  ;;  %5050 = vmatprep.subr.bf16.mxu1 %v5049_v35  ;;  %v5073_v10 = vpack.c.bf16 %v2085_v21, %v2083_v5  ;;  %v2082_v35 = vld [vmem:[#allocation10 + $0x380] sm:$0xff]  ;;  %v5077_v18 = vpack.c.bf16 %v2089_v16, %v2087_v12  ;;  %v2263_v5 = vld [vmem:[#allocation10 + $0x478] sm:$0xff] }
 0x2cb   :  { %v7211_v26 = vadd.f32 %v7151_v58, %v1665_v22  ;;  %v5075_v17 = vpack.c.bf16 %v2084_v11, %v2082_v35  ;;  %v2088_v22 = vld [vmem:[#allocation10 + $0x3b0] sm:$0xff]  ;;  %v2267_v35 = vld [vmem:[#allocation10 + $0x498] sm:$0xff]  ;;  %v2264_v16 = vld [vmem:[#allocation10 + $0x480] sm:$0xff] }
 0x2cd   :  { %5052 = vmatpush1.bf16.msra.mxu1 %v5051_v19  ;;  %v1669_v32 = vpop.f32.mrb[16].mxu0  ;;  %v2086_v19 = vld [vmem:[#allocation10 + $0x3a0] sm:$0xff] }
 0x2ce   :  { %v7214_v46 = vadd.f32 %v7148_v57, %v1669_v32  ;;  %v1671_v13 = vpop.f32.mrb[17].mxu0  ;;  %5054 = vmatprep.subr.bf16.mxu1 %v5053_v45  ;;  %v2091_v45 = vld [vmem:[#allocation10 + $0x3c8] sm:$0xff]  ;;  %v5079_v24 = vpack.c.bf16 %v2088_v22, %v2086_v19  ;;  %v2092_v32 = vld [vmem:[#allocation10 + $0x3d0] sm:$0xff]  ;;  %v2271_v19 = vld [vmem:[#allocation10 + $0x4b8] sm:$0xff] }
 0x2cf   :  { %v7217_v41 = vadd.f32 %v7151_v58, %v1671_v13  ;;  %v5081_v27 = vpack.c.bf16 %v2093_v23, %v2091_v45  ;;  %v2097_v13 = vld [vmem:[#allocation10 + $0x3f8] sm:$0xff]  ;;  %v2268_v23 = vld [vmem:[#allocation10 + $0x4a0] sm:$0xff] }
 0x2d1   :  { %5056 = vmatpush1.bf16.msra.mxu1 %v5055_v33  ;;  %v1675_v37 = vpop.f32.mrb[18].mxu0  ;;  %v2095_v33 = vld [vmem:[#allocation10 + $0x3e8] sm:$0xff] }
 0x2d2   :  { %v7220_v49 = vadd.f32 %v7148_v57, %v1675_v37  ;;  %v1677_v14 = vpop.f32.mrb[19].mxu0  ;;  %5058 = vmatprep.subr.bf16.mxu1 %v5057_v36  ;;  %v5067_v57 = vpack.c.bf16 %v2076_v62, %v2074_v61  ;;  %v5083_v36 = vpack.c.bf16 %v2092_v32, %v2090_v31  ;;  %v5085_v38 = vpack.c.bf16 %v2097_v13, %v2095_v33  ;;  %v2251_v37 = vld [vmem:[#allocation10 + $0x418] sm:$0xff]  ;;  %v2254_v61 = vld [vmem:[#allocation10 + $0x430] sm:$0xff]  ;;  %v2257_v62 = vld [vmem:[#allocation10 + $0x448] sm:$0xff] }
 0x2d3   :  { %v7223_v34 = vadd.f32 %v7151_v58, %v1677_v14  ;;  %v5071_v58 = vpack.c.bf16 %v2080_v28, %v2078_v3  ;;  %v5089_v14 = vpack.c.bf16 %v2251_v37, %v2249_v47  ;;  %v2258_v3 = vld [vmem:[#allocation10 + $0x450] sm:$0xff]  ;;  %v2261_v28 = vld [vmem:[#allocation10 + $0x468] sm:$0xff]  ;;  %v2275_v32 = vld [vmem:[#allocation10 + $0x4d8] sm:$0xff]  ;;  %v7240_v13 = vmax.f32 %v7198_v9, 0.0 }
 0x2d4   :  { %v2273_v31 = vld [vmem:[#allocation10 + $0x4c8] sm:$0xff]  ;;  %v2279_v47 = vld [vmem:[#allocation10 + $0x4f8] sm:$0xff] }
 0x2d5   :  { %5060 = vmatpush1.bf16.msra.mxu1 %v5059_v29  ;;  %v5087_v29 = vpack.c.bf16 %v2096_v43, %v2094_v40  ;;  %v2274_v40 = vld [vmem:[#allocation10 + $0x4d0] sm:$0xff]  ;;  %v2277_v43 = vld [vmem:[#allocation10 + $0x4e8] sm:$0xff] }
 0x2d6   :  { %5062 = vmatprep.subr.bf16.mxu1 %v5061_v50  ;;  %v2248_v50 = vld [vmem:[#allocation10 + $0x400] sm:$0xff]  ;;  %v5117_v37 = vpack.c.bf16 %v2279_v47, %v2277_v43  ;;  %v2306_v47 = vld [vmem:[#allocation10 + $0x5d0] sm:$0xff] }
 0x2d7   :  { %v5091_v54 = vpack.c.bf16 %v2250_v39, %v2248_v50  ;;  %v2281_v50 = vld [vmem:[#allocation10 + $0x508] sm:$0xff]  ;;  %v2283_v39 = vld [vmem:[#allocation10 + $0x518] sm:$0xff]  ;;  %v2304_v43 = vld [vmem:[#allocation10 + $0x5c0] sm:$0xff] }
 0x2d9   :  { %5064 = vmatpush1.bf16.msra.mxu1 %v5063_v7  ;;  %v5093_v7 = vpack.c.bf16 %v2255_v52, %v2253_v51  ;;  %v5121_v51 = vpack.c.bf16 %v2283_v39, %v2281_v50  ;;  %v2280_v52 = vld [vmem:[#allocation10 + $0x500] sm:$0xff]  ;;  %v2310_v39 = vld [vmem:[#allocation10 + $0x5f0] sm:$0xff] }
 0x2da   :  { %5066 = vmatprep.subr.bf16.mxu1 %v5065_v60  ;;  %v2252_v60 = vld [vmem:[#allocation10 + $0x420] sm:$0xff] }
 0x2db   :  { %v5095_v1 = vpack.c.bf16 %v2254_v61, %v2252_v60  ;;  %v2287_v60 = vld [vmem:[#allocation10 + $0x538] sm:$0xff]  ;;  %v2308_v50 = vld [vmem:[#allocation10 + $0x5e0] sm:$0xff] }
 0x2dd   :  { %5068 = vmatpush1.bf16.msra.mxu1 %v5067_v57  ;;  %v5097_v57 = vpack.c.bf16 %v2259_v63, %v2257_v62  ;;  %v2286_v63 = vld [vmem:[#allocation10 + $0x530] sm:$0xff] }
 0x2de   :  { %5070 = vmatprep.subr.bf16.mxu1 %v5069_v2  ;;  %v2256_v2 = vld [vmem:[#allocation10 + $0x440] sm:$0xff] }
 0x2df   :  { %v5099_v21 = vpack.c.bf16 %v2258_v3, %v2256_v2 }
 0x2e1   :  { %5072 = vmatpush1.bf16.msra.mxu1 %v5071_v58  ;;  %v5101_v58 = vpack.c.bf16 %v2263_v5, %v2261_v28  ;;  %v2288_v28 = vld [vmem:[#allocation10 + $0x540] sm:$0xff]  ;;  %v2290_v5 = vld [vmem:[#allocation10 + $0x550] sm:$0xff] }
 0x2e2   :  { %5074 = vmatprep.subr.bf16.mxu1 %v5073_v10  ;;  %v2265_v10 = vld [vmem:[#allocation10 + $0x488] sm:$0xff] }
 0x2e3   :  { %v5105_v12 = vpack.c.bf16 %v2267_v35, %v2265_v10  ;;  %v2292_v10 = vld [vmem:[#allocation10 + $0x560] sm:$0xff]  ;;  %v2294_v35 = vld [vmem:[#allocation10 + $0x570] sm:$0xff] }
 0x2e5   :  { %5076 = vmatpush1.bf16.msra.mxu1 %v5075_v17  ;;  %v2266_v17 = vld [vmem:[#allocation10 + $0x490] sm:$0xff] }
 0x2e6   :  { %5078 = vmatprep.subr.bf16.mxu1 %v5077_v18  ;;  %v2269_v18 = vld [vmem:[#allocation10 + $0x4a8] sm:$0xff]  ;;  %v5107_v22 = vpack.c.bf16 %v2266_v17, %v2264_v16  ;;  %v5135_v16 = vpack.c.bf16 %v2294_v35, %v2292_v10 }
 0x2e7   :  { %v5109_v45 = vpack.c.bf16 %v2271_v19, %v2269_v18  ;;  %v2296_v18 = vld [vmem:[#allocation10 + $0x580] sm:$0xff]  ;;  %v2298_v19 = vld [vmem:[#allocation10 + $0x590] sm:$0xff] }
 0x2e9   :  { %5080 = vmatpush1.bf16.msra.mxu1 %v5079_v24  ;;  %v2270_v24 = vld [vmem:[#allocation10 + $0x4b0] sm:$0xff] }
 0x2ea   :  { %5082 = vmatprep.subr.bf16.mxu1 %v5081_v27  ;;  %v7235_v27 = vmax.f32 %v7201_v15, 0.0  ;;  %v5111_v33 = vpack.c.bf16 %v2270_v24, %v2268_v23  ;;  %v5139_v23 = vpack.c.bf16 %v2298_v19, %v2296_v18  ;;  %v2478_v19 = vld [vmem:[#allocation10 + $0x680] sm:$0xff] }
 0x2ed   :  { %5084 = vmatpush1.bf16.msra.mxu1 %v5083_v36  ;;  %v5113_v36 = vpack.c.bf16 %v2275_v32, %v2273_v31  ;;  %v2300_v31 = vld [vmem:[#allocation10 + $0x5a0] sm:$0xff]  ;;  %v2302_v32 = vld [vmem:[#allocation10 + $0x5b0] sm:$0xff] }
 0x2ee   :  { %5086 = vmatprep.subr.bf16.mxu1 %v5085_v38  ;;  %v2272_v38 = vld [vmem:[#allocation10 + $0x4c0] sm:$0xff] }
 0x2ef   :  { %v5115_v15 = vpack.c.bf16 %v2274_v40, %v2272_v38  ;;  %v5143_v38 = vpack.c.bf16 %v2302_v32, %v2300_v31  ;;  %v2482_v32 = vld [vmem:[#allocation10 + $0x6a0] sm:$0xff] }
 0x2f1   :  { %5088 = vmatpush1.bf16.msra.mxu1 %v5087_v29  ;;  %v2276_v29 = vld [vmem:[#allocation10 + $0x4e0] sm:$0xff] }
 0x2f2   :  { %5090 = vmatprep.subr.bf16.mxu1 %v5089_v14  ;;  %v2278_v14 = vld [vmem:[#allocation10 + $0x4f0] sm:$0xff] }
 0x2f3   :  { %v5119_v9 = vpack.c.bf16 %v2278_v14, %v2276_v29  ;;  %v5147_v29 = vpack.c.bf16 %v2306_v47, %v2304_v43  ;;  %v7258_v47 = vmax.f32 %v7208_v20, 0.0  ;;  %v2946_v20 = vld [vmem:[#allocation13 + $0x8] sm:$0xff] }
 0x2f4   :  { %2163 = vmatmul.mubr.f32.vlgmr.msra.gmra.mrb[0].mxu1 %v1794_v42  ;;  %v2262_v42 = vld [vmem:[#allocation10 + $0x470] sm:$0xff] }
 0x2f5   :  { %2168 = vmatprep.mubr.f32.mxu1 %v7169_v25  ;;  %5092 = vmatpush1.bf16.msra.mxu1 %v5091_v54  ;;  %v5103_v11 = vpack.c.bf16 %v2262_v42, %v2260_v6  ;;  %v2282_v54 = vld [vmem:[#allocation10 + $0x510] sm:$0xff]  ;;  %v5131_v6 = vpack.c.bf16 %v2290_v5, %v2288_v28 }
 0x2f6   :  { %5094 = vmatprep.subr.bf16.mxu1 %v5093_v7  ;;  %v2285_v7 = vld [vmem:[#allocation10 + $0x528] sm:$0xff]  ;;  %v5123_v61 = vpack.c.bf16 %v2282_v54, %v2280_v52  ;;  %v5151_v52 = vpack.c.bf16 %v2310_v39, %v2308_v50  ;;  %v2493_v50 = vld [vmem:[#allocation10 + $0x6f8] sm:$0xff]  ;;  %v2492_v39 = vld [vmem:[#allocation10 + $0x6f0] sm:$0xff] }
 0x2f7   :  { %v5125_v62 = vpack.c.bf16 %v2287_v60, %v2285_v7  ;;  %v2462_v7 = vld [vmem:[#allocation10 + $0x600] sm:$0xff]  ;;  %v2464_v60 = vld [vmem:[#allocation10 + $0x610] sm:$0xff] }
 0x2f8   :  { %2169 = vmatmul.mubr.f32.gmra.mrb[2].mxu1 %v7171_v30 }
 0x2f9   :  { %2174 = vmatprep.mubr.f32.mxu1 %v7177_v44  ;;  %5096 = vmatpush1.bf16.msra.mxu1 %v5095_v1  ;;  %v2289_v1 = vld [vmem:[#allocation10 + $0x548] sm:$0xff] }
 0x2fa   :  { %5098 = vmatprep.subr.bf16.mxu1 %v5097_v57  ;;  %v2291_v57 = vld [vmem:[#allocation10 + $0x558] sm:$0xff] }
 0x2fb   :  { %v5129_v3 = vpack.c.bf16 %v2291_v57, %v2289_v1  ;;  %v2466_v1 = vld [vmem:[#allocation10 + $0x620] sm:$0xff]  ;;  %v2468_v57 = vld [vmem:[#allocation10 + $0x630] sm:$0xff] }
 0x2fc   :  { %2175 = vmatmul.mubr.f32.gmra.mrb[4].mxu1 %v7179_v48  ;;  %v5159_v28 = vpack.c.bf16 %v2468_v57, %v2466_v1  ;;  %v2947_v1 = vld [vmem:[#allocation13 + $0x10] sm:$0xff]  ;;  %v2948_v57 = vld [vmem:[#allocation13 + $0x18] sm:$0xff] }
 0x2fd   :  { %2180 = vmatprep.mubr.f32.mxu1 %v7185_v53  ;;  %5100 = vmatpush1.bf16.msra.mxu1 %v5099_v21  ;;  %v2293_v21 = vld [vmem:[#allocation10 + $0x568] sm:$0xff] }
 0x2fe   :  { %5102 = vmatprep.subr.bf16.mxu1 %v5101_v58  ;;  %v2295_v58 = vld [vmem:[#allocation10 + $0x578] sm:$0xff] }
 0x2ff   :  { %v5133_v42 = vpack.c.bf16 %v2295_v58, %v2293_v21  ;;  %v2470_v21 = vld [vmem:[#allocation10 + $0x640] sm:$0xff]  ;;  %v2472_v58 = vld [vmem:[#allocation10 + $0x650] sm:$0xff] }
 0x300   :  { %2181 = vmatmul.mubr.f32.gmra.mrb[6].mxu1 %v7187_v59  ;;  %v5163_v10 = vpack.c.bf16 %v2472_v58, %v2470_v21  ;;  %v5287_v21 = vpack.c.bf16 %v2948_v57, %v2947_v1  ;;  %v2494_v58 = vld [vmem:[#allocation10 + $0x700] sm:$0xff]  ;;  %v2508_v57 = vld [vmem:[#allocation10 + $0x770] sm:$0xff] }
 0x301   :  { %2186 = vmatprep.mubr.f32.mxu1 %v7193_v4  ;;  %5104 = vmatpush1.bf16.msra.mxu1 %v5103_v11  ;;  %v2297_v11 = vld [vmem:[#allocation10 + $0x588] sm:$0xff] }
 0x302   :  { %5106 = vmatprep.subr.bf16.mxu1 %v5105_v12  ;;  %v2299_v12 = vld [vmem:[#allocation10 + $0x598] sm:$0xff] }
 0x303   :  { %v5137_v17 = vpack.c.bf16 %v2299_v12, %v2297_v11  ;;  %v2474_v11 = vld [vmem:[#allocation10 + $0x660] sm:$0xff]  ;;  %v2479_v12 = vld [vmem:[#allocation10 + $0x688] sm:$0xff] }
 0x304   :  { %2187 = vmatmul.mubr.f32.gmra.mrb[8].mxu1 %v7195_v8 }
 0x305   :  { %2192 = vmatprep.mubr.f32.mxu1 %v7235_v27  ;;  %5108 = vmatpush1.bf16.msra.mxu1 %v5107_v22  ;;  %v2301_v22 = vld [vmem:[#allocation10 + $0x5a8] sm:$0xff] }
 0x306   :  { %5110 = vmatprep.subr.bf16.mxu1 %v5109_v45  ;;  %v2303_v45 = vld [vmem:[#allocation10 + $0x5b8] sm:$0xff] }
 0x307   :  { %v5141_v24 = vpack.c.bf16 %v2303_v45, %v2301_v22  ;;  %v2480_v22 = vld [vmem:[#allocation10 + $0x690] sm:$0xff]  ;;  %v2483_v45 = vld [vmem:[#allocation10 + $0x6a8] sm:$0xff] }
 0x308   :  { %2193 = vmatmul.mubr.f32.gmra.mrb[10].mxu1 %v7240_v13 }
 0x309   :  { %5112 = vmatpush1.bf16.msra.mxu1 %v5111_v33  ;;  %2376 = vmatprep.mubr.f32.mxu1 %v7169_v25  ;;  %v2284_v25 = vld [vmem:[#allocation10 + $0x520] sm:$0xff]  ;;  %v2305_v33 = vld [vmem:[#allocation10 + $0x5c8] sm:$0xff] }
 0x30a   :  { %5114 = vmatprep.subr.bf16.mxu1 %v5113_v36  ;;  %v5127_v2 = vpack.c.bf16 %v2286_v63, %v2284_v25  ;;  %v2307_v36 = vld [vmem:[#allocation10 + $0x5d8] sm:$0xff]  ;;  %v5155_v25 = vpack.c.bf16 %v2464_v60, %v2462_v7 }
 0x30b   :  { %v5145_v40 = vpack.c.bf16 %v2307_v36, %v2305_v33  ;;  %v2484_v33 = vld [vmem:[#allocation10 + $0x6b0] sm:$0xff]  ;;  %v7253_v36 = vmax.f32 %v7211_v26, 0.0  ;;  %v2490_v26 = vld [vmem:[#allocation10 + $0x6e0] sm:$0xff] }
 0x30c   :  { %v5175_v43 = vpack.c.bf16 %v2484_v33, %v2482_v32  ;;  %v2963_v60 = vld [vmem:[#allocation13 + $0x90] sm:$0xff]  ;;  %v2969_v33 = vld [vmem:[#allocation13 + $0xc0] sm:$0xff] }
 0x30d   :  { %5116 = vmatpush1.bf16.msra.mxu1 %v5115_v15  ;;  %v2309_v15 = vld [vmem:[#allocation10 + $0x5e8] sm:$0xff]  ;;  %v2500_v32 = vld [vmem:[#allocation10 + $0x730] sm:$0xff] }
 0x30e   :  { %5118 = vmatprep.subr.bf16.mxu1 %v5117_v37  ;;  %v2311_v37 = vld [vmem:[#allocation10 + $0x5f8] sm:$0xff] }
 0x30f   :  { %v5149_v14 = vpack.c.bf16 %v2311_v37, %v2309_v15  ;;  %v2486_v37 = vld [vmem:[#allocation10 + $0x6c0] sm:$0xff] }
 0x311   :  { %5120 = vmatpush1.bf16.msra.mxu1 %v5119_v9  ;;  %v2463_v9 = vld [vmem:[#allocation10 + $0x608] sm:$0xff] }
 0x312   :  { %5122 = vmatprep.subr.bf16.mxu1 %v5121_v51  ;;  %v2465_v51 = vld [vmem:[#allocation10 + $0x618] sm:$0xff] }
 0x313   :  { %v5153_v54 = vpack.c.bf16 %v2465_v51, %v2463_v9  ;;  %v2961_v9 = vld [vmem:[#allocation13 + $0x80] sm:$0xff]  ;;  %v2962_v51 = vld [vmem:[#allocation13 + $0x88] sm:$0xff] }
 0x314   :  { %v5281_v7 = vpack.c.bf16 %v2962_v51, %v2961_v9  ;;  %v2504_v9 = vld [vmem:[#allocation10 + $0x750] sm:$0xff] }
 0x315   :  { %5124 = vmatpush1.bf16.msra.mxu1 %v5123_v61  ;;  %v2467_v61 = vld [vmem:[#allocation10 + $0x628] sm:$0xff]  ;;  %v2971_v51 = vld [vmem:[#allocation13 + $0xd0] sm:$0xff] }
 0x316   :  { %5126 = vmatprep.subr.bf16.mxu1 %v5125_v62  ;;  %v2469_v62 = vld [vmem:[#allocation10 + $0x638] sm:$0xff]  ;;  %5282 = vmatprep.subr.bf16.mxu0 %v5281_v7 }
 0x317   :  { %v5157_v63 = vpack.c.bf16 %v2469_v62, %v2467_v61  ;;  %v2964_v61 = vld [vmem:[#allocation13 + $0x98] sm:$0xff] }
 0x318   :  { %v2509_v7 = vld [vmem:[#allocation10 + $0x778] sm:$0xff] }
 0x319   :  { %5128 = vmatpush1.bf16.msra.mxu1 %v5127_v2  ;;  %v2471_v2 = vld [vmem:[#allocation10 + $0x648] sm:$0xff] }
 0x31a   :  { %5130 = vmatprep.subr.bf16.mxu1 %v5129_v3  ;;  %v2473_v3 = vld [vmem:[#allocation10 + $0x658] sm:$0xff] }
 0x31b   :  { %v5161_v5 = vpack.c.bf16 %v2473_v3, %v2471_v2  ;;  %v2965_v2 = vld [vmem:[#allocation13 + $0xa0] sm:$0xff] }
 0x31c   :  { %v2495_v3 = vld [vmem:[#allocation10 + $0x708] sm:$0xff] }
 0x31d   :  { %5132 = vmatpush1.bf16.msra.mxu1 %v5131_v6  ;;  %v2475_v6 = vld [vmem:[#allocation10 + $0x668] sm:$0xff] }
 0x31e   :  { %5134 = vmatprep.subr.bf16.mxu1 %v5133_v42  ;;  %v2477_v42 = vld [vmem:[#allocation10 + $0x678] sm:$0xff] }
 0x31f   :  { %v5165_v35 = vpack.c.bf16 %v2477_v42, %v2475_v6  ;;  %v2949_v42 = vld [vmem:[#allocation13 + $0x20] sm:$0xff] }
 0x321   :  { %5136 = vmatpush1.bf16.msra.mxu1 %v5135_v16  ;;  %v2481_v16 = vld [vmem:[#allocation10 + $0x698] sm:$0xff] }
 0x322   :  { %5138 = vmatprep.subr.bf16.mxu1 %v5137_v17  ;;  %v5169_v18 = vpack.c.bf16 %v2481_v16, %v2479_v12  ;;  %v2968_v12 = vld [vmem:[#allocation13 + $0xb8] sm:$0xff]  ;;  %v2499_v16 = vld [vmem:[#allocation10 + $0x728] sm:$0xff] }
 0x325   :  { %5140 = vmatpush1.bf16.msra.mxu1 %v5139_v23  ;;  %v2485_v23 = vld [vmem:[#allocation10 + $0x6b8] sm:$0xff] }
 0x326   :  { %5142 = vmatprep.subr.bf16.mxu1 %v5141_v24  ;;  %v5171_v24 = vpack.c.bf16 %v2480_v22, %v2478_v19  ;;  %v5173_v31 = vpack.c.bf16 %v2485_v23, %v2483_v45  ;;  %v2498_v22 = vld [vmem:[#allocation10 + $0x720] sm:$0xff]  ;;  %v2951_v23 = vld [vmem:[#allocation13 + $0x30] sm:$0xff] }
 0x329   :  { %5144 = vmatpush1.bf16.msra.mxu1 %v5143_v38  ;;  %v2487_v38 = vld [vmem:[#allocation10 + $0x6c8] sm:$0xff] }
 0x32a   :  { %5146 = vmatprep.subr.bf16.mxu1 %v5145_v40  ;;  %v2489_v40 = vld [vmem:[#allocation10 + $0x6d8] sm:$0xff] }
 0x32b   :  { %v5177_v15 = vpack.c.bf16 %v2489_v40, %v2487_v38  ;;  %v2970_v38 = vld [vmem:[#allocation13 + $0xc8] sm:$0xff] }
 0x32c   :  { %v2503_v40 = vld [vmem:[#allocation10 + $0x748] sm:$0xff] }
 0x32d   :  { %5148 = vmatpush1.bf16.msra.mxu1 %v5147_v29  ;;  %v2488_v29 = vld [vmem:[#allocation10 + $0x6d0] sm:$0xff] }
 0x32e   :  { %5150 = vmatprep.subr.bf16.mxu1 %v5149_v14  ;;  %v2491_v14 = vld [vmem:[#allocation10 + $0x6e8] sm:$0xff] }
 0x32f   :  { %v5181_v62 = vpack.c.bf16 %v2493_v50, %v2491_v14  ;;  %v5297_v14 = vpack.c.bf16 %v2970_v38, %v2969_v33  ;;  %v2953_v50 = vld [vmem:[#allocation13 + $0x40] sm:$0xff]  ;;  %v2520_v33 = vld [vmem:[#allocation10 + $0x7d0] sm:$0xff] }
 0x330   :  { %v2523_v38 = vld [vmem:[#allocation10 + $0x7e8] sm:$0xff] }
 0x331   :  { %5152 = vmatpush1.bf16.msra.mxu1 %v5151_v52  ;;  %v2945_v52 = vld [vmem:[#allocation13] sm:$0xff] }
 0x332   :  { %5154 = vmatprep.subr.bf16.mxu1 %v5153_v54  ;;  %v5179_v54 = vpack.c.bf16 %v2488_v29, %v2486_v37  ;;  %v5191_v37 = vpack.c.bf16 %v2500_v32, %v2498_v22  ;;  %v2502_v29 = vld [vmem:[#allocation10 + $0x740] sm:$0xff]  ;;  %v2516_v22 = vld [vmem:[#allocation10 + $0x7b0] sm:$0xff] }
 0x333   :  { %v2518_v32 = vld [vmem:[#allocation10 + $0x7c0] sm:$0xff] }
 0x334   :  { %2377 = vmatmul.mubr.f32.vlgmr.msra.gmra.mrb[0].mxu1 %v7171_v30  ;;  %v2476_v30 = vld [vmem:[#allocation10 + $0x670] sm:$0xff] }
 0x335   :  { %2382 = vmatprep.mubr.f32.mxu1 %v7177_v44  ;;  %5156 = vmatpush1.bf16.msra.mxu1 %v5155_v25  ;;  %v5167_v17 = vpack.c.bf16 %v2476_v30, %v2474_v11  ;;  %v5283_v25 = vpack.c.bf16 %v2946_v20, %v2945_v52  ;;  %v2496_v11 = vld [vmem:[#allocation10 + $0x710] sm:$0xff]  ;;  %v2972_v52 = vld [vmem:[#allocation13 + $0xd8] sm:$0xff] }
 0x336   :  { %5158 = vmatprep.subr.bf16.mxu1 %v5157_v63  ;;  %v5285_v63 = vpack.c.bf16 %v2964_v61, %v2963_v60  ;;  %v2967_v30 = vld [vmem:[#allocation13 + $0xb0] sm:$0xff]  ;;  %v5187_v19 = vpack.c.bf16 %v2496_v11, %v2494_v58  ;;  %v5195_v60 = vpack.c.bf16 %v2504_v9, %v2502_v29  ;;  %v2506_v61 = vld [vmem:[#allocation10 + $0x760] sm:$0xff] }
 0x337   :  { %5284 = vmatpush3.bf16.msra.mxu0 %v5283_v25  ;;  %v5293_v45 = vpack.c.bf16 %v2968_v12, %v2967_v30  ;;  %v2955_v25 = vld [vmem:[#allocation13 + $0x50] sm:$0xff]  ;;  %v2515_v30 = vld [vmem:[#allocation10 + $0x7a8] sm:$0xff]  ;;  %v2676_v9 = vld [vmem:[#allocation10 + $0x800] sm:$0xff] }
 0x338   :  { %2383 = vmatmul.mubr.f32.gmra.mrb[2].mxu1 %v7179_v48  ;;  %5286 = vmatprep.subr.bf16.mxu0 %v5285_v63  ;;  %v2956_v63 = vld [vmem:[#allocation13 + $0x58] sm:$0xff]  ;;  %v2512_v11 = vld [vmem:[#allocation10 + $0x790] sm:$0xff] }
 0x339   :  { %2388 = vmatprep.mubr.f32.mxu1 %v7185_v53  ;;  %5160 = vmatpush1.bf16.msra.mxu1 %v5159_v28  ;;  %v2497_v28 = vld [vmem:[#allocation10 + $0x718] sm:$0xff]  ;;  %v2524_v29 = vld [vmem:[#allocation10 + $0x7f0] sm:$0xff] }
 0x33a   :  { %5162 = vmatprep.subr.bf16.mxu1 %v5161_v5  ;;  %v2966_v5 = vld [vmem:[#allocation13 + $0xa8] sm:$0xff]  ;;  %v2517_v12 = vld [vmem:[#allocation10 + $0x7b8] sm:$0xff] }
 0x33b   :  { %v5289_v6 = vpack.c.bf16 %v2966_v5, %v2965_v2  ;;  %5288 = vmatpush3.bf16.msra.mxu0 %v5287_v21  ;;  %v2973_v2 = vld [vmem:[#allocation13 + $0xe0] sm:$0xff]  ;;  %v2513_v5 = vld [vmem:[#allocation10 + $0x798] sm:$0xff]  ;;  %v5303_v21 = vpack.c.bf16 %v2956_v63, %v2955_v25 }
 0x33c   :  { %2389 = vmatmul.mubr.f32.gmra.mrb[4].mxu1 %v7187_v59  ;;  %v2687_v25 = vld [vmem:[#allocation10 + $0x858] sm:$0xff] }
 0x33d   :  { %2394 = vmatprep.mubr.f32.mxu1 %v7193_v4  ;;  %5164 = vmatpush1.bf16.msra.mxu1 %v5163_v10  ;;  %v2950_v10 = vld [vmem:[#allocation13 + $0x28] sm:$0xff] }
 0x33e   :  { %5166 = vmatprep.subr.bf16.mxu1 %v5165_v35  ;;  %v5185_v35 = vpack.c.bf16 %v2497_v28, %v2495_v3  ;;  %5290 = vmatprep.subr.bf16.mxu0 %v5289_v6  ;;  %v2974_v3 = vld [vmem:[#allocation13 + $0xe8] sm:$0xff]  ;;  %v2957_v6 = vld [vmem:[#allocation13 + $0x60] sm:$0xff] }
 0x33f   :  { %v2511_v28 = vld [vmem:[#allocation10 + $0x788] sm:$0xff]  ;;  %v5305_v58 = vpack.c.bf16 %v2974_v3, %v2973_v2  ;;  %v2686_v2 = vld [vmem:[#allocation10 + $0x850] sm:$0xff] }
 0x340   :  { %2395 = vmatmul.mubr.f32.gmra.mrb[6].mxu1 %v7195_v8  ;;  %v2689_v3 = vld [vmem:[#allocation10 + $0x868] sm:$0xff] }
 0x341   :  { %2400 = vmatprep.mubr.f32.mxu1 %v7235_v27  ;;  %5168 = vmatpush1.bf16.msra.mxu1 %v5167_v17  ;;  %v2501_v17 = vld [vmem:[#allocation10 + $0x738] sm:$0xff] }
 0x342   :  { %5170 = vmatprep.subr.bf16.mxu1 %v5169_v18  ;;  %v5291_v18 = vpack.c.bf16 %v2950_v10, %v2949_v42  ;;  %v2958_v42 = vld [vmem:[#allocation13 + $0x68] sm:$0xff]  ;;  %v5201_v10 = vpack.c.bf16 %v2513_v5, %v2511_v28  ;;  %v2691_v28 = vld [vmem:[#allocation10 + $0x878] sm:$0xff] }
 0x344   :  { %2401 = vmatmul.mubr.f32.gmra.mrb[8].mxu1 %v7240_v13  ;;  %5292 = vmatpush3.bf16.msra.mxu0 %v5291_v18  ;;  %v5205_v18 = vpack.c.bf16 %v2517_v12, %v2515_v30  ;;  %v2697_v30 = vld [vmem:[#allocation10 + $0x8a8] sm:$0xff]  ;;  %v2699_v12 = vld [vmem:[#allocation10 + $0x8b8] sm:$0xff] }
 0x345   :  { %2406 = vmatprep.mubr.f32.mxu1 %v7253_v36  ;;  %5172 = vmatpush1.bf16.msra.mxu1 %v5171_v24  ;;  %v2952_v24 = vld [vmem:[#allocation13 + $0x38] sm:$0xff] }
 0x346   :  { %5174 = vmatprep.subr.bf16.mxu1 %v5173_v31  ;;  %v5189_v31 = vpack.c.bf16 %v2501_v17, %v2499_v16  ;;  %5294 = vmatprep.subr.bf16.mxu0 %v5293_v45  ;;  %v5307_v16 = vpack.c.bf16 %v2958_v42, %v2957_v6  ;;  %v2519_v45 = vld [vmem:[#allocation10 + $0x7c8] sm:$0xff]  ;;  %v2695_v6 = vld [vmem:[#allocation10 + $0x898] sm:$0xff] }
 0x348   :  { %2407 = vmatmul.mubr.f32.gmra.mrb[10].mxu1 %v7258_v47 }
 0x349   :  { %5176 = vmatpush1.bf16.msra.mxu1 %v5175_v43  ;;  %2590 = vmatprep.mubr.f32.mxu1 %v7177_v44  ;;  %v5183_v44 = vpack.c.bf16 %v2492_v39, %v2490_v26  ;;  %v2505_v43 = vld [vmem:[#allocation10 + $0x758] sm:$0xff]  ;;  %v2954_v26 = vld [vmem:[#allocation13 + $0x48] sm:$0xff] }
 0x34a   :  { %5178 = vmatprep.subr.bf16.mxu1 %v5177_v15  ;;  %v5295_v15 = vpack.c.bf16 %v2952_v24, %v2951_v23  ;;  %v5193_v39 = vpack.c.bf16 %v2505_v43, %v2503_v40  ;;  %v5299_v20 = vpack.c.bf16 %v2954_v26, %v2953_v50  ;;  %v2521_v23 = vld [vmem:[#allocation10 + $0x7d8] sm:$0xff]  ;;  %v5211_v43 = vpack.c.bf16 %v2520_v33, %v2518_v32  ;;  %v2700_v33 = vld [vmem:[#allocation10 + $0x8c0] sm:$0xff] }
 0x34b   :  { %v2525_v40 = vld [vmem:[#allocation10 + $0x7f8] sm:$0xff] }
 0x34c   :  { %5296 = vmatpush3.bf16.msra.mxu0 %v5295_v15  ;;  %v5213_v15 = vpack.c.bf16 %v2525_v40, %v2523_v38  ;;  %v2679_v50 = vld [vmem:[#allocation10 + $0x818] sm:$0xff]  ;;  %v2702_v38 = vld [vmem:[#allocation10 + $0x8d0] sm:$0xff]  ;;  %v2705_v40 = vld [vmem:[#allocation10 + $0x8e8] sm:$0xff] }
 0x34d   :  { %5180 = vmatpush1.bf16.msra.mxu1 %v5179_v54  ;;  %v2507_v54 = vld [vmem:[#allocation10 + $0x768] sm:$0xff]  ;;  %5298 = vmatprep.subr.bf16.mxu0 %v5297_v14 }
 0x34e   :  { %5182 = vmatprep.subr.bf16.mxu1 %v5181_v62  ;;  %v5301_v62 = vpack.c.bf16 %v2972_v52, %v2971_v51  ;;  %v5197_v1 = vpack.c.bf16 %v2509_v7, %v2507_v54  ;;  %v2677_v14 = vld [vmem:[#allocation10 + $0x808] sm:$0xff]  ;;  %v2678_v51 = vld [vmem:[#allocation10 + $0x810] sm:$0xff]  ;;  %v2683_v54 = vld [vmem:[#allocation10 + $0x838] sm:$0xff] }
 0x34f   :  { %v2681_v52 = vld [vmem:[#allocation10 + $0x828] sm:$0xff]  ;;  %v5219_v7 = vpack.c.bf16 %v2678_v51, %v2676_v9  ;;  %v2708_v51 = vld [vmem:[#allocation10 + $0x900] sm:$0xff] }
 0x350   :  { %5300 = vmatpush3.bf16.msra.mxu0 %v5299_v20  ;;  %v5221_v20 = vpack.c.bf16 %v2683_v54, %v2681_v52  ;;  %v2710_v52 = vld [vmem:[#allocation10 + $0x910] sm:$0xff]  ;;  %v2713_v54 = vld [vmem:[#allocation10 + $0x928] sm:$0xff] }
 0x351   :  { %5184 = vmatpush1.bf16.msra.mxu1 %v5183_v44  ;;  %v5199_v44 = vpack.c.bf16 %v2508_v57, %v2506_v61  ;;  %5302 = vmatprep.subr.bf16.mxu0 %v5301_v62  ;;  %v2682_v61 = vld [vmem:[#allocation10 + $0x830] sm:$0xff]  ;;  %v2685_v62 = vld [vmem:[#allocation10 + $0x848] sm:$0xff]  ;;  %v2684_v57 = vld [vmem:[#allocation10 + $0x840] sm:$0xff] }
 0x352   :  { %5186 = vmatprep.subr.bf16.mxu1 %v5185_v35  ;;  %v2510_v35 = vld [vmem:[#allocation10 + $0x780] sm:$0xff]  ;;  %v5227_v5 = vpack.c.bf16 %v2686_v2, %v2684_v57  ;;  %v2718_v2 = vld [vmem:[#allocation10 + $0x950] sm:$0xff] }
 0x353   :  { %v5203_v17 = vpack.c.bf16 %v2512_v11, %v2510_v35  ;;  %v2692_v35 = vld [vmem:[#allocation10 + $0x880] sm:$0xff]  ;;  %v2694_v11 = vld [vmem:[#allocation10 + $0x890] sm:$0xff] }
 0x354   :  { %5304 = vmatpush3.bf16.msra.mxu0 %v5303_v21  ;;  %v5229_v21 = vpack.c.bf16 %v2691_v28, %v2689_v3  ;;  %v2716_v57 = vld [vmem:[#allocation10 + $0x940] sm:$0xff]  ;;  %v2721_v3 = vld [vmem:[#allocation10 + $0x968] sm:$0xff]  ;;  %v2723_v28 = vld [vmem:[#allocation10 + $0x978] sm:$0xff] }
 0x355   :  { %5188 = vmatpush1.bf16.msra.mxu1 %v5187_v19  ;;  %5306 = vmatprep.subr.bf16.mxu0 %v5305_v58  ;;  %v2514_v19 = vld [vmem:[#allocation10 + $0x7a0] sm:$0xff]  ;;  %v2693_v58 = vld [vmem:[#allocation10 + $0x888] sm:$0xff] }
 0x356   :  { %5190 = vmatprep.subr.bf16.mxu1 %v5189_v31  ;;  %v5207_v24 = vpack.c.bf16 %v2516_v22, %v2514_v19  ;;  %v5209_v31 = vpack.c.bf16 %v2521_v23, %v2519_v45  ;;  %v2698_v19 = vld [vmem:[#allocation10 + $0x8b0] sm:$0xff]  ;;  %v1809_v22 = vmax.f32 %v7217_v41, 0.0  ;;  %v2701_v45 = vld [vmem:[#allocation10 + $0x8c8] sm:$0xff]  ;;  %v2703_v23 = vld [vmem:[#allocation10 + $0x8d8] sm:$0xff] }
 0x357   :  { %v5241_v32 = vpack.c.bf16 %v2703_v23, %v2701_v45  ;;  %v2733_v45 = vld [vmem:[#allocation10 + $0x9c8] sm:$0xff]  ;;  %v2735_v23 = vld [vmem:[#allocation10 + $0x9d8] sm:$0xff] }
 0x358   :  { %5308 = vmatpush3.bf16.msra.mxu0 %v5307_v16  ;;  %v5235_v16 = vpack.c.bf16 %v2694_v11, %v2692_v35  ;;  %v2724_v35 = vld [vmem:[#allocation10 + $0x980] sm:$0xff]  ;;  %v2726_v11 = vld [vmem:[#allocation10 + $0x990] sm:$0xff] }
 0x359   :  { %5192 = vmatpush1.bf16.msra.mxu1 %v5191_v37  ;;  %v2522_v37 = vld [vmem:[#allocation10 + $0x7e0] sm:$0xff]  ;;  %v2959_v41 = vld [vmem:[#allocation13 + $0x70] sm:$0xff] }
 0x35a   :  { %5194 = vmatprep.subr.bf16.mxu1 %v5193_v39  ;;  %v5215_v26 = vpack.c.bf16 %v2524_v29, %v2522_v37  ;;  %v5217_v39 = vpack.c.bf16 %v2679_v50, %v2677_v14  ;;  %v2704_v29 = vld [vmem:[#allocation10 + $0x8e0] sm:$0xff]  ;;  %v2706_v14 = vld [vmem:[#allocation10 + $0x8f0] sm:$0xff]  ;;  %v2709_v50 = vld [vmem:[#allocation10 + $0x908] sm:$0xff] }
 0x35d   :  { %5196 = vmatpush1.bf16.msra.mxu1 %v5195_v60  ;;  %v2680_v60 = vld [vmem:[#allocation10 + $0x820] sm:$0xff] }
 0x35e   :  { %5198 = vmatprep.subr.bf16.mxu1 %v5197_v1  ;;  %v5223_v63 = vpack.c.bf16 %v2682_v61, %v2680_v60  ;;  %v5225_v1 = vpack.c.bf16 %v2687_v25, %v2685_v62  ;;  %v2714_v61 = vld [vmem:[#allocation10 + $0x930] sm:$0xff]  ;;  %v2717_v62 = vld [vmem:[#allocation10 + $0x948] sm:$0xff]  ;;  %v2719_v25 = vld [vmem:[#allocation10 + $0x958] sm:$0xff] }
 0x361   :  { %5200 = vmatpush1.bf16.msra.mxu1 %v5199_v44  ;;  %v2688_v44 = vld [vmem:[#allocation10 + $0x860] sm:$0xff] }
 0x362   :  { %5202 = vmatprep.subr.bf16.mxu1 %v5201_v10  ;;  %v5233_v10 = vpack.c.bf16 %v2695_v6, %v2693_v58  ;;  %v2725_v58 = vld [vmem:[#allocation10 + $0x988] sm:$0xff]  ;;  %v2727_v6 = vld [vmem:[#allocation10 + $0x998] sm:$0xff] }
 0x365   :  { %5204 = vmatpush1.bf16.msra.mxu1 %v5203_v17  ;;  %v5237_v17 = vpack.c.bf16 %v2699_v12, %v2697_v30  ;;  %v2729_v30 = vld [vmem:[#allocation10 + $0x9a8] sm:$0xff]  ;;  %v2731_v12 = vld [vmem:[#allocation10 + $0x9b8] sm:$0xff] }
 0x366   :  { %5206 = vmatprep.subr.bf16.mxu1 %v5205_v18  ;;  %v2696_v18 = vld [vmem:[#allocation10 + $0x8a0] sm:$0xff] }
 0x369   :  { %5208 = vmatpush1.bf16.msra.mxu1 %v5207_v24  ;;  %v5239_v24 = vpack.c.bf16 %v2698_v19, %v2696_v18  ;;  %v2728_v18 = vld [vmem:[#allocation10 + $0x9a0] sm:$0xff]  ;;  %v2730_v19 = vld [vmem:[#allocation10 + $0x9b0] sm:$0xff] }
 0x36a   :  { %5210 = vmatprep.subr.bf16.mxu1 %v5209_v31  ;;  %v1808_v31 = vmax.f32 %v7214_v46, 0.0 }
 0x36d   :  { %5212 = vmatpush1.bf16.msra.mxu1 %v5211_v43  ;;  %v2707_v43 = vld [vmem:[#allocation10 + $0x8f8] sm:$0xff] }
 0x36e   :  { %5214 = vmatprep.subr.bf16.mxu1 %v5213_v15  ;;  %v5243_v15 = vpack.c.bf16 %v2702_v38, %v2700_v33  ;;  %v5245_v37 = vpack.c.bf16 %v2707_v43, %v2705_v40  ;;  %v2732_v33 = vld [vmem:[#allocation10 + $0x9c0] sm:$0xff]  ;;  %v2734_v38 = vld [vmem:[#allocation10 + $0x9d0] sm:$0xff]  ;;  %v2737_v40 = vld [vmem:[#allocation10 + $0x9e8] sm:$0xff] }
 0x36f   :  { %v2739_v43 = vld [vmem:[#allocation10 + $0x9f8] sm:$0xff] }
 0x371   :  { %5216 = vmatpush1.bf16.msra.mxu1 %v5215_v26  ;;  %v2711_v26 = vld [vmem:[#allocation10 + $0x918] sm:$0xff] }
 0x372   :  { %5218 = vmatprep.subr.bf16.mxu1 %v5217_v39  ;;  %v5247_v39 = vpack.c.bf16 %v2706_v14, %v2704_v29  ;;  %v5249_v9 = vpack.c.bf16 %v2711_v26, %v2709_v50  ;;  %v2736_v29 = vld [vmem:[#allocation10 + $0x9e0] sm:$0xff]  ;;  %v2738_v14 = vld [vmem:[#allocation10 + $0x9f0] sm:$0xff] }
 0x373   :  { %v3229_v50 = vld [vmem:[#allocation13 + $0x280] sm:$0xff]  ;;  %v3230_v26 = vld [vmem:[#allocation13 + $0x288] sm:$0xff] }
 0x374   :  { %2591 = vmatmul.mubr.f32.vlgmr.msra.gmra.mrb[0].mxu1 %v7179_v48  ;;  %v2690_v48 = vld [vmem:[#allocation10 + $0x870] sm:$0xff] }
 0x375   :  { %2596 = vmatprep.mubr.f32.mxu1 %v7185_v53  ;;  %5220 = vmatpush1.bf16.msra.mxu1 %v5219_v7  ;;  %v5231_v42 = vpack.c.bf16 %v2690_v48, %v2688_v44  ;;  %v2715_v7 = vld [vmem:[#allocation10 + $0x938] sm:$0xff]  ;;  %v2720_v44 = vld [vmem:[#allocation10 + $0x960] sm:$0xff]  ;;  %v2722_v48 = vld [vmem:[#allocation10 + $0x970] sm:$0xff] }
 0x376   :  { %5222 = vmatprep.subr.bf16.mxu1 %v5221_v20  ;;  %v5251_v20 = vpack.c.bf16 %v2710_v52, %v2708_v51  ;;  %v5253_v60 = vpack.c.bf16 %v2715_v7, %v2713_v54  ;;  %v3213_v51 = vld [vmem:[#allocation13 + $0x200] sm:$0xff]  ;;  %v3214_v52 = vld [vmem:[#allocation13 + $0x208] sm:$0xff]  ;;  %v3231_v54 = vld [vmem:[#allocation13 + $0x290] sm:$0xff] }
 0x377   :  { %v3232_v7 = vld [vmem:[#allocation13 + $0x298] sm:$0xff] }
 0x378   :  { %2597 = vmatmul.mubr.f32.gmra.mrb[2].mxu1 %v7187_v59 }
 0x379   :  { %2602 = vmatprep.mubr.f32.mxu1 %v7193_v4  ;;  %5224 = vmatpush1.bf16.msra.mxu1 %v5223_v63 }
 0x37a   :  { %5226 = vmatprep.subr.bf16.mxu1 %v5225_v1  ;;  %v5257_v1 = vpack.c.bf16 %v2719_v25, %v2717_v62  ;;  %v3233_v62 = vld [vmem:[#allocation13 + $0x2a0] sm:$0xff]  ;;  %v3234_v25 = vld [vmem:[#allocation13 + $0x2a8] sm:$0xff] }
 0x37c   :  { %2603 = vmatmul.mubr.f32.gmra.mrb[4].mxu1 %v7195_v8 }
 0x37d   :  { %2608 = vmatprep.mubr.f32.mxu1 %v7235_v27  ;;  %5228 = vmatpush1.bf16.msra.mxu1 %v5227_v5  ;;  %v5259_v5 = vpack.c.bf16 %v2718_v2, %v2716_v57  ;;  %v3217_v57 = vld [vmem:[#allocation13 + $0x220] sm:$0xff]  ;;  %v3218_v2 = vld [vmem:[#allocation13 + $0x228] sm:$0xff] }
 0x37e   :  { %5230 = vmatprep.subr.bf16.mxu1 %v5229_v21  ;;  %v5261_v21 = vpack.c.bf16 %v2723_v28, %v2721_v3  ;;  %v3235_v3 = vld [vmem:[#allocation13 + $0x2b0] sm:$0xff]  ;;  %v3236_v28 = vld [vmem:[#allocation13 + $0x2b8] sm:$0xff] }
 0x380   :  { %2609 = vmatmul.mubr.f32.gmra.mrb[6].mxu1 %v7240_v13 }
 0x381   :  { %2614 = vmatprep.mubr.f32.mxu1 %v7253_v36  ;;  %5232 = vmatpush1.bf16.msra.mxu1 %v5231_v42  ;;  %v5263_v42 = vpack.c.bf16 %v2722_v48, %v2720_v44  ;;  %v3219_v44 = vld [vmem:[#allocation13 + $0x230] sm:$0xff]  ;;  %v3237_v48 = vld [vmem:[#allocation13 + $0x2c0] sm:$0xff] }
 0x382   :  { %5234 = vmatprep.subr.bf16.mxu1 %v5233_v10  ;;  %v5265_v10 = vpack.c.bf16 %v2727_v6, %v2725_v58 }
 0x384   :  { %2615 = vmatmul.mubr.f32.gmra.mrb[8].mxu1 %v7258_v47 }
 0x385   :  { %2620 = vmatprep.mubr.f32.mxu1 %v1809_v22  ;;  %5236 = vmatpush1.bf16.msra.mxu1 %v5235_v16  ;;  %v5267_v16 = vpack.c.bf16 %v2726_v11, %v2724_v35  ;;  %v2976_v35 = vld [vmem:[#allocation13 + $0xf8] sm:$0xff]  ;;  %v3239_v11 = vld [vmem:[#allocation13 + $0x2d0] sm:$0xff] }
 0x386   :  { %5238 = vmatprep.subr.bf16.mxu1 %v5237_v17  ;;  %v5269_v17 = vpack.c.bf16 %v2731_v12, %v2729_v30  ;;  %v3240_v12 = vld [vmem:[#allocation13 + $0x2d8] sm:$0xff] }
 0x387   :  { %v5365_v46 = vpack.c.bf16 %v3240_v12, %v3239_v11 }
 0x388   :  { %2621 = vmatmul.mubr.f32.gmra.mrb[10].mxu1 %v1808_v31 }
 0x389   :  { %5240 = vmatpush1.bf16.msra.mxu1 %v5239_v24  ;;  %2804 = vmatprep.mubr.f32.mxu1 %v7185_v53  ;;  %v2712_v53 = vld [vmem:[#allocation10 + $0x920] sm:$0xff]  ;;  %v5271_v24 = vpack.c.bf16 %v2730_v19, %v2728_v18 }
 0x38a   :  { %5242 = vmatprep.subr.bf16.mxu1 %v5241_v32  ;;  %v5255_v63 = vpack.c.bf16 %v2714_v61, %v2712_v53  ;;  %v5273_v32 = vpack.c.bf16 %v2735_v23, %v2733_v45  ;;  %v3215_v53 = vld [vmem:[#allocation13 + $0x210] sm:$0xff]  ;;  %v3216_v61 = vld [vmem:[#allocation13 + $0x218] sm:$0xff]  ;;  %v3241_v19 = vld [vmem:[#allocation13 + $0x2e0] sm:$0xff] }
 0x38b   :  { %v3242_v45 = vld [vmem:[#allocation13 + $0x2e8] sm:$0xff] }
 0x38c   :  { %v5369_v23 = vpack.c.bf16 %v3242_v45, %v3241_v19 }
 0x38d   :  { %5244 = vmatpush1.bf16.msra.mxu1 %v5243_v15  ;;  %v5275_v15 = vpack.c.bf16 %v2734_v38, %v2732_v33  ;;  %v3243_v38 = vld [vmem:[#allocation13 + $0x2f0] sm:$0xff] }
 0x38e   :  { %5246 = vmatprep.subr.bf16.mxu1 %v5245_v37  ;;  %v5277_v37 = vpack.c.bf16 %v2739_v43, %v2737_v40  ;;  %v3244_v40 = vld [vmem:[#allocation13 + $0x2f8] sm:$0xff]  ;;  %v3227_v43 = vld [vmem:[#allocation13 + $0x270] sm:$0xff] }
 0x391   :  { %5248 = vmatpush1.bf16.msra.mxu1 %v5247_v39  ;;  %v5279_v39 = vpack.c.bf16 %v2738_v14, %v2736_v29  ;;  %v2889_v14 = vld [vmem:[#allocation12] sm:$0x3] }
 0x392   :  { %5250 = vmatprep.subr.bf16.mxu1 %v5249_v9  ;;  %v5345_v9 = vpack.c.bf16 %v3230_v26, %v3229_v50  ;;  %v7292_v50 = vrot.slane %v2889_v14, %v7143_v55  ;;  %v7295_v26 = vrot.slane %v2889_v14, %v7145_v56 }
 0x395   :  { %5252 = vmatpush1.bf16.msra.mxu1 %v5251_v20  ;;  %v5347_v20 = vpack.c.bf16 %v3214_v52, %v3213_v51  ;;  %v3075_v52 = vld [vmem:[#allocation13 + $0x100] sm:$0xff] }
 0x396   :  { %5254 = vmatprep.subr.bf16.mxu1 %v5253_v60  ;;  %v5349_v60 = vpack.c.bf16 %v3232_v7, %v3231_v54  ;;  %v3076_v54 = vld [vmem:[#allocation13 + $0x108] sm:$0xff] }
 0x399   :  { %5256 = vmatpush1.bf16.msra.mxu1 %v5255_v63  ;;  %v5351_v63 = vpack.c.bf16 %v3216_v61, %v3215_v53 }
 0x39a   :  { %5258 = vmatprep.subr.bf16.mxu1 %v5257_v1  ;;  %v5353_v1 = vpack.c.bf16 %v3234_v25, %v3233_v62  ;;  %v5315_v62 = vpack.c.bf16 %v3076_v54, %v3075_v52  ;;  %v3085_v54 = vld [vmem:[#allocation13 + $0x150] sm:$0xff] }
 0x39d   :  { %5260 = vmatpush1.bf16.msra.mxu1 %v5259_v5  ;;  %v5355_v5 = vpack.c.bf16 %v3218_v2, %v3217_v57  ;;  %v3077_v2 = vld [vmem:[#allocation13 + $0x110] sm:$0xff] }
 0x39e   :  { %5262 = vmatprep.subr.bf16.mxu1 %v5261_v21  ;;  %v5357_v21 = vpack.c.bf16 %v3236_v28, %v3235_v3  ;;  %v3078_v3 = vld [vmem:[#allocation13 + $0x118] sm:$0xff] }
 0x3a1   :  { %5264 = vmatpush1.bf16.msra.mxu1 %v5263_v42 }
 0x3a2   :  { %5266 = vmatprep.subr.bf16.mxu1 %v5265_v10  ;;  %v2975_v10 = vld [vmem:[#allocation13 + $0xf0] sm:$0xff] }
 0x3a5   :  { %5268 = vmatpush1.bf16.msra.mxu1 %v5267_v16  ;;  %v3224_v16 = vld [vmem:[#allocation13 + $0x258] sm:$0xff] }
 0x3a6   :  { %5270 = vmatprep.subr.bf16.mxu1 %v5269_v17  ;;  %v3092_v17 = vld [vmem:[#allocation13 + $0x188] sm:$0xff] }
 0x3a9   :  { %5272 = vmatpush1.bf16.msra.mxu1 %v5271_v24  ;;  %v3225_v24 = vld [vmem:[#allocation13 + $0x260] sm:$0xff] }
 0x3aa   :  { %5274 = vmatprep.subr.bf16.mxu1 %v5273_v32  ;;  %v3226_v32 = vld [vmem:[#allocation13 + $0x268] sm:$0xff] }
 0x3ab   :  { %v5371_v33 = vpack.c.bf16 %v3226_v32, %v3225_v24 }
 0x3ad   :  { %5276 = vmatpush1.bf16.msra.mxu1 %v5275_v15  ;;  %v3228_v15 = vld [vmem:[#allocation13 + $0x278] sm:$0xff] }
 0x3ae   :  { %5278 = vmatprep.subr.bf16.mxu1 %v5277_v37  ;;  %v5373_v37 = vpack.c.bf16 %v3244_v40, %v3243_v38  ;;  %v5375_v29 = vpack.c.bf16 %v3228_v15, %v3227_v43  ;;  %v3084_v38 = vld [vmem:[#allocation13 + $0x148] sm:$0xff]  ;;  %v3101_v43 = vld [vmem:[#allocation13 + $0x1d0] sm:$0xff]  ;;  %v3102_v15 = vld [vmem:[#allocation13 + $0x1d8] sm:$0xff] }
 0x3af   :  { %v5333_v52 = vpack.c.bf16 %v3102_v15, %v3101_v43  ;;  %v4269_v43 = vld [vmem:[%s7638_s7 + $0xd0] sm:$0xff]  ;;  %v4270_v15 = vld [vmem:[%s7638_s7 + $0xd8] sm:$0xff] }
 0x3b1   :  { %5280 = vmatpush1.bf16.msra.mxu1 %v5279_v39 }
 0x3b2   :  { %5346 = vmatprep.subr.bf16.mxu1 %v5345_v9 }
 0x3b4   :  { %2805 = vmatmul.mubr.f32.vlgmr.msra.gmra.mrb[0].mxu1 %v7187_v59  ;;  %v3220_v59 = vld [vmem:[#allocation13 + $0x238] sm:$0xff] }
 0x3b5   :  { %2810 = vmatprep.mubr.f32.mxu1 %v7193_v4  ;;  %5348 = vmatpush3.bf16.msra.mxu1 %v5347_v20  ;;  %v3238_v4 = vld [vmem:[#allocation13 + $0x2c8] sm:$0xff]  ;;  %v5359_v58 = vpack.c.bf16 %v3220_v59, %v3219_v44  ;;  %v3093_v20 = vld [vmem:[#allocation13 + $0x190] sm:$0xff] }
 0x3b6   :  { %5350 = vmatprep.subr.bf16.mxu1 %v5349_v60  ;;  %v5361_v6 = vpack.c.bf16 %v3238_v4, %v3237_v48  ;;  %v3094_v60 = vld [vmem:[#allocation13 + $0x198] sm:$0xff]  ;;  %v5319_v48 = vpack.c.bf16 %v3078_v3, %v3077_v2  ;;  %v3088_v2 = vld [vmem:[#allocation13 + $0x168] sm:$0xff] }
 0x3b7   :  { %v5317_v57 = vpack.c.bf16 %v3094_v60, %v3093_v20  ;;  %v3103_v60 = vld [vmem:[#allocation13 + $0x1e0] sm:$0xff]  ;;  %v3106_v3 = vld [vmem:[#allocation13 + $0x1f8] sm:$0xff] }
 0x3b8   :  { %2811 = vmatmul.mubr.f32.gmra.mrb[2].mxu1 %v7195_v8  ;;  %v1811_v8 = vmax.f32 %v7223_v34, 0.0  ;;  %v3223_v34 = vld [vmem:[#allocation13 + $0x250] sm:$0xff] }
 0x3b9   :  { %2816 = vmatprep.mubr.f32.mxu1 %v7235_v27  ;;  %5352 = vmatpush3.bf16.msra.mxu1 %v5351_v63  ;;  %v1810_v27 = vmax.f32 %v7220_v49, 0.0  ;;  %v3091_v49 = vld [vmem:[#allocation13 + $0x180] sm:$0xff] }
 0x3ba   :  { %5354 = vmatprep.subr.bf16.mxu1 %v5353_v1  ;;  %v5313_v18 = vpack.c.bf16 %v3092_v17, %v3091_v49  ;;  %v3100_v49 = vld [vmem:[#allocation13 + $0x1c8] sm:$0xff] }
 0x3bc   :  { %2817 = vmatmul.mubr.f32.gmra.mrb[4].mxu1 %v7240_v13  ;;  %v3221_v13 = vld [vmem:[#allocation13 + $0x240] sm:$0xff] }
 0x3bd   :  { %2822 = vmatprep.mubr.f32.mxu1 %v7253_v36  ;;  %5356 = vmatpush3.bf16.msra.mxu1 %v5355_v5  ;;  %v3222_v36 = vld [vmem:[#allocation13 + $0x248] sm:$0xff]  ;;  %v3095_v5 = vld [vmem:[#allocation13 + $0x1a0] sm:$0xff] }
 0x3be   :  { %5358 = vmatprep.subr.bf16.mxu1 %v5357_v21  ;;  %v5363_v42 = vpack.c.bf16 %v3222_v36, %v3221_v13  ;;  %v3096_v21 = vld [vmem:[#allocation13 + $0x1a8] sm:$0xff] }
 0x3bf   :  { %v3080_v13 = vld [vmem:[#allocation13 + $0x128] sm:$0xff] }
 0x3c0   :  { %2823 = vmatmul.mubr.f32.gmra.mrb[6].mxu1 %v7258_v47  ;;  %v5309_v47 = vpack.c.bf16 %v2976_v35, %v2975_v10  ;;  %v3098_v10 = vld [vmem:[#allocation13 + $0x1b8] sm:$0xff] }
 0x3c1   :  { %2828 = vmatprep.mubr.f32.mxu1 %v1809_v22  ;;  %5360 = vmatpush3.bf16.msra.mxu1 %v5359_v58  ;;  %v2960_v22 = vld [vmem:[#allocation13 + $0x78] sm:$0xff] }
 0x3c2   :  { %5362 = vmatprep.subr.bf16.mxu1 %v5361_v6  ;;  %v5311_v30 = vpack.c.bf16 %v2960_v22, %v2959_v41  ;;  %5310 = vmatprep.subr.bf16.mxu0 %v5309_v47 }
 0x3c4   :  { %2829 = vmatmul.mubr.f32.gmra.mrb[8].mxu1 %v1808_v31  ;;  %v5367_v31 = vpack.c.bf16 %v3224_v16, %v3223_v34  ;;  %5312 = vmatpush3.bf16.msra.mxu0 %v5311_v30  ;;  %v3081_v34 = vld [vmem:[#allocation13 + $0x130] sm:$0xff]  ;;  %v3082_v16 = vld [vmem:[#allocation13 + $0x138] sm:$0xff] }
 0x3c5   :  { %2834 = vmatprep.mubr.f32.mxu1 %v1811_v8  ;;  %5364 = vmatpush3.bf16.msra.mxu1 %v5363_v42  ;;  %v5321_v8 = vpack.c.bf16 %v3096_v21, %v3095_v5  ;;  %v3097_v42 = vld [vmem:[#allocation13 + $0x1b0] sm:$0xff]  ;;  %v5327_v19 = vpack.c.bf16 %v3082_v16, %v3081_v34  ;;  %v3090_v21 = vld [vmem:[#allocation13 + $0x178] sm:$0xff] }
 0x3c6   :  { %5366 = vmatprep.subr.bf16.mxu1 %v5365_v46  ;;  %5314 = vmatprep.subr.bf16.mxu0 %v5313_v18  ;;  %v5325_v12 = vpack.c.bf16 %v3098_v10, %v3097_v42  ;;  %v3089_v5 = vld [vmem:[#allocation13 + $0x170] sm:$0xff] }
 0x3c7   :  { %v4261_v42 = vld [vmem:[%s7638_s7 + $0x90] sm:$0xff]  ;;  %v4262_v10 = vld [vmem:[%s7638_s7 + $0x98] sm:$0xff] }
 0x3c8   :  { %2835 = vmatmul.mubr.f32.gmra.mrb[10].mxu1 %v1810_v27  ;;  %v3079_v27 = vld [vmem:[#allocation13 + $0x120] sm:$0xff]  ;;  %v3373_v16 = vld [vmem:[%s7638_s7 + $0x38] sm:$0xff] }
 0x3c9   :  { %5368 = vmatpush3.bf16.msra.mxu1 %v5367_v31  ;;  %v5323_v41 = vpack.c.bf16 %v3080_v13, %v3079_v27  ;;  %v3099_v31 = vld [vmem:[#allocation13 + $0x1c0] sm:$0xff]  ;;  %v3369_v13 = vld [vmem:[%s7638_s7 + $0x18] sm:$0xff] }
 0x3ca   :  { %5370 = vmatprep.subr.bf16.mxu1 %v5369_v23  ;;  %v5329_v32 = vpack.c.bf16 %v3100_v49, %v3099_v31  ;;  %v4266_v31 = vld [vmem:[%s7638_s7 + $0xb8] sm:$0xff] }
 0x3cd   :  { %5372 = vmatpush3.bf16.msra.mxu1 %v5371_v33  ;;  %v3083_v33 = vld [vmem:[#allocation13 + $0x140] sm:$0xff] }
 0x3ce   :  { %5374 = vmatprep.subr.bf16.mxu1 %v5373_v37  ;;  %v5331_v14 = vpack.c.bf16 %v3084_v38, %v3083_v33  ;;  %v3377_v38 = vld [vmem:[%s7638_s7 + $0x58] sm:$0xff] }
 0x3d1   :  { %5376 = vmatpush3.bf16.msra.mxu1 %v5375_v29 }
 0x487   :  { %v2806_v39 = vpop.f32.mrb[0].mxu1 }
 0x488   :  { %v2901_v9 = vadd.f32 %v7292_v50, %v2806_v39  ;;  %v2808_v51 = vpop.f32.mrb[1].mxu1 }
 0x489   :  { %v2902_v7 = vadd.f32 %v7295_v26, %v2808_v51 }
 0x48a   :  { %v2913_v25 = vmax.f32 %v2901_v9, 0.0 }
 0x48b   :  { %v2914_v53 = vmax.f32 %v2902_v7, 0.0  ;;  %v2812_v61 = vpop.f32.mrb[2].mxu1  ;;  %v3086_v7 = vld [vmem:[#allocation13 + $0x158] sm:$0xff] }
 0x48c   :  { %v7300_v63 = vadd.f32 %v7292_v50, %v2812_v61  ;;  %v2814_v1 = vpop.f32.mrb[3].mxu1 }
 0x48d   :  { %v2904_v28 = vadd.f32 %v7295_v26, %v2814_v1  ;;  %3041 = vmatprep.mubr.f32.mxu0 %v2914_v53  ;;  %v3104_v53 = vld [vmem:[#allocation13 + $0x1e8] sm:$0xff] }
 0x48e   :  { %3042 = vmatmul.mubr.f32.vlgmr.msra.gmra.mrb[20].mxu0 %v2913_v25  ;;  %v2915_v4 = vmax.f32 %v7300_v63, 0.0  ;;  %v5337_v1 = vpack.c.bf16 %v3104_v53, %v3103_v60  ;;  %v4259_v63 = vld [vmem:[%s7638_s7 + $0x80] sm:$0xff]  ;;  %v4273_v60 = vld [vmem:[%s7638_s7 + $0xf0] sm:$0xff]  ;;  %v4274_v53 = vld [vmem:[%s7638_s7 + $0xf8] sm:$0xff] }
 0x48f   :  { %v2916_v44 = vmax.f32 %v2904_v28, 0.0  ;;  %5316 = vmatpush3.bf16.msra.mxu0 %v5315_v62  ;;  %v2818_v59 = vpop.f32.mrb[4].mxu1  ;;  %v5335_v62 = vpack.c.bf16 %v3086_v7, %v3085_v54  ;;  %v3381_v7 = vld [vmem:[%s7638_s7 + $0x78] sm:$0xff] }
 0x490   :  { %v2905_v58 = vadd.f32 %v7292_v50, %v2818_v59  ;;  %v2820_v6 = vpop.f32.mrb[5].mxu1  ;;  %5318 = vmatprep.subr.bf16.mxu0 %v5317_v57  ;;  %v3087_v57 = vld [vmem:[#allocation13 + $0x160] sm:$0xff] }
 0x491   :  { %v2906_v36 = vadd.f32 %v7295_v26, %v2820_v6  ;;  %3046 = vmatprep.mubr.f32.mxu0 %v2916_v44  ;;  %v5339_v28 = vpack.c.bf16 %v3088_v2, %v3087_v57  ;;  %v3366_v59 = vld [vmem:[%s7638_s7] sm:$0xff]  ;;  %v6021_v6 = vmov 0.0|0.0  }
 0x492   :  { %3047 = vmatmul.mubr.f32.gmra.mrb[22].mxu0 %v2915_v4  ;;  %v7310_v22 = vmax.f32 %v2905_v58, 0.0  ;;  %5401 = vmatprep.subr.bf16.mxu1 %v6021_v6 }
 0x493   :  { %v7308_v35 = vmax.f32 %v2906_v36, 0.0  ;;  %5320 = vmatpush3.bf16.msra.mxu0 %v5319_v48  ;;  %v2824_v47 = vpop.f32.mrb[6].mxu1  ;;  %v3367_v48 = vld [vmem:[%s7638_s7 + $0x8] sm:$0xff] }
 0x494   :  { %v2907_v11 = vadd.f32 %v7292_v50, %v2824_v47  ;;  %v2826_v30 = vpop.f32.mrb[7].mxu1  ;;  %5322 = vmatprep.subr.bf16.mxu0 %v5321_v8  ;;  %v5402_v58 = vpack.c.bf16 %v3367_v48, %v3366_v59  ;;  %v3368_v8 = vld [vmem:[%s7638_s7 + $0x10] sm:$0xff]  ;;  %v5381_v47 = vpack.c.bf16 %v4262_v10, %v4261_v42 }
 0x495   :  { %v2908_v46 = vadd.f32 %v7295_v26, %v2826_v30  ;;  %3051 = vmatprep.mubr.f32.mxu0 %v7308_v35  ;;  %3309 = vmatprep.mubr.f32.mxu1 %v7308_v35  ;;  %v5405_v36 = vpack.c.bf16 %v3369_v13, %v3368_v8  ;;  %v4264_v30 = vld [vmem:[%s7638_s7 + $0xa8] sm:$0xff] }
 0x496   :  { %3052 = vmatmul.mubr.f32.gmra.mrb[24].mxu0 %v7310_v22  ;;  %3310 = vmatmul.mubr.f32.vlgmr.msra.gmra.mrb[12].mxu1 %v7310_v22  ;;  %v2919_v45 = vmax.f32 %v2907_v11, 0.0  ;;  %v4263_v11 = vld [vmem:[%s7638_s7 + $0xa0] sm:$0xff] }
 0x497   :  { %v2920_v17 = vmax.f32 %v2908_v46, 0.0  ;;  %5324 = vmatpush3.bf16.msra.mxu0 %v5323_v41  ;;  %v2830_v18 = vpop.f32.mrb[8].mxu1  ;;  %5403 = vmatpush3.bf16.msra.mxu1 %v5402_v58  ;;  %v3371_v41 = vld [vmem:[%s7638_s7 + $0x28] sm:$0xff]  ;;  %v5384_v34 = vpack.c.bf16 %v4264_v30, %v4263_v11  ;;  %v4265_v46 = vld [vmem:[%s7638_s7 + $0xb0] sm:$0xff] }
 0x498   :  { %v2909_v23 = vadd.f32 %v7292_v50, %v2830_v18  ;;  %v2832_v24 = vpop.f32.mrb[9].mxu1  ;;  %5326 = vmatprep.subr.bf16.mxu0 %v5325_v12  ;;  %5404 = vmatprep.subr.bf16.mxu1 %v6021_v6  ;;  %v3372_v12 = vld [vmem:[%s7638_s7 + $0x30] sm:$0xff]  ;;  %v3375_v18 = vld [vmem:[%s7638_s7 + $0x48] sm:$0xff] }
 0x499   :  { %v2910_v40 = vadd.f32 %v7295_v26, %v2832_v24  ;;  %3056 = vmatprep.mubr.f32.mxu0 %v2920_v17  ;;  %3314 = vmatprep.mubr.f32.mxu1 %v2920_v17  ;;  %v5411_v49 = vpack.c.bf16 %v3373_v16, %v3372_v12  ;;  %v4268_v24 = vld [vmem:[%s7638_s7 + $0xc8] sm:$0xff]  ;;  %v7444_v12 = vld [vmem:[#allocation15] ss:$0 sm:$0xff] }
 0x49a   :  { %3057 = vmatmul.mubr.f32.gmra.mrb[26].mxu0 %v2919_v45  ;;  %3315 = vmatmul.mubr.f32.gmra.mrb[14].mxu1 %v2919_v45  ;;  %v2921_v39 = vmax.f32 %v2909_v23, 0.0  ;;  %v4267_v23 = vld [vmem:[%s7638_s7 + $0xc0] sm:$0xff] }
 0x49b   :  { %v2922_v37 = vmax.f32 %v2910_v40, 0.0  ;;  %5328 = vmatpush3.bf16.msra.mxu0 %v5327_v19  ;;  %v2836_v29 = vpop.f32.mrb[10].mxu1  ;;  %3171 = vmatprep.mubr.f32.mxu0 %v2916_v44  ;;  %v5343_v44 = vpack.c.bf16 %v3090_v21, %v3089_v5  ;;  %v5387_v19 = vpack.c.bf16 %v4266_v31, %v4265_v46  ;;  %v5390_v33 = vpack.c.bf16 %v4268_v24, %v4267_v23  ;;  %v4291_v31 = vld [vmem:[%s7638_s7 + $0x180] sm:$0xff] }
 0x49c   :  { %v2911_v9 = vadd.f32 %v7292_v50, %v2836_v29  ;;  %v2838_v51 = vpop.f32.mrb[11].mxu1  ;;  %5330 = vmatprep.subr.bf16.mxu0 %v5329_v32  ;;  %v3105_v50 = vld [vmem:[#allocation13 + $0x1f0] sm:$0xff]  ;;  %5406 = vmatpush3.bf16.msra.mxu1 %v5405_v36  ;;  %v5393_v29 = vpack.c.bf16 %v4270_v15, %v4269_v43  ;;  %v4275_v24 = vld [vmem:[%s7638_s7 + $0x100] sm:$0xff] }
 0x49d   :  { %v2912_v20 = vadd.f32 %v7295_v26, %v2838_v51  ;;  %3319 = vmatprep.mubr.f32.mxu1 %v2922_v37  ;;  %v5341_v26 = vpack.c.bf16 %v3106_v3, %v3105_v50  ;;  %5407 = vmatprep.subr.bf16.mxu1 %v6021_v6  ;;  %v3376_v32 = vld [vmem:[%s7638_s7 + $0x50] sm:$0xff]  ;;  %v4272_v51 = vld [vmem:[%s7638_s7 + $0xe8] sm:$0xff]  ;;  %v4294_v15 = vld [vmem:[%s7638_s7 + $0x198] sm:$0xff] }
 0x49e   :  { %3320 = vmatmul.mubr.f32.gmra.mrb[16].mxu1 %v2921_v39  ;;  %v2923_v25 = vmax.f32 %v2911_v9, 0.0  ;;  %v5417_v40 = vpack.c.bf16 %v3377_v38, %v3376_v32  ;;  %v4271_v9 = vld [vmem:[%s7638_s7 + $0xe0] sm:$0xff]  ;;  %v4293_v43 = vld [vmem:[%s7638_s7 + $0x190] sm:$0xff] }
 0x49f   :  { %v2924_v61 = vmax.f32 %v2912_v20, 0.0  ;;  %5332 = vmatpush3.bf16.msra.mxu0 %v5331_v14  ;;  %v3379_v14 = vld [vmem:[%s7638_s7 + $0x68] sm:$0xff]  ;;  %v5396_v54 = vpack.c.bf16 %v4272_v51, %v4271_v9  ;;  %v5453_v51 = vpack.c.bf16 %v4294_v15, %v4293_v43  ;;  %v3731_v15 = vld [vmem:[#allocation18 + $0x10] sm:$0xff] }
 0x4a0   :  { %5334 = vmatprep.subr.bf16.mxu0 %v5333_v52  ;;  %v3380_v52 = vld [vmem:[%s7638_s7 + $0x70] sm:$0xff] }
 0x4a1   :  { %3324 = vmatprep.mubr.f32.mxu1 %v2924_v61  ;;  %v5423_v20 = vpack.c.bf16 %v3381_v7, %v3380_v52  ;;  %v5399_v61 = vpack.c.bf16 %v4274_v53, %v4273_v60  ;;  %v4277_v52 = vld [vmem:[%s7638_s7 + $0x110] sm:$0xff]  ;;  %v4278_v60 = vld [vmem:[%s7638_s7 + $0x118] sm:$0xff]  ;;  %v4295_v53 = vld [vmem:[%s7638_s7 + $0x1a0] sm:$0xff] }
 0x4a2   :  { %3325 = vmatmul.mubr.f32.gmra.mrb[18].mxu1 %v2923_v25 }
 0x4a3   :  { %5336 = vmatpush3.bf16.msra.mxu0 %v5335_v62  ;;  %4629 = vmatprep.mubr.msk.f32.mxu1 %vm6022_vm0, %v6020_v0 }
 0x4a4   :  { %5338 = vmatprep.subr.bf16.mxu0 %v5337_v1 }
 0x4a7   :  { %5340 = vmatpush3.bf16.msra.mxu0 %v5339_v28 }
 0x4a8   :  { %5342 = vmatprep.subr.bf16.mxu0 %v5341_v26 }
 0x4ab   :  { %5344 = vmatpush3.bf16.msra.mxu0 %v5343_v44 }
 0x4ac   :  { %5377 = vmatprep.subr.bf16.mxu0 %v6021_v6 }
 0x4ae   :  { %3172 = vmatmul.mubr.f32.vlgmr.msra.gmra.mrb[28].mxu0 %v2915_v4  ;;  %v4260_v4 = vld [vmem:[%s7638_s7 + $0x88] sm:$0xff] }
 0x4af   :  { %3176 = vmatprep.mubr.f32.mxu0 %v7308_v35  ;;  %v5378_v27 = vpack.c.bf16 %v4260_v4, %v4259_v63  ;;  %v3370_v35 = vld [vmem:[%s7638_s7 + $0x20] sm:$0xff] }
 0x4b1   :  { %5379 = vmatpush3.bf16.msra.mxu0 %v5378_v27 }
 0x4b2   :  { %3177 = vmatmul.mubr.f32.gmra.mrb[30].mxu0 %v7310_v22  ;;  %5380 = vmatprep.subr.bf16.mxu0 %v6021_v6  ;;  %v5408_v22 = vpack.c.bf16 %v3371_v41, %v3370_v35 }
 0x4b3   :  { %3181 = vmatprep.mubr.f32.mxu0 %v2920_v17  ;;  %v3374_v17 = vld [vmem:[%s7638_s7 + $0x40] sm:$0xff] }
 0x4b4   :  { %5409 = vmatpush3.bf16.msra.mxu1 %v5408_v22 }
 0x4b5   :  { %5382 = vmatpush3.bf16.msra.mxu0 %v5381_v47  ;;  %5410 = vmatprep.subr.bf16.mxu1 %v6021_v6 }
 0x4b6   :  { %3182 = vmatmul.mubr.f32.gmra.mrb[32].mxu0 %v2919_v45  ;;  %5383 = vmatprep.subr.bf16.mxu0 %v6021_v6  ;;  %v5414_v45 = vpack.c.bf16 %v3375_v18, %v3374_v17 }
 0x4b7   :  { %3186 = vmatprep.mubr.f32.mxu0 %v2922_v37  ;;  %v3378_v37 = vld [vmem:[%s7638_s7 + $0x60] sm:$0xff] }
 0x4b8   :  { %5412 = vmatpush3.bf16.msra.mxu1 %v5411_v49  ;;  %v4292_v49 = vld [vmem:[%s7638_s7 + $0x188] sm:$0xff] }
 0x4b9   :  { %5385 = vmatpush3.bf16.msra.mxu0 %v5384_v34  ;;  %5413 = vmatprep.subr.bf16.mxu1 %v6021_v6  ;;  %v5450_v23 = vpack.c.bf16 %v4292_v49, %v4291_v31 }
 0x4ba   :  { %3187 = vmatmul.mubr.f32.gmra.mrb[34].mxu0 %v2921_v39  ;;  %5386 = vmatprep.subr.bf16.mxu0 %v6021_v6  ;;  %v5420_v39 = vpack.c.bf16 %v3379_v14, %v3378_v37 }
 0x4bb   :  { %4594 = vmatprep.mubr.msk.f32.mxu0 %vm6022_vm0, %v6020_v0 }
 0x4bc   :  { %5415 = vmatpush3.bf16.msra.mxu1 %v5414_v45 }
 0x4bd   :  { %5388 = vmatpush3.bf16.msra.mxu0 %v5387_v19  ;;  %5416 = vmatprep.subr.bf16.mxu1 %v6021_v6 }
 0x4be   :  { %5389 = vmatprep.subr.bf16.mxu0 %v6021_v6 }
 0x4c0   :  { %5418 = vmatpush3.bf16.msra.mxu1 %v5417_v40  ;;  %v4276_v40 = vld [vmem:[%s7638_s7 + $0x108] sm:$0xff] }
 0x4c1   :  { %5391 = vmatpush3.bf16.msra.mxu0 %v5390_v33  ;;  %5419 = vmatprep.subr.bf16.mxu1 %v6021_v6  ;;  %v5426_v9 = vpack.c.bf16 %v4276_v40, %v4275_v24  ;;  %v3729_v40 = vld [vmem:[#allocation18] sm:$0xff] }
 0x4c2   :  { %5392 = vmatprep.subr.bf16.mxu0 %v6021_v6 }
 0x4c4   :  { %5421 = vmatpush3.bf16.msra.mxu1 %v5420_v39 }
 0x4c5   :  { %5394 = vmatpush3.bf16.msra.mxu0 %v5393_v29  ;;  %5422 = vmatprep.subr.bf16.mxu1 %v6021_v6 }
 0x4c6   :  { %5395 = vmatprep.subr.bf16.mxu0 %v6021_v6 }
 0x4c8   :  { %5424 = vmatpush3.bf16.msra.mxu1 %v5423_v20 }
 0x4c9   :  { %5397 = vmatpush3.bf16.msra.mxu0 %v5396_v54  ;;  %5449 = vmatprep.subr.bf16.mxu1 %v6021_v6 }
 0x4ca   :  { %5398 = vmatprep.subr.bf16.mxu0 %v6021_v6 }
 0x4cd   :  { %5400 = vmatpush3.bf16.msra.mxu0 %v5399_v61  ;;  %v4296_v61 = vld [vmem:[%s7638_s7 + $0x1a8] sm:$0xff] }
 0x4ce   :  { %5425 = vmatprep.subr.bf16.mxu0 %v6021_v6 }
 0x561   :  { %v4342_v62 = vpop.f32.mrb[20].mxu0 }
 0x562   :  { %v4343_v25 = vpop.f32.mrb[21].mxu0 }
 0x563   :  { %v4344_v1 = vadd.f32 %v4343_v25, %v4342_v62  ;;  %v5429_v25 = vpack.c.bf16 %v4278_v60, %v4277_v52  ;;  %v3740_v52 = vld [vmem:[#allocation18 + $0x58] sm:$0xff]  ;;  %v3739_v60 = vld [vmem:[#allocation18 + $0x50] sm:$0xff] }
 0x565   :  { %v4345_v57 = vpop.f32.mrb[22].mxu0 }
 0x566   :  { %v4346_v2 = vpop.f32.mrb[23].mxu0 }
 0x567   :  { %v4347_v50 = vadd.f32 %v4346_v2, %v4345_v57  ;;  %v4279_v57 = vld [vmem:[%s7638_s7 + $0x120] sm:$0xff] }
 0x569   :  { %v4348_v3 = vpop.f32.mrb[24].mxu0  ;;  %v4430_v28 = vpop.f32.mrb[12].mxu1 }
 0x56a   :  { %v4349_v26 = vpop.f32.mrb[25].mxu0  ;;  %v4431_v5 = vpop.f32.mrb[13].mxu1 }
 0x56b   :  { %v4350_v21 = vadd.f32 %v4349_v26, %v4348_v3  ;;  %v4432_v44 = vadd.f32 %v4431_v5, %v4430_v28  ;;  %v4297_v3 = vld [vmem:[%s7638_s7 + $0x1b0] sm:$0xff]  ;;  %v4298_v28 = vld [vmem:[%s7638_s7 + $0x1b8] sm:$0xff] }
 0x56c   :  { %v5459_v5 = vpack.c.bf16 %v4298_v28, %v4297_v3 }
 0x56d   :  { %v4351_v59 = vpop.f32.mrb[26].mxu0  ;;  %v4433_v48 = vpop.f32.mrb[14].mxu1 }
 0x56e   :  { %v4352_v58 = vpop.f32.mrb[27].mxu0  ;;  %v4434_v63 = vpop.f32.mrb[15].mxu1 }
 0x56f   :  { %v4353_v4 = vadd.f32 %v4352_v58, %v4351_v59  ;;  %v4435_v8 = vadd.f32 %v4434_v63, %v4433_v48  ;;  %v4299_v59 = vld [vmem:[%s7638_s7 + $0x1c0] sm:$0xff]  ;;  %v4300_v48 = vld [vmem:[%s7638_s7 + $0x1c8] sm:$0xff] }
 0x570   :  { %v5462_v63 = vpack.c.bf16 %v4300_v48, %v4299_v59  ;;  %v3752_v59 = vld [vmem:[#allocation18 + $0xb8] sm:$0xff] }
 0x571   :  { %v4436_v27 = vpop.f32.mrb[16].mxu1 }
 0x572   :  { %v4437_v13 = vpop.f32.mrb[17].mxu1 }
 0x573   :  { %v4438_v36 = vadd.f32 %v4437_v13, %v4436_v27  ;;  %v4301_v27 = vld [vmem:[%s7638_s7 + $0x1d0] sm:$0xff]  ;;  %v4302_v13 = vld [vmem:[%s7638_s7 + $0x1d8] sm:$0xff] }
 0x575   :  { %v4439_v42 = vpop.f32.mrb[18].mxu1 }
 0x576   :  { %v4440_v10 = vpop.f32.mrb[19].mxu1 }
 0x577   :  { %v4441_v35 = vadd.f32 %v4440_v10, %v4439_v42  ;;  %v5465_v42 = vpack.c.bf16 %v4302_v13, %v4301_v27  ;;  %v4285_v10 = vld [vmem:[%s7638_s7 + $0x150] sm:$0xff]  ;;  %v3756_v27 = vld [vmem:[#allocation18 + $0xd8] sm:$0xff] }
 0x581   :  { %v4386_v47 = vpop.f32.mrb[28].mxu0 }
 0x582   :  { %v4387_v41 = vpop.f32.mrb[29].mxu0 }
 0x583   :  { %v4388_v22 = vadd.f32 %v4387_v41, %v4386_v47  ;;  %v4303_v47 = vld [vmem:[%s7638_s7 + $0x1e0] sm:$0xff]  ;;  %v4304_v41 = vld [vmem:[%s7638_s7 + $0x1e8] sm:$0xff] }
 0x585   :  { %v3196_v11 = vadd.f32 %v4388_v22, %v4344_v1  ;;  %v4389_v30 = vpop.f32.mrb[30].mxu0  ;;  %v5456_v1 = vpack.c.bf16 %v4296_v61, %v4295_v53  ;;  %v3742_v53 = vld [vmem:[#allocation18 + $0x68] sm:$0xff]  ;;  %v3744_v61 = vld [vmem:[#allocation18 + $0x78] sm:$0xff] }
 0x586   :  { %v4390_v34 = vpop.f32.mrb[31].mxu0 }
 0x587   :  { %v3334_v16 = vadd.f32 %v4432_v44, %v3196_v11  ;;  %v4391_v46 = vadd.f32 %v4390_v34, %v4389_v30  ;;  %v4282_v44 = vld [vmem:[%s7638_s7 + $0x138] sm:$0xff]  ;;  %v5468_v11 = vpack.c.bf16 %v4304_v41, %v4303_v47  ;;  %v4287_v30 = vld [vmem:[%s7638_s7 + $0x160] sm:$0xff]  ;;  %v4288_v34 = vld [vmem:[%s7638_s7 + $0x168] sm:$0xff] }
 0x588   :  { %v5444_v31 = vpack.c.bf16 %v4288_v34, %v4287_v30  ;;  %v3760_v47 = vld [vmem:[#allocation18 + $0xf8] sm:$0xff]  ;;  %v3866_v34 = vld [vmem:[#allocation21 + $0x80] sm:$0xff] }
 0x589   :  { %v3353_v17 = vadd.f32 %v7444_v12, %v3334_v16  ;;  %v3197_v18 = vadd.f32 %v4391_v46, %v4347_v50  ;;  %v4392_v19 = vpop.f32.mrb[32].mxu0  ;;  %v4280_v50 = vld [vmem:[%s7638_s7 + $0x128] sm:$0xff]  ;;  %v4305_v16 = vld [vmem:[%s7638_s7 + $0x1f0] sm:$0xff]  ;;  %v4306_v46 = vld [vmem:[%s7638_s7 + $0x1f8] sm:$0xff] }
 0x58a   :  { %v4393_v45 = vpop.f32.mrb[33].mxu0  ;;  %v5432_v26 = vpack.c.bf16 %v4280_v50, %v4279_v57  ;;  %v5471_v49 = vpack.c.bf16 %v4306_v46, %v4305_v16  ;;  %v3743_v57 = vld [vmem:[#allocation18 + $0x70] sm:$0xff]  ;;  %v3748_v50 = vld [vmem:[#allocation18 + $0x98] sm:$0xff]  ;;  %v3850_v46 = vld [vmem:[#allocation21] sm:$0xff] }
 0x58b   :  { %v3357_v32 = vmax.f32 %v3353_v17, 0.0  ;;  %v3335_v33 = vadd.f32 %v4435_v8, %v3197_v18  ;;  %v4394_v38 = vadd.f32 %v4393_v45, %v4392_v19  ;;  %v4284_v8 = vld [vmem:[%s7638_s7 + $0x148] sm:$0xff]  ;;  %v4289_v18 = vld [vmem:[%s7638_s7 + $0x170] sm:$0xff]  ;;  %v4290_v19 = vld [vmem:[%s7638_s7 + $0x178] sm:$0xff] }
 0x58c   :  { %v5447_v45 = vpack.c.bf16 %v4290_v19, %v4289_v18  ;;  %v3867_v16 = vld [vmem:[#allocation21 + $0x88] sm:$0xff]  ;;  %v3869_v18 = vld [vmem:[#allocation21 + $0x98] sm:$0xff] }
 0x58d   :  { %v3354_v37 = vadd.f32 %v7444_v12, %v3335_v33  ;;  %v3198_v29 = vadd.f32 %v4394_v38, %v4350_v21  ;;  %v4395_v14 = vpop.f32.mrb[34].mxu0  ;;  %4630 = vmatmul.mubr.f32.vlgmr.msra.gmra.mrb[20].mxu1 %v3357_v32  ;;  %v4281_v21 = vld [vmem:[%s7638_s7 + $0x130] sm:$0xff]  ;;  %v3732_v38 = vld [vmem:[#allocation18 + $0x18] sm:$0xff] }
 0x58e   :  { %5451 = vmatpush3.bf16.msra.mxu1 %v5450_v23  ;;  %v4396_v39 = vpop.f32.mrb[35].mxu0  ;;  %4699 = vmatprep.mubr.msk.f32.mxu1 %vm6022_vm0, %v6020_v0  ;;  %v5435_v58 = vpack.c.bf16 %v4282_v44, %v4281_v21  ;;  %v3730_v33 = vld [vmem:[#allocation18 + $0x8] sm:$0xff] }
 0x58f   :  { %v3358_v54 = vmax.f32 %v3354_v37, 0.0  ;;  %v7471_v7 = vadd.f32 %v4438_v36, %v3198_v29  ;;  %v4397_v20 = vadd.f32 %v4396_v39, %v4395_v14  ;;  %5452 = vmatprep.subr.bf16.mxu1 %v6021_v6  ;;  %v5473_v43 = vpack.c.bf16 %v3732_v38, %v3730_v33  ;;  %v3734_v37 = vld [vmem:[#allocation18 + $0x28] sm:$0xff]  ;;  %v3736_v29 = vld [vmem:[#allocation18 + $0x38] sm:$0xff] }
 0x590   :  { %v5475_v14 = vpack.c.bf16 %v3731_v15, %v3729_v40  ;;  %v5477_v39 = vpack.c.bf16 %v3736_v29, %v3734_v37  ;;  %v3750_v44 = vld [vmem:[#allocation18 + $0xa8] sm:$0xff]  ;;  %v3872_v37 = vld [vmem:[#allocation21 + $0xb0] sm:$0xff]  ;;  %v3873_v29 = vld [vmem:[#allocation21 + $0xb8] sm:$0xff] }
 0x591   :  { %v3199_v62 = vadd.f32 %v4397_v20, %v4353_v4  ;;  %4595 = vmatmul.mubr.f32.vlgmr.msra.gmra.mrb[36].mxu0 %v3358_v54  ;;  %v4283_v4 = vld [vmem:[%s7638_s7 + $0x140] sm:$0xff]  ;;  %v3355_v23 = vadd.f32 %v7444_v12, %v7471_v7  ;;  %v3737_v20 = vld [vmem:[#allocation18 + $0x40] sm:$0xff]  ;;  %v5493_v48 = vpack.c.bf16 %v3752_v59, %v3750_v44  ;;  %v3871_v33 = vld [vmem:[#allocation21 + $0xa8] sm:$0xff] }
 0x592   :  { %5427 = vmatpush3.bf16.msra.mxu0 %v5426_v9  ;;  %5454 = vmatpush3.bf16.msra.mxu1 %v5453_v51  ;;  %v5438_v36 = vpack.c.bf16 %v4284_v8, %v4283_v4  ;;  %v3733_v9 = vld [vmem:[#allocation18 + $0x20] sm:$0xff]  ;;  %v3738_v51 = vld [vmem:[#allocation18 + $0x48] sm:$0xff] }
 0x593   :  { %v3337_v2 = vadd.f32 %v4441_v35, %v3199_v62  ;;  %5428 = vmatprep.subr.bf16.mxu0 %v6021_v6  ;;  %5455 = vmatprep.subr.bf16.mxu1 %v6021_v6  ;;  %v4286_v35 = vld [vmem:[%s7638_s7 + $0x158] sm:$0xff]  ;;  %v3359_v32 = vmax.f32 %v3355_v23, 0.0  ;;  %v5481_v7 = vpack.c.bf16 %v3740_v52, %v3738_v51  ;;  %v5483_v62 = vpack.c.bf16 %v3739_v60, %v3737_v20  ;;  %v3754_v8 = vld [vmem:[#allocation18 + $0xc8] sm:$0xff] }
 0x594   :  { %4664 = vmatprep.mubr.msk.f32.mxu0 %vm6022_vm0, %v6020_v0  ;;  %v5441_v22 = vpack.c.bf16 %v4286_v35, %v4285_v10  ;;  %v5497_v13 = vpack.c.bf16 %v3756_v27, %v3754_v8  ;;  %v3758_v35 = vld [vmem:[#allocation18 + $0xe8] sm:$0xff]  ;;  %v3852_v23 = vld [vmem:[#allocation21 + $0x10] sm:$0xff]  ;;  %v4307_v27 = vld [vmem:[#allocation16] ss:$0 sm:$0xff] }
 0x595   :  { %v3356_v17 = vadd.f32 %v7444_v12, %v3337_v2  ;;  %v3735_v12 = vld [vmem:[#allocation18 + $0x30] sm:$0xff]  ;;  %v3746_v2 = vld [vmem:[#allocation18 + $0x88] sm:$0xff]  ;;  %v5501_v41 = vpack.c.bf16 %v3760_v47, %v3758_v35 }
 0x596   :  { %5430 = vmatpush3.bf16.msra.mxu0 %v5429_v25  ;;  %5457 = vmatpush3.bf16.msra.mxu1 %v5456_v1  ;;  %v5479_v54 = vpack.c.bf16 %v3735_v12, %v3733_v9  ;;  %v5485_v25 = vpack.c.bf16 %v3744_v61, %v3742_v53  ;;  %v3741_v1 = vld [vmem:[#allocation18 + $0x60] sm:$0xff]  ;;  %v5489_v28 = vpack.c.bf16 %v3748_v50, %v3746_v2  ;;  %v3855_v15 = vld [vmem:[#allocation21 + $0x28] sm:$0xff]  ;;  %v3856_v9 = vld [vmem:[#allocation21 + $0x30] sm:$0xff] }
 0x597   :  { %5431 = vmatprep.subr.bf16.mxu0 %v6021_v6  ;;  %5458 = vmatprep.subr.bf16.mxu1 %v6021_v6  ;;  %v3360_v24 = vmax.f32 %v3356_v17, 0.0  ;;  %v5487_v3 = vpack.c.bf16 %v3743_v57, %v3741_v1  ;;  %v3868_v17 = vld [vmem:[#allocation21 + $0x90] sm:$0xff]  ;;  %v3857_v12 = vld [vmem:[#allocation21 + $0x38] sm:$0xff]  ;;  %v3874_v51 = vld [vmem:[#allocation21 + $0xc0] sm:$0xff] }
 0x598   :  { %v3875_v52 = vld [vmem:[#allocation21 + $0xc8] sm:$0xff]  ;;  %v3858_v20 = vld [vmem:[#allocation21 + $0x40] sm:$0xff]  ;;  %v3876_v53 = vld [vmem:[#allocation21 + $0xd0] sm:$0xff] }
 0x599   :  { %v3859_v60 = vld [vmem:[#allocation21 + $0x48] sm:$0xff]  ;;  %v3877_v61 = vld [vmem:[#allocation21 + $0xd8] sm:$0xff]  ;;  %v3860_v1 = vld [vmem:[#allocation21 + $0x50] sm:$0xff] }
 0x59a   :  { %5433 = vmatpush3.bf16.msra.mxu0 %v5432_v26  ;;  %5460 = vmatpush3.bf16.msra.mxu1 %v5459_v5  ;;  %v3745_v26 = vld [vmem:[#allocation18 + $0x80] sm:$0xff]  ;;  %v3747_v5 = vld [vmem:[#allocation18 + $0x90] sm:$0xff] }
 0x59b   :  { %5434 = vmatprep.subr.bf16.mxu0 %v6021_v6  ;;  %5461 = vmatprep.subr.bf16.mxu1 %v6021_v6  ;;  %v5491_v21 = vpack.c.bf16 %v3747_v5, %v3745_v26  ;;  %v3861_v57 = vld [vmem:[#allocation21 + $0x58] sm:$0xff]  ;;  %v3878_v2 = vld [vmem:[#allocation21 + $0xe0] sm:$0xff]  ;;  %v3879_v50 = vld [vmem:[#allocation21 + $0xe8] sm:$0xff] }
 0x59c   :  { %v3863_v35 = vld [vmem:[#allocation21 + $0x68] sm:$0xff] }
 0x59e   :  { %5436 = vmatpush3.bf16.msra.mxu0 %v5435_v58  ;;  %5463 = vmatpush3.bf16.msra.mxu1 %v5462_v63  ;;  %v3749_v58 = vld [vmem:[#allocation18 + $0xa0] sm:$0xff]  ;;  %v3751_v63 = vld [vmem:[#allocation18 + $0xb0] sm:$0xff] }
 0x59f   :  { %5437 = vmatprep.subr.bf16.mxu0 %v6021_v6  ;;  %5464 = vmatprep.subr.bf16.mxu1 %v6021_v6  ;;  %v5495_v4 = vpack.c.bf16 %v3751_v63, %v3749_v58 }
 0x5a2   :  { %5439 = vmatpush3.bf16.msra.mxu0 %v5438_v36  ;;  %5466 = vmatpush3.bf16.msra.mxu1 %v5465_v42  ;;  %v3753_v36 = vld [vmem:[#allocation18 + $0xc0] sm:$0xff]  ;;  %v3755_v42 = vld [vmem:[#allocation18 + $0xd0] sm:$0xff] }
 0x5a3   :  { %5440 = vmatprep.subr.bf16.mxu0 %v6021_v6  ;;  %5467 = vmatprep.subr.bf16.mxu1 %v6021_v6  ;;  %v5499_v10 = vpack.c.bf16 %v3755_v42, %v3753_v36 }
 0x5a6   :  { %5442 = vmatpush3.bf16.msra.mxu0 %v5441_v22  ;;  %5469 = vmatpush3.bf16.msra.mxu1 %v5468_v11  ;;  %v3757_v22 = vld [vmem:[#allocation18 + $0xe0] sm:$0xff]  ;;  %v3759_v11 = vld [vmem:[#allocation18 + $0xf0] sm:$0xff] }
 0x5a7   :  { %5443 = vmatprep.subr.bf16.mxu0 %v6021_v6  ;;  %5470 = vmatprep.subr.bf16.mxu1 %v6021_v6  ;;  %v5503_v30 = vpack.c.bf16 %v3759_v11, %v3757_v22  ;;  %v3881_v22 = vld [vmem:[#allocation21 + $0xf8] sm:$0xff] }
 0x5aa   :  { %5445 = vmatpush3.bf16.msra.mxu0 %v5444_v31  ;;  %5472 = vmatpush3.bf16.msra.mxu1 %v5471_v49  ;;  %v5505_v31 = vpack.c.bf16 %v3867_v16, %v3866_v34  ;;  %v3851_v49 = vld [vmem:[#allocation21 + $0x8] sm:$0xff]  ;;  %v3865_v34 = vld [vmem:[#allocation21 + $0x78] sm:$0xff] }
 0x5ab   :  { %5446 = vmatprep.subr.bf16.mxu0 %v6021_v6  ;;  %v5507_v19 = vpack.c.bf16 %v3851_v49, %v3850_v46  ;;  %v3962_v46 = vld [vmem:[%s7644_s13] sm:$0xff] }
 0x5ac   :  { %5506 = vmatprep.subr.bf16.mxu1 %v5505_v31  ;;  %v3964_v31 = vld [vmem:[%s7644_s13 + $0x10] sm:$0xff] }
 0x5ad   :  { %4700 = vmatmul.mubr.f32.vlgmr.msra.gmra.mrb[22].mxu1 %v3360_v24  ;;  %v3853_v24 = vld [vmem:[#allocation21 + $0x18] sm:$0xff] }
 0x5ae   :  { %5448 = vmatpush3.bf16.msra.mxu0 %v5447_v45  ;;  %v5509_v45 = vpack.c.bf16 %v3869_v18, %v3868_v17  ;;  %5508 = vmatpush3.bf16.msra.mxu1 %v5507_v19  ;;  %v5511_v38 = vpack.c.bf16 %v3853_v24, %v3852_v23  ;;  %v3965_v17 = vld [vmem:[%s7644_s13 + $0x18] sm:$0xff]  ;;  %v3966_v19 = vld [vmem:[%s7644_s13 + $0x20] sm:$0xff]  ;;  %v3968_v24 = vld [vmem:[%s7644_s13 + $0x30] sm:$0xff] }
 0x5af   :  { %5474 = vmatprep.subr.bf16.mxu0 %v5473_v43  ;;  %v3854_v43 = vld [vmem:[#allocation21 + $0x20] sm:$0xff]  ;;  %v5541_v18 = vpack.c.bf16 %v3965_v17, %v3964_v31 }
 0x5b0   :  { %5510 = vmatprep.subr.bf16.mxu1 %v5509_v45  ;;  %v3967_v45 = vld [vmem:[%s7644_s13 + $0x28] sm:$0xff] }
 0x5b1   :  { %4665 = vmatmul.mubr.f32.vlgmr.msra.gmra.mrb[38].mxu0 %v3359_v32  ;;  %v3870_v32 = vld [vmem:[#allocation21 + $0xa0] sm:$0xff]  ;;  %v5544_v23 = vpack.c.bf16 %v3967_v45, %v3966_v19 }
 0x5b2   :  { %3837 = vmatprep.mubr.f32.mxu0 %v6020_v0  ;;  %5476 = vmatpush1.bf16.msra.mxu0 %v5475_v14  ;;  %v5513_v40 = vpack.c.bf16 %v3871_v33, %v3870_v32  ;;  %v5515_v14 = vpack.c.bf16 %v3855_v15, %v3854_v43  ;;  %v3969_v32 = vld [vmem:[%s7644_s13 + $0x38] sm:$0xff]  ;;  %v3972_v15 = vld [vmem:[%s7644_s13 + $0x50] sm:$0xff] }
 0x5b3   :  { %5478 = vmatprep.subr.bf16.mxu0 %v5477_v39  ;;  %5512 = vmatpush3.bf16.msra.mxu1 %v5511_v38  ;;  %v5517_v39 = vpack.c.bf16 %v3873_v29, %v3872_v37  ;;  %v5547_v33 = vpack.c.bf16 %v3969_v32, %v3968_v24  ;;  %v3970_v38 = vld [vmem:[%s7644_s13 + $0x40] sm:$0xff]  ;;  %v3973_v37 = vld [vmem:[%s7644_s13 + $0x58] sm:$0xff] }
 0x5b4   :  { %5514 = vmatprep.subr.bf16.mxu1 %v5513_v40  ;;  %v3971_v40 = vld [vmem:[%s7644_s13 + $0x48] sm:$0xff]  ;;  %v5553_v29 = vpack.c.bf16 %v3973_v37, %v3972_v15 }
 0x5b5   :  { %v5550_v43 = vpack.c.bf16 %v3971_v40, %v3970_v38 }
 0x5b6   :  { %5480 = vmatpush1.bf16.msra.mxu0 %v5479_v54  ;;  %v5519_v54 = vpack.c.bf16 %v3857_v12, %v3856_v9 }
 0x5b7   :  { %5482 = vmatprep.subr.bf16.mxu0 %v5481_v7  ;;  %5516 = vmatpush3.bf16.msra.mxu1 %v5515_v14  ;;  %v5521_v7 = vpack.c.bf16 %v3875_v52, %v3874_v51  ;;  %v3761_v14 = vld [vmem:[#allocation19] sm:$0x3] }
 0x5b8   :  { %5518 = vmatprep.subr.bf16.mxu1 %v5517_v39  ;;  %v3766_v39 = vrot.slane %v3761_v14, %v7143_v55  ;;  %v3770_v9 = vrot.slane %v3761_v14, %v7145_v56  ;;  %v3976_v55 = vld [vmem:[%s7644_s13 + $0x70] sm:$0xff]  ;;  %v3977_v56 = vld [vmem:[%s7644_s13 + $0x78] sm:$0xff] }
 0x5ba   :  { %5484 = vmatpush1.bf16.msra.mxu0 %v5483_v62  ;;  %v5523_v62 = vpack.c.bf16 %v3859_v60, %v3858_v20  ;;  %v3974_v60 = vld [vmem:[%s7644_s13 + $0x60] sm:$0xff] }
 0x5bb   :  { %5486 = vmatprep.subr.bf16.mxu0 %v5485_v25  ;;  %5520 = vmatpush3.bf16.msra.mxu1 %v5519_v54  ;;  %v5525_v25 = vpack.c.bf16 %v3877_v61, %v3876_v53  ;;  %v3975_v53 = vld [vmem:[%s7644_s13 + $0x68] sm:$0xff] }
 0x5bc   :  { %5522 = vmatprep.subr.bf16.mxu1 %v5521_v7  ;;  %v5556_v61 = vpack.c.bf16 %v3975_v53, %v3974_v60 }
 0x5be   :  { %5488 = vmatpush1.bf16.msra.mxu0 %v5487_v3  ;;  %v5527_v3 = vpack.c.bf16 %v3861_v57, %v3860_v1  ;;  %v4308_v1 = vld [vmem:[#allocation22] ss:$0 sm:$0xff] }
 0x5bf   :  { %5490 = vmatprep.subr.bf16.mxu0 %v5489_v28  ;;  %5524 = vmatpush3.bf16.msra.mxu1 %v5523_v62  ;;  %v5529_v28 = vpack.c.bf16 %v3879_v50, %v3878_v2  ;;  %v5559_v62 = vpack.c.bf16 %v3977_v56, %v3976_v55 }
 0x5c0   :  { %5526 = vmatprep.subr.bf16.mxu1 %v5525_v25 }
 0x5c2   :  { %5492 = vmatpush1.bf16.msra.mxu0 %v5491_v21 }
 0x5c3   :  { %5494 = vmatprep.subr.bf16.mxu0 %v5493_v48  ;;  %5528 = vmatpush3.bf16.msra.mxu1 %v5527_v3 }
 0x5c4   :  { %5530 = vmatprep.subr.bf16.mxu1 %v5529_v28  ;;  %v4309_v28 = vld [vmem:[#allocation24] ss:$0 sm:$0xff] }
 0x5c6   :  { %5496 = vmatpush1.bf16.msra.mxu0 %v5495_v4 }
 0x5c7   :  { %5498 = vmatprep.subr.bf16.mxu0 %v5497_v13 }
 0x5ca   :  { %5500 = vmatpush1.bf16.msra.mxu0 %v5499_v10  ;;  %v3862_v10 = vld [vmem:[#allocation21 + $0x60] sm:$0xff] }
 0x5cb   :  { %5502 = vmatprep.subr.bf16.mxu0 %v5501_v41  ;;  %v5531_v47 = vpack.c.bf16 %v3863_v35, %v3862_v10  ;;  %v3880_v41 = vld [vmem:[#allocation21 + $0xf0] sm:$0xff] }
 0x5cc   :  { %v5533_v11 = vpack.c.bf16 %v3881_v22, %v3880_v41 }
 0x5cd   :  { %5532 = vmatpush3.bf16.msra.mxu1 %v5531_v47 }
 0x5ce   :  { %5504 = vmatpush1.bf16.msra.mxu0 %v5503_v30  ;;  %v3864_v30 = vld [vmem:[#allocation21 + $0x70] sm:$0xff]  ;;  %5534 = vmatprep.subr.bf16.mxu1 %v5533_v11 }
 0x5cf   :  { %5537 = vmatprep.subr.bf16.mxu0 %v6021_v6  ;;  %v5535_v16 = vpack.c.bf16 %v3865_v34, %v3864_v30 }
 0x5d1   :  { %5536 = vmatpush3.bf16.msra.mxu1 %v5535_v16 }
 0x660   :  { %v3536_v26 = vpop.f32.mrb[20].mxu1 }
 0x661   :  { %v4631_v5 = vpop.f32.mrb[21].mxu1 }
 0x664   :  { %v3466_v21 = vpop.f32.mrb[36].mxu0 }
 0x665   :  { %v3537_v44 = vadd.f32 %v3536_v26, %v3466_v21  ;;  %v4596_v59 = vpop.f32.mrb[37].mxu0 }
 0x680   :  { %v3713_v48 = vpop.f32.mrb[22].mxu1 }
 0x681   :  { %v4701_v58 = vpop.f32.mrb[23].mxu1 }
 0x684   :  { %v3624_v63 = vpop.f32.mrb[38].mxu0 }
 0x685   :  { %v3628_v4 = vadd.f32 %v3624_v63, %v3537_v44  ;;  %v4666_v8 = vpop.f32.mrb[39].mxu0 }
 0x687   :  { %v3717_v13 = vadd.f32 %v3713_v48, %v3628_v4 }
 0x689   :  { %v3725_v36 = vadd.f32 %v4307_v27, %v3717_v13 }
 0x68b   :  { %v3726_v42 = vmax.f32 %v3725_v36, 0.0 }
 0x68d   :  { %3838 = vmatmul.mubr.f32.vlgmr.msra.gmra.mrb[40].mxu0 %v3726_v42 }
 0x68e   :  { %4734 = vmatprep.mubr.msk.f32.mxu0 %vm6022_vm0, %v6020_v0  ;;  %v3963_v0 = vld [vmem:[%s7644_s13 + $0x8] sm:$0xff] }
 0x68f   :  { %v5538_v49 = vpack.c.bf16 %v3963_v0, %v3962_v46 }
 0x691   :  { %5539 = vmatpush3.bf16.msra.mxu0 %v5538_v49 }
 0x692   :  { %5540 = vmatprep.subr.bf16.mxu0 %v6021_v6 }
 0x695   :  { %5542 = vmatpush3.bf16.msra.mxu0 %v5541_v18 }
 0x696   :  { %5543 = vmatprep.subr.bf16.mxu0 %v6021_v6 }
 0x699   :  { %5545 = vmatpush3.bf16.msra.mxu0 %v5544_v23 }
 0x69a   :  { %5546 = vmatprep.subr.bf16.mxu0 %v6021_v6 }
 0x69d   :  { %5548 = vmatpush3.bf16.msra.mxu0 %v5547_v33 }
 0x69e   :  { %5549 = vmatprep.subr.bf16.mxu0 %v6021_v6 }
 0x6a1   :  { %5551 = vmatpush3.bf16.msra.mxu0 %v5550_v43 }
 0x6a2   :  { %5552 = vmatprep.subr.bf16.mxu0 %v6021_v6 }
 0x6a5   :  { %5554 = vmatpush3.bf16.msra.mxu0 %v5553_v29 }
 0x6a6   :  { %5555 = vmatprep.subr.bf16.mxu0 %v6021_v6 }
 0x6a9   :  { %5557 = vmatpush3.bf16.msra.mxu0 %v5556_v61 }
 0x6aa   :  { %5558 = vmatprep.subr.bf16.mxu0 %v6021_v6 }
 0x6ad   :  { %5560 = vmatpush3.bf16.msra.mxu0 %v5559_v62 }
 0x760   :  { %v3839_v12 = vpop.f32.mrb[40].mxu0 }
 0x761   :  { %v3840_v51 = vadd.f32 %v3839_v12, %v3766_v39  ;;  %v3841_v52 = vpop.f32.mrb[41].mxu0 }
 0x762   :  { %v3842_v54 = vadd.f32 %v3841_v52, %v3770_v9 }
 0x763   :  { %v3844_v20 = vmax.f32 %v3840_v51, 0.0 }
 0x764   :  { %v3845_v7 = vmax.f32 %v3842_v54, 0.0 }
 0x766   :  { %3953 = vmatprep.mubr.f32.mxu1 %v3845_v7 }
 0x767   :  { %3954 = vmatmul.mubr.f32.vlgmr.msra.gmra.mrb[24].mxu1 %v3844_v20 }
 0x83a   :  { %v4542_v25 = vpop.f32.mrb[24].mxu1 }
 0x83b   :  { %v4543_v57 = vpop.f32.mrb[25].mxu1 }
 0x83c   :  { %v4544_v2 = vadd.f32 %v4543_v57, %v4542_v25 }
 0x83e   :  { %v3956_v50 = vadd.f32 %v4544_v2, %v4308_v1 }
 0x840   :  { %v3959_v3 = vmax.f32 %v3956_v50, 0.0 }
 0x842   :  { %4735 = vmatmul.mubr.f32.vlgmr.msra.gmra.mrb[42].mxu0 %v3959_v3 }
 0x915   :  { %v4051_v26 = vpop.f32.mrb[42].mxu0 }
 0x916   :  { %v4052_v6 = vadd.f32 %v4309_v28, %v4051_v26  ;;  %v4736_v5 = vpop.f32.mrb[43].mxu0 }
 0x918   :  { %4055 = vst [vmem:[%s7646_s15] sm:$0xff] %v4052_v6 }
 0x919   :  { %4060 = vsyncpa [#allocation9], 1 }
 0x91a   :  { %4061 = vsyncpa [#allocation11], 1 }
 0x91b   :  { %4062 = vsyncpa [#allocation14], 1 }
 0x91c   :  { %4063 = vsyncpa [#allocation17], 1 }
 0x91d   :  { %4064 = vsyncpa [#allocation20], 1 }
 0x91e   :  { %4065 = vsyncpa [#allocation23], 1 }

</bundles_post_ra>
